<compile_context>
chip_gen: v7x
topology: tpu7x:2x2x1
jax: 0.10.0
libtpu: 0.0.40
codegen_flags: <defaults>
</compile_context>

<pallas_src>
import jax
import jax.numpy as jnp
from jax.experimental import pallas as pl
from jax.experimental.pallas import tpu as pltpu

# ---- small BERT-like config (stand-in for roberta-large, same structure) ----
VOCAB = 100
SEQ = 16
HIDDEN = 128
N_HEADS = 4
HEAD_DIM = HIDDEN // N_HEADS
FFN = 256
N_LAYERS = 2
N_CLASSES = 2
BATCH = 2
CLS_PAD = 128          # classifier output padded to one full lane dim


# ----------------------------- in-kernel helpers ------------------------------
def _ln(x_f32, g, b, eps=1e-5):
    mean = jnp.mean(x_f32, axis=-1, keepdims=True)
    var = jnp.mean(jnp.square(x_f32 - mean), axis=-1, keepdims=True)
    return (x_f32 - mean) * jax.lax.rsqrt(var + eps) * g + b


# ----------------------------- Pallas kernels --------------------------------
def _emb_ln_kernel(x_ref, g_ref, b_ref, o_ref):
    x = x_ref[...].astype(jnp.float32)
    o_ref[...] = _ln(x, g_ref[...], b_ref[...]).astype(o_ref.dtype)


def emb_layernorm(x, g, b):
    """Embedding LayerNorm: [B*S, H] f32 -> [B*S, H] bf16."""
    M, H = x.shape
    return pl.pallas_call(
        _emb_ln_kernel,
        out_shape=jax.ShapeDtypeStruct((M, H), jnp.bfloat16),
        grid=(M // SEQ,),
        in_specs=[
            pl.BlockSpec((SEQ, H), lambda i: (i, 0)),
            pl.BlockSpec((1, H), lambda i: (0, 0)),
            pl.BlockSpec((1, H), lambda i: (0, 0)),
        ],
        out_specs=pl.BlockSpec((SEQ, H), lambda i: (i, 0)),
        compiler_params=pltpu.CompilerParams(dimension_semantics=("parallel",)),
    )(x, g, b)


def _encoder_layer_kernel(
    x_ref, bias_ref,
    wqkv_ref, bqkv_ref, wo_ref, bo_ref,
    ln1g_ref, ln1b_ref,
    w1_ref, b1_ref, w2_ref, b2_ref,
    ln2g_ref, ln2b_ref,
    o_ref,
    qkv_sc, attn_sc,
):
    # One grid step == one batch element: x is [S, H] bf16.
    x = x_ref[...]
    xf = x.astype(jnp.float32)

    # Fused QKV projection: one MXU pass, N = 3*H (softmax scale already folded
    # into the Q columns of wqkv/bqkv at parameter-prep time).
    qkv = jnp.dot(x, wqkv_ref[...], preferred_element_type=jnp.float32)
    qkv = qkv + bqkv_ref[...]
    qkv_sc[...] = qkv.astype(qkv_sc.dtype)              # bf16 staging for head slices

    bias = bias_ref[0]                                   # [1, S] additive mask bias

    # Multi-head self-attention, heads unrolled inside the same kernel.
    # Heads live in contiguous 32-lane column slices, so no split/merge-head
    # transposes are ever materialized.
    for h in range(N_HEADS):
        c0, c1 = h * HEAD_DIM, (h + 1) * HEAD_DIM
        q = qkv_sc[:, c0:c1]                              # [S, Dh] bf16 (pre-scaled)
        k = qkv_sc[:, HIDDEN + c0:HIDDEN + c1]
        v = qkv_sc[:, 2 * HIDDEN + c0:2 * HIDDEN + c1]
        # contract last dims -> no explicit k.T transpose through the XLU
        s = jax.lax.dot_general(
            q, k, dimension_numbers=(((1,), (1,)), ((), ())),
            preferred_element_type=jnp.float32)           # [S, S] f32
        s = s + bias
        s = s - jnp.max(s, axis=-1, keepdims=True)
        p = jnp.exp(s)
        p = p * pl.reciprocal(jnp.sum(p, axis=-1, keepdims=True), approx=True)
        o_h = jnp.dot(p.astype(jnp.bfloat16), v,
                      preferred_element_type=jnp.float32)  # [S, Dh] f32
        attn_sc[:, c0:c1] = o_h.astype(attn_sc.dtype)

    # Output projection + residual + LN1 (post-LN, as in BERT/RoBERTa).
    attn = jnp.dot(attn_sc[...], wo_ref[...],
                   preferred_element_type=jnp.float32) + bo_ref[...]
    h1 = _ln(xf + attn, ln1g_ref[...], ln1b_ref[...])

    # Feed-forward + residual + LN2.
    ff = jnp.dot(h1.astype(jnp.bfloat16), w1_ref[...],
                 preferred_element_type=jnp.float32) + b1_ref[...]
    # TODO(synk): HF BERT/RoBERTa uses exact erf GELU; tanh approximation here.
    ff = jax.nn.gelu(ff)
    ff = jnp.dot(ff.astype(jnp.bfloat16), w2_ref[...],
                 preferred_element_type=jnp.float32) + b2_ref[...]
    out = _ln(h1 + ff, ln2g_ref[...], ln2b_ref[...])

    o_ref[...] = out.astype(o_ref.dtype)


def encoder_layer(x, bias, lp):
    """Whole transformer layer as a single pallas_call. x: [B*S, H] bf16."""
    M, H = x.shape
    B = M // SEQ

    def wspec(shape):
        return pl.BlockSpec(shape, lambda b: (0,) * len(shape))

    return pl.pallas_call(
        _encoder_layer_kernel,
        out_shape=jax.ShapeDtypeStruct((M, H), jnp.bfloat16),
        grid=(B,),
        in_specs=[
            pl.BlockSpec((SEQ, H), lambda b: (b, 0)),        # x (per-batch block)
            pl.BlockSpec((1, 1, SEQ), lambda b: (b, 0, 0)),  # additive mask bias
            wspec((H, 3 * H)), wspec((1, 3 * H)),            # wqkv, bqkv
            wspec((H, H)), wspec((1, H)),                    # wo, bo
            wspec((1, H)), wspec((1, H)),                    # ln1 g, b
            wspec((H, FFN)), wspec((1, FFN)),                # w1, b1
            wspec((FFN, H)), wspec((1, H)),                  # w2, b2
            wspec((1, H)), wspec((1, H)),                    # ln2 g, b
        ],
        out_specs=pl.BlockSpec((SEQ, H), lambda b: (b, 0)),
        scratch_shapes=[
            pltpu.VMEM((SEQ, 3 * HIDDEN), jnp.bfloat16),     # staged QKV
            pltpu.VMEM((SEQ, HIDDEN), jnp.bfloat16),         # merged attention out
        ],
        compiler_params=pltpu.CompilerParams(
            dimension_semantics=("parallel",)),              # megacore over batch (v7x)
    )(x, bias,
      lp["wqkv"], lp["bqkv"], lp["wo"], lp["bo"],
      lp["ln1_g"], lp["ln1_b"],
      lp["w1"], lp["b1"], lp["w2"], lp["b2"],
      lp["ln2_g"], lp["ln2_b"])


def _head_kernel(cls_ref, pw_ref, pb_ref, cw_ref, cb_ref, o_ref):
    cls = cls_ref[...]                                       # [B, H] bf16
    pooled = jnp.tanh(
        jnp.dot(cls, pw_ref[...], preferred_element_type=jnp.float32)
        + pb_ref[...])
    # nn.Dropout -> identity at inference.
    logits = jnp.dot(pooled.astype(jnp.bfloat16), cw_ref[...],
                     preferred_element_type=jnp.float32) + cb_ref[...]
    o_ref[...] = logits                                      # [B, 128] f32 (lane-padded)


def pooler_classifier(cls_tok, pw, pb, cw_pad, cb_pad):
    B, H = cls_tok.shape
    return pl.pallas_call(
        _head_kernel,
        out_shape=jax.ShapeDtypeStruct((B, CLS_PAD), jnp.float32),
        grid=(1,),
        in_specs=[
            pl.BlockSpec((B, H), lambda i: (0, 0)),
            pl.BlockSpec((H, H), lambda i: (0, 0)),
            pl.BlockSpec((1, H), lambda i: (0, 0)),
            pl.BlockSpec((H, CLS_PAD), lambda i: (0, 0)),
            pl.BlockSpec((1, CLS_PAD), lambda i: (0, 0)),
        ],
        out_specs=pl.BlockSpec((B, CLS_PAD), lambda i: (0, 0)),
    )(cls_tok, pw, pb, cw_pad, cb_pad)


# ----------------------------- params -----------------------------------------
def init_params(key):
    keys = iter(jax.random.split(key, 128))

    def w(shape, scale=0.02):
        return (scale * jax.random.normal(next(keys), shape)).astype(jnp.float32)

    zeros = lambda s: jnp.zeros(s, jnp.float32)
    ones = lambda s: jnp.ones(s, jnp.float32)

    params = {
        "word_emb": w((VOCAB, HIDDEN)),
        "pos_emb": w((SEQ, HIDDEN)),
        "emb_ln_g": ones((HIDDEN,)), "emb_ln_b": zeros((HIDDEN,)),
        "layers": [],
        "pool_w": w((HIDDEN, HIDDEN)), "pool_b": zeros((HIDDEN,)),
        "cls_w": w((HIDDEN, N_CLASSES)), "cls_b": zeros((N_CLASSES,)),  # nn.Linear(1024, 2) analogue
    }
    for _ in range(N_LAYERS):
        params["layers"].append({
            "wq": w((HIDDEN, HIDDEN)), "bq": zeros((HIDDEN,)),
            "wk": w((HIDDEN, HIDDEN)), "bk": zeros((HIDDEN,)),
            "wv": w((HIDDEN, HIDDEN)), "bv": zeros((HIDDEN,)),
            "wo": w((HIDDEN, HIDDEN)), "bo": zeros((HIDDEN,)),
            "ln1_g": ones((HIDDEN,)), "ln1_b": zeros((HIDDEN,)),
            "w1": w((HIDDEN, FFN)), "b1": zeros((FFN,)),
            "w2": w((FFN, HIDDEN)), "b2": zeros((HIDDEN,)),
            "ln2_g": ones((HIDDEN,)), "ln2_b": zeros((HIDDEN,)),
        })
    return params


def prepare_params(p):
    """Kernel-ready params: fused QKV (softmax scale folded into the Q slice),
    bf16 matmul weights, f32 biases/LN params, lane-padded classifier head."""
    scale = 1.0 / float(HEAD_DIM) ** 0.5
    out = {
        "word_emb": p["word_emb"],
        "pos_emb": p["pos_emb"],
        "emb_ln_g": p["emb_ln_g"].reshape(1, HIDDEN),
        "emb_ln_b": p["emb_ln_b"].reshape(1, HIDDEN),
        "layers": [],
        "pool_w": p["pool_w"].astype(jnp.bfloat16),
        "pool_b": p["pool_b"].reshape(1, HIDDEN),
        "cls_w": jnp.zeros((HIDDEN, CLS_PAD), jnp.float32)
                   .at[:, :N_CLASSES].set(p["cls_w"]).astype(jnp.bfloat16),
        "cls_b": jnp.zeros((1, CLS_PAD), jnp.float32)
                   .at[0, :N_CLASSES].set(p["cls_b"]),
    }
    for lp in p["layers"]:
        wqkv = jnp.concatenate([lp["wq"] * scale, lp["wk"], lp["wv"]], axis=1)
        bqkv = jnp.concatenate([lp["bq"] * scale, lp["bk"], lp["bv"]], axis=0)
        out["layers"].append({
            "wqkv": wqkv.astype(jnp.bfloat16),
            "bqkv": bqkv.reshape(1, 3 * HIDDEN),
            "wo": lp["wo"].astype(jnp.bfloat16), "bo": lp["bo"].reshape(1, HIDDEN),
            "ln1_g": lp["ln1_g"].reshape(1, HIDDEN), "ln1_b": lp["ln1_b"].reshape(1, HIDDEN),
            "w1": lp["w1"].astype(jnp.bfloat16), "b1": lp["b1"].reshape(1, FFN),
            "w2": lp["w2"].astype(jnp.bfloat16), "b2": lp["b2"].reshape(1, HIDDEN),
            "ln2_g": lp["ln2_g"].reshape(1, HIDDEN), "ln2_b": lp["ln2_b"].reshape(1, HIDDEN),
        })
    return out


# ----------------------------- forward (glue) ----------------------------------
@jax.jit
def bert_classifier_forward(kparams, input_ids, mask):
    B, S = input_ids.shape
    # Embeddings (gather + positional add are XLA glue); LN is a Pallas kernel.
    x = kparams["word_emb"][input_ids] + kparams["pos_emb"][None, :S, :]
    x = emb_layernorm(x.reshape(B * S, HIDDEN),
                      kparams["emb_ln_g"], kparams["emb_ln_b"])      # -> bf16

    # Additive attention bias, computed once per forward (reused by all layers).
    bias = ((1.0 - mask.astype(jnp.float32)) * -1e9).reshape(B, 1, S)

    for lp in kparams["layers"]:
        x = encoder_layer(x, bias, lp)

    # Pooler (tanh(W h_[CLS] + b)) + classifier head, one fused lane-padded kernel.
    cls_tok = x.reshape(B, S, HIDDEN)[:, 0, :]
    logits_pad = pooler_classifier(cls_tok, kparams["pool_w"], kparams["pool_b"],
                                   kparams["cls_w"], kparams["cls_b"])
    return logits_pad[:, :N_CLASSES]


if __name__ == "__main__":
    params = init_params(jax.random.PRNGKey(0))
    kparams = prepare_params(params)

    input_ids = jax.random.randint(jax.random.PRNGKey(1), (BATCH, SEQ), 0, VOCAB)
    # attention_mask: second example has padding on the last half of the sequence
    mask = jnp.ones((BATCH, SEQ), jnp.float32).at[1, SEQ // 2:].set(0.0)

    logits = bert_classifier_forward(kparams, input_ids, mask)
    jax.block_until_ready(logits)
    assert logits.shape == (BATCH, N_CLASSES)
    assert jnp.all(jnp.isfinite(logits))
    print("KERNEL_OK")
</pallas_src>

<mosaic_0001>
module attributes {stable_mosaic.version = 11 : i64} {
  func.func @_emb_ln_kernel(%arg0: i32, %arg1: memref<16x128xf32, #tpu.memory_space<vmem>>, %arg2: memref<1x128xf32, #tpu.memory_space<vmem>>, %arg3: memref<1x128xf32, #tpu.memory_space<vmem>>, %arg4: memref<16x128xbf16, #tpu.memory_space<vmem>>) attributes {dimension_semantics = [#tpu.dimension_semantics<parallel>], iteration_bounds = array<i64: 2>, scalar_prefetch = 0 : i64, scratch_operands = 0 : i64, tpu.core_type = #tpu.core_type<tc>, window_params = [{transform_indices = @transform_0, window_bounds = array<i64: 16, 128>}, {pipeline_mode = #tpu.pipeline_mode<synchronous>, transform_indices = @transform_1, window_bounds = array<i64: 1, 128>}, {pipeline_mode = #tpu.pipeline_mode<synchronous>, transform_indices = @transform_2, window_bounds = array<i64: 1, 128>}, {transform_indices = @transform_3, window_bounds = array<i64: 16, 128>}]} {
    %c0 = arith.constant 0 : index
    %c0_0 = arith.constant 0 : index
    %0 = vector.load %arg1[%c0, %c0_0] : memref<16x128xf32, #tpu.memory_space<vmem>>, vector<16x128xf32>
    %c0_1 = arith.constant 0 : index
    %c0_2 = arith.constant 0 : index
    %1 = vector.load %arg2[%c0_1, %c0_2] : memref<1x128xf32, #tpu.memory_space<vmem>>, vector<1x128xf32>
    %c0_3 = arith.constant 0 : index
    %c0_4 = arith.constant 0 : index
    %2 = vector.load %arg3[%c0_3, %c0_4] : memref<1x128xf32, #tpu.memory_space<vmem>>, vector<1x128xf32>
    %cst = arith.constant dense<0.000000e+00> : vector<16xf32>
    %3 = vector.multi_reduction <add>, %0, %cst [1] : vector<16x128xf32> to vector<16xf32>
    %4 = vector.shape_cast %3 : vector<16xf32> to vector<16x1xf32>
    %cst_5 = arith.constant 1.280000e+02 : f32
    %5 = vector.broadcast %cst_5 : f32 to vector<16x1xf32>
    %6 = arith.divf %4, %5 : vector<16x1xf32>
    %7 = vector.broadcast %6 : vector<16x1xf32> to vector<16x128xf32>
    %8 = arith.subf %0, %7 : vector<16x128xf32>
    %9 = arith.mulf %8, %8 : vector<16x128xf32>
    %cst_6 = arith.constant dense<0.000000e+00> : vector<16xf32>
    %10 = vector.multi_reduction <add>, %9, %cst_6 [1] : vector<16x128xf32> to vector<16xf32>
    %11 = vector.shape_cast %10 : vector<16xf32> to vector<16x1xf32>
    %cst_7 = arith.constant 1.280000e+02 : f32
    %12 = vector.broadcast %cst_7 : f32 to vector<16x1xf32>
    %13 = arith.divf %11, %12 : vector<16x1xf32>
    %14 = vector.broadcast %6 : vector<16x1xf32> to vector<16x128xf32>
    %15 = arith.subf %0, %14 : vector<16x128xf32>
    %cst_8 = arith.constant 9.99999974E-6 : f32
    %16 = vector.broadcast %cst_8 : f32 to vector<16x1xf32>
    %17 = arith.addf %13, %16 : vector<16x1xf32>
    %18 = math.rsqrt %17 : vector<16x1xf32>
    %19 = vector.broadcast %18 : vector<16x1xf32> to vector<16x128xf32>
    %20 = arith.mulf %15, %19 : vector<16x128xf32>
    %21 = vector.broadcast %1 : vector<1x128xf32> to vector<16x128xf32>
    %22 = arith.mulf %20, %21 : vector<16x128xf32>
    %23 = vector.broadcast %2 : vector<1x128xf32> to vector<16x128xf32>
    %24 = arith.addf %22, %23 : vector<16x128xf32>
    %25 = arith.truncf %24 : vector<16x128xf32> to vector<16x128xbf16>
    %c0_9 = arith.constant 0 : index
    %c0_10 = arith.constant 0 : index
    %26 = vector.load %arg4[%c0_9, %c0_10] : memref<16x128xbf16, #tpu.memory_space<vmem>>, vector<16x128xbf16>
    tpu.vector_store %arg4[%c0_9, %c0_10], %25 {strides = array<i32>} : memref<16x128xbf16, #tpu.memory_space<vmem>>, vector<16x128xbf16>,
    return
  }
  func.func @transform_0(%arg0: i32) -> (i32, i32) {
    %c0_i32 = arith.constant 0 : i32
    %c0_i32_0 = arith.constant 0 : i32
    return %arg0, %c0_i32 : i32, i32
  }
  func.func @transform_1(%arg0: i32) -> (i32, i32) {
    %c0_i32 = arith.constant 0 : i32
    %c0_i32_0 = arith.constant 0 : i32
    %c0_i32_1 = arith.constant 0 : i32
    return %c0_i32, %c0_i32_0 : i32, i32
  }
  func.func @transform_2(%arg0: i32) -> (i32, i32) {
    %c0_i32 = arith.constant 0 : i32
    %c0_i32_0 = arith.constant 0 : i32
    %c0_i32_1 = arith.constant 0 : i32
    return %c0_i32, %c0_i32_0 : i32, i32
  }
  func.func @transform_3(%arg0: i32) -> (i32, i32) {
    %c0_i32 = arith.constant 0 : i32
    %c0_i32_0 = arith.constant 0 : i32
    return %arg0, %c0_i32 : i32, i32
  }
}

module attributes {stable_mosaic.version = 11 : i64} {
  func.func @_encoder_layer_kernel(%arg0: i32, %arg1: memref<16x128xbf16, #tpu.memory_space<vmem>>, %arg2: memref<1x1x16xf32, #tpu.memory_space<vmem>>, %arg3: memref<128x384xbf16, #tpu.memory_space<vmem>>, %arg4: memref<1x384xf32, #tpu.memory_space<vmem>>, %arg5: memref<128x128xbf16, #tpu.memory_space<vmem>>, %arg6: memref<1x128xf32, #tpu.memory_space<vmem>>, %arg7: memref<1x128xf32, #tpu.memory_space<vmem>>, %arg8: memref<1x128xf32, #tpu.memory_space<vmem>>, %arg9: memref<128x256xbf16, #tpu.memory_space<vmem>>, %arg10: memref<1x256xf32, #tpu.memory_space<vmem>>, %arg11: memref<256x128xbf16, #tpu.memory_space<vmem>>, %arg12: memref<1x128xf32, #tpu.memory_space<vmem>>, %arg13: memref<1x128xf32, #tpu.memory_space<vmem>>, %arg14: memref<1x128xf32, #tpu.memory_space<vmem>>, %arg15: memref<16x128xbf16, #tpu.memory_space<vmem>>, %arg16: memref<16x384xbf16, #tpu.memory_space<vmem>>, %arg17: memref<16x128xbf16, #tpu.memory_space<vmem>>) attributes {dimension_semantics = [#tpu.dimension_semantics<parallel>], iteration_bounds = array<i64: 2>, scalar_prefetch = 0 : i64, scratch_operands = 2 : i64, tpu.core_type = #tpu.core_type<tc>, window_params = [{transform_indices = @transform_0, window_bounds = array<i64: 16, 128>}, {transform_indices = @transform_1, window_bounds = array<i64: 1, 1, 16>}, {pipeline_mode = #tpu.pipeline_mode<synchronous>, transform_indices = @transform_2, window_bounds = array<i64: 128, 384>}, {pipeline_mode = #tpu.pipeline_mode<synchronous>, transform_indices = @transform_3, window_bounds = array<i64: 1, 384>}, {pipeline_mode = #tpu.pipeline_mode<synchronous>, transform_indices = @transform_4, window_bounds = array<i64: 128, 128>}, {pipeline_mode = #tpu.pipeline_mode<synchronous>, transform_indices = @transform_5, window_bounds = array<i64: 1, 128>}, {pipeline_mode = #tpu.pipeline_mode<synchronous>, transform_indices = @transform_6, window_bounds = array<i64: 1, 128>}, {pipeline_mode = #tpu.pipeline_mode<synchronous>, transform_indices = @transform_7, window_bounds = array<i64: 1, 128>}, {pipeline_mode = #tpu.pipeline_mode<synchronous>, transform_indices = @transform_8, window_bounds = array<i64: 128, 256>}, {pipeline_mode = #tpu.pipeline_mode<synchronous>, transform_indices = @transform_9, window_bounds = array<i64: 1, 256>}, {pipeline_mode = #tpu.pipeline_mode<synchronous>, transform_indices = @transform_10, window_bounds = array<i64: 256, 128>}, {pipeline_mode = #tpu.pipeline_mode<synchronous>, transform_indices = @transform_11, window_bounds = array<i64: 1, 128>}, {pipeline_mode = #tpu.pipeline_mode<synchronous>, transform_indices = @transform_12, window_bounds = array<i64: 1, 128>}, {pipeline_mode = #tpu.pipeline_mode<synchronous>, transform_indices = @transform_13, window_bounds = array<i64: 1, 128>}, {transform_indices = @transform_14, window_bounds = array<i64: 16, 128>}]} {
    %c0 = arith.constant 0 : index
    %c0_0 = arith.constant 0 : index
    %0 = vector.load %arg1[%c0, %c0_0] : memref<16x128xbf16, #tpu.memory_space<vmem>>, vector<16x128xbf16>
    %1 = arith.extf %0 : vector<16x128xbf16> to vector<16x128xf32>
    %c0_1 = arith.constant 0 : index
    %c0_2 = arith.constant 0 : index
    %2 = vector.load %arg3[%c0_1, %c0_2] : memref<128x384xbf16, #tpu.memory_space<vmem>>, vector<128x384xbf16>
    %cst = arith.constant dense<0.000000e+00> : vector<16x384xf32>
    %3 = tpu.matmul %0, %2, %cst {dimension_numbers = #tpu.dot_dimension_numbers<[1], [0], [0], [1], [0, 0, 1, 1], [], []>} : vector<16x128xbf16>, vector<128x384xbf16>, vector<16x384xf32> -> vector<16x384xf32>
    %c0_3 = arith.constant 0 : index
    %c0_4 = arith.constant 0 : index
    %4 = vector.load %arg4[%c0_3, %c0_4] : memref<1x384xf32, #tpu.memory_space<vmem>>, vector<1x384xf32>
    %5 = vector.broadcast %4 : vector<1x384xf32> to vector<16x384xf32>
    %6 = arith.addf %3, %5 : vector<16x384xf32>
    %7 = arith.truncf %6 : vector<16x384xf32> to vector<16x384xbf16>
    %c0_5 = arith.constant 0 : index
    %c0_6 = arith.constant 0 : index
    %8 = vector.load %arg16[%c0_5, %c0_6] : memref<16x384xbf16, #tpu.memory_space<vmem>>, vector<16x384xbf16>
    tpu.vector_store %arg16[%c0_5, %c0_6], %7 {strides = array<i32>} : memref<16x384xbf16, #tpu.memory_space<vmem>>, vector<16x384xbf16>,
    %c0_7 = arith.constant 0 : index
    %c0_8 = arith.constant 0 : index
    %c0_9 = arith.constant 0 : index
    %9 = vector.load %arg2[%c0_7, %c0_8, %c0_9] : memref<1x1x16xf32, #tpu.memory_space<vmem>>, vector<1x1x16xf32>
    %10 = vector.shape_cast %9 : vector<1x1x16xf32> to vector<1x16xf32>
    %c0_10 = arith.constant 0 : index
    %c0_11 = arith.constant 0 : index
    %11 = vector.load %arg16[%c0_10, %c0_11] : memref<16x384xbf16, #tpu.memory_space<vmem>>, vector<16x32xbf16>
    %c0_12 = arith.constant 0 : index
    %c128 = arith.constant 128 : index
    %12 = vector.load %arg16[%c0_12, %c128] : memref<16x384xbf16, #tpu.memory_space<vmem>>, vector<16x32xbf16>
    %c0_13 = arith.constant 0 : index
    %c256 = arith.constant 256 : index
    %13 = vector.load %arg16[%c0_13, %c256] : memref<16x384xbf16, #tpu.memory_space<vmem>>, vector<16x32xbf16>
    %cst_14 = arith.constant dense<0.000000e+00> : vector<16x16xf32>
    %14 = tpu.matmul %11, %12, %cst_14 {dimension_numbers = #tpu.dot_dimension_numbers<[1], [1], [0], [0], [0, 0, 1, 0], [], []>} : vector<16x32xbf16>, vector<16x32xbf16>, vector<16x16xf32> -> vector<16x16xf32>
    %15 = vector.broadcast %10 : vector<1x16xf32> to vector<16x16xf32>
    %16 = arith.addf %14, %15 : vector<16x16xf32>
    %cst_15 = arith.constant dense<0xFF800000> : vector<16xf32>
    %17 = vector.multi_reduction <maximumf>, %16, %cst_15 [1] : vector<16x16xf32> to vector<16xf32>
    %18 = vector.shape_cast %17 : vector<16xf32> to vector<16x1xf32>
    %19 = vector.broadcast %18 : vector<16x1xf32> to vector<16x16xf32>
    %20 = arith.subf %16, %19 : vector<16x16xf32>
    %21 = math.exp %20 : vector<16x16xf32>
    %cst_16 = arith.constant dense<0.000000e+00> : vector<16xf32>
    %22 = vector.multi_reduction <add>, %21, %cst_16 [1] : vector<16x16xf32> to vector<16xf32>
    %23 = vector.shape_cast %22 : vector<16xf32> to vector<16x1xf32>
    %24 = tpu.reciprocal %23 {approx = true} : vector<16x1xf32> -> vector<16x1xf32>
    %25 = vector.broadcast %24 : vector<16x1xf32> to vector<16x16xf32>
    %26 = arith.mulf %21, %25 : vector<16x16xf32>
    %27 = arith.truncf %26 : vector<16x16xf32> to vector<16x16xbf16>
    %cst_17 = arith.constant dense<0.000000e+00> : vector<16x32xf32>
    %28 = tpu.matmul %27, %13, %cst_17 {dimension_numbers = #tpu.dot_dimension_numbers<[1], [0], [0], [1], [0, 0, 1, 1], [], []>} : vector<16x16xbf16>, vector<16x32xbf16>, vector<16x32xf32> -> vector<16x32xf32>
    %29 = arith.truncf %28 : vector<16x32xf32> to vector<16x32xbf16>
    %c0_18 = arith.constant 0 : index
    %c0_19 = arith.constant 0 : index
    %30 = vector.load %arg17[%c0_18, %c0_19] : memref<16x128xbf16, #tpu.memory_space<vmem>>, vector<16x32xbf16>
    tpu.vector_store %arg17[%c0_18, %c0_19], %29 {strides = array<i32>} : memref<16x128xbf16, #tpu.memory_space<vmem>>, vector<16x32xbf16>,
    %c0_20 = arith.constant 0 : index
    %c32 = arith.constant 32 : index
    %31 = vector.load %arg16[%c0_20, %c32] : memref<16x384xbf16, #tpu.memory_space<vmem>>, vector<16x32xbf16>
    %c0_21 = arith.constant 0 : index
    %c160 = arith.constant 160 : index
    %32 = vector.load %arg16[%c0_21, %c160] : memref<16x384xbf16, #tpu.memory_space<vmem>>, vector<16x32xbf16>
    %c0_22 = arith.constant 0 : index
    %c288 = arith.constant 288 : index
    %33 = vector.load %arg16[%c0_22, %c288] : memref<16x384xbf16, #tpu.memory_space<vmem>>, vector<16x32xbf16>
    %cst_23 = arith.constant dense<0.000000e+00> : vector<16x16xf32>
    %34 = tpu.matmul %31, %32, %cst_23 {dimension_numbers = #tpu.dot_dimension_numbers<[1], [1], [0], [0], [0, 0, 1, 0], [], []>} : vector<16x32xbf16>, vector<16x32xbf16>, vector<16x16xf32> -> vector<16x16xf32>
    %35 = vector.broadcast %10 : vector<1x16xf32> to vector<16x16xf32>
    %36 = arith.addf %34, %35 : vector<16x16xf32>
    %cst_24 = arith.constant dense<0xFF800000> : vector<16xf32>
    %37 = vector.multi_reduction <maximumf>, %36, %cst_24 [1] : vector<16x16xf32> to vector<16xf32>
    %38 = vector.shape_cast %37 : vector<16xf32> to vector<16x1xf32>
    %39 = vector.broadcast %38 : vector<16x1xf32> to vector<16x16xf32>
    %40 = arith.subf %36, %39 : vector<16x16xf32>
    %41 = math.exp %40 : vector<16x16xf32>
    %cst_25 = arith.constant dense<0.000000e+00> : vector<16xf32>
    %42 = vector.multi_reduction <add>, %41, %cst_25 [1] : vector<16x16xf32> to vector<16xf32>
    %43 = vector.shape_cast %42 : vector<16xf32> to vector<16x1xf32>
    %44 = tpu.reciprocal %43 {approx = true} : vector<16x1xf32> -> vector<16x1xf32>
    %45 = vector.broadcast %44 : vector<16x1xf32> to vector<16x16xf32>
    %46 = arith.mulf %41, %45 : vector<16x16xf32>
    %47 = arith.truncf %46 : vector<16x16xf32> to vector<16x16xbf16>
    %cst_26 = arith.constant dense<0.000000e+00> : vector<16x32xf32>
    %48 = tpu.matmul %47, %33, %cst_26 {dimension_numbers = #tpu.dot_dimension_numbers<[1], [0], [0], [1], [0, 0, 1, 1], [], []>} : vector<16x16xbf16>, vector<16x32xbf16>, vector<16x32xf32> -> vector<16x32xf32>
    %49 = arith.truncf %48 : vector<16x32xf32> to vector<16x32xbf16>
    %c0_27 = arith.constant 0 : index
    %c32_28 = arith.constant 32 : index
    %50 = vector.load %arg17[%c0_27, %c32_28] : memref<16x128xbf16, #tpu.memory_space<vmem>>, vector<16x32xbf16>
    tpu.vector_store %arg17[%c0_27, %c32_28], %49 {strides = array<i32>} : memref<16x128xbf16, #tpu.memory_space<vmem>>, vector<16x32xbf16>,
    %c0_29 = arith.constant 0 : index
    %c64 = arith.constant 64 : index
    %51 = vector.load %arg16[%c0_29, %c64] : memref<16x384xbf16, #tpu.memory_space<vmem>>, vector<16x32xbf16>
    %c0_30 = arith.constant 0 : index
    %c192 = arith.constant 192 : index
    %52 = vector.load %arg16[%c0_30, %c192] : memref<16x384xbf16, #tpu.memory_space<vmem>>, vector<16x32xbf16>
    %c0_31 = arith.constant 0 : index
    %c320 = arith.constant 320 : index
    %53 = vector.load %arg16[%c0_31, %c320] : memref<16x384xbf16, #tpu.memory_space<vmem>>, vector<16x32xbf16>
    %cst_32 = arith.constant dense<0.000000e+00> : vector<16x16xf32>
    %54 = tpu.matmul %51, %52, %cst_32 {dimension_numbers = #tpu.dot_dimension_numbers<[1], [1], [0], [0], [0, 0, 1, 0], [], []>} : vector<16x32xbf16>, vector<16x32xbf16>, vector<16x16xf32> -> vector<16x16xf32>
    %55 = vector.broadcast %10 : vector<1x16xf32> to vector<16x16xf32>
    %56 = arith.addf %54, %55 : vector<16x16xf32>
    %cst_33 = arith.constant dense<0xFF800000> : vector<16xf32>
    %57 = vector.multi_reduction <maximumf>, %56, %cst_33 [1] : vector<16x16xf32> to vector<16xf32>
    %58 = vector.shape_cast %57 : vector<16xf32> to vector<16x1xf32>
    %59 = vector.broadcast %58 : vector<16x1xf32> to vector<16x16xf32>
    %60 = arith.subf %56, %59 : vector<16x16xf32>
    %61 = math.exp %60 : vector<16x16xf32>
    %cst_34 = arith.constant dense<0.000000e+00> : vector<16xf32>
    %62 = vector.multi_reduction <add>, %61, %cst_34 [1] : vector<16x16xf32> to vector<16xf32>
    %63 = vector.shape_cast %62 : vector<16xf32> to vector<16x1xf32>
    %64 = tpu.reciprocal %63 {approx = true} : vector<16x1xf32> -> vector<16x1xf32>
    %65 = vector.broadcast %64 : vector<16x1xf32> to vector<16x16xf32>
    %66 = arith.mulf %61, %65 : vector<16x16xf32>
    %67 = arith.truncf %66 : vector<16x16xf32> to vector<16x16xbf16>
    %cst_35 = arith.constant dense<0.000000e+00> : vector<16x32xf32>
    %68 = tpu.matmul %67, %53, %cst_35 {dimension_numbers = #tpu.dot_dimension_numbers<[1], [0], [0], [1], [0, 0, 1, 1], [], []>} : vector<16x16xbf16>, vector<16x32xbf16>, vector<16x32xf32> -> vector<16x32xf32>
    %69 = arith.truncf %68 : vector<16x32xf32> to vector<16x32xbf16>
    %c0_36 = arith.constant 0 : index
    %c64_37 = arith.constant 64 : index
    %70 = vector.load %arg17[%c0_36, %c64_37] : memref<16x128xbf16, #tpu.memory_space<vmem>>, vector<16x32xbf16>
    tpu.vector_store %arg17[%c0_36, %c64_37], %69 {strides = array<i32>} : memref<16x128xbf16, #tpu.memory_space<vmem>>, vector<16x32xbf16>,
    %c0_38 = arith.constant 0 : index
    %c96 = arith.constant 96 : index
    %71 = vector.load %arg16[%c0_38, %c96] : memref<16x384xbf16, #tpu.memory_space<vmem>>, vector<16x32xbf16>
    %c0_39 = arith.constant 0 : index
    %c224 = arith.constant 224 : index
    %72 = vector.load %arg16[%c0_39, %c224] : memref<16x384xbf16, #tpu.memory_space<vmem>>, vector<16x32xbf16>
    %c0_40 = arith.constant 0 : index
    %c352 = arith.constant 352 : index
    %73 = vector.load %arg16[%c0_40, %c352] : memref<16x384xbf16, #tpu.memory_space<vmem>>, vector<16x32xbf16>
    %cst_41 = arith.constant dense<0.000000e+00> : vector<16x16xf32>
    %74 = tpu.matmul %71, %72, %cst_41 {dimension_numbers = #tpu.dot_dimension_numbers<[1], [1], [0], [0], [0, 0, 1, 0], [], []>} : vector<16x32xbf16>, vector<16x32xbf16>, vector<16x16xf32> -> vector<16x16xf32>
    %75 = vector.broadcast %10 : vector<1x16xf32> to vector<16x16xf32>
    %76 = arith.addf %74, %75 : vector<16x16xf32>
    %cst_42 = arith.constant dense<0xFF800000> : vector<16xf32>
    %77 = vector.multi_reduction <maximumf>, %76, %cst_42 [1] : vector<16x16xf32> to vector<16xf32>
    %78 = vector.shape_cast %77 : vector<16xf32> to vector<16x1xf32>
    %79 = vector.broadcast %78 : vector<16x1xf32> to vector<16x16xf32>
    %80 = arith.subf %76, %79 : vector<16x16xf32>
    %81 = math.exp %80 : vector<16x16xf32>
    %cst_43 = arith.constant dense<0.000000e+00> : vector<16xf32>
    %82 = vector.multi_reduction <add>, %81, %cst_43 [1] : vector<16x16xf32> to vector<16xf32>
    %83 = vector.shape_cast %82 : vector<16xf32> to vector<16x1xf32>
    %84 = tpu.reciprocal %83 {approx = true} : vector<16x1xf32> -> vector<16x1xf32>
    %85 = vector.broadcast %84 : vector<16x1xf32> to vector<16x16xf32>
    %86 = arith.mulf %81, %85 : vector<16x16xf32>
    %87 = arith.truncf %86 : vector<16x16xf32> to vector<16x16xbf16>
    %cst_44 = arith.constant dense<0.000000e+00> : vector<16x32xf32>
    %88 = tpu.matmul %87, %73, %cst_44 {dimension_numbers = #tpu.dot_dimension_numbers<[1], [0], [0], [1], [0, 0, 1, 1], [], []>} : vector<16x16xbf16>, vector<16x32xbf16>, vector<16x32xf32> -> vector<16x32xf32>
    %89 = arith.truncf %88 : vector<16x32xf32> to vector<16x32xbf16>
    %c0_45 = arith.constant 0 : index
    %c96_46 = arith.constant 96 : index
    %90 = vector.load %arg17[%c0_45, %c96_46] : memref<16x128xbf16, #tpu.memory_space<vmem>>, vector<16x32xbf16>
    tpu.vector_store %arg17[%c0_45, %c96_46], %89 {strides = array<i32>} : memref<16x128xbf16, #tpu.memory_space<vmem>>, vector<16x32xbf16>,
    %c0_47 = arith.constant 0 : index
    %c0_48 = arith.constant 0 : index
    %91 = vector.load %arg17[%c0_47, %c0_48] : memref<16x128xbf16, #tpu.memory_space<vmem>>, vector<16x128xbf16>
    %c0_49 = arith.constant 0 : index
    %c0_50 = arith.constant 0 : index
    %92 = vector.load %arg5[%c0_49, %c0_50] : memref<128x128xbf16, #tpu.memory_space<vmem>>, vector<128x128xbf16>
    %cst_51 = arith.constant dense<0.000000e+00> : vector<16x128xf32>
    %93 = tpu.matmul %91, %92, %cst_51 {dimension_numbers = #tpu.dot_dimension_numbers<[1], [0], [0], [1], [0, 0, 1, 1], [], []>} : vector<16x128xbf16>, vector<128x128xbf16>, vector<16x128xf32> -> vector<16x128xf32>
    %c0_52 = arith.constant 0 : index
    %c0_53 = arith.constant 0 : index
    %94 = vector.load %arg6[%c0_52, %c0_53] : memref<1x128xf32, #tpu.memory_space<vmem>>, vector<1x128xf32>
    %95 = vector.broadcast %94 : vector<1x128xf32> to vector<16x128xf32>
    %96 = arith.addf %93, %95 : vector<16x128xf32>
    %97 = arith.addf %1, %96 : vector<16x128xf32>
    %c0_54 = arith.constant 0 : index
    %c0_55 = arith.constant 0 : index
    %98 = vector.load %arg7[%c0_54, %c0_55] : memref<1x128xf32, #tpu.memory_space<vmem>>, vector<1x128xf32>
    %c0_56 = arith.constant 0 : index
    %c0_57 = arith.constant 0 : index
    %99 = vector.load %arg8[%c0_56, %c0_57] : memref<1x128xf32, #tpu.memory_space<vmem>>, vector<1x128xf32>
    %cst_58 = arith.constant dense<0.000000e+00> : vector<16xf32>
    %100 = vector.multi_reduction <add>, %97, %cst_58 [1] : vector<16x128xf32> to vector<16xf32>
    %101 = vector.shape_cast %100 : vector<16xf32> to vector<16x1xf32>
    %cst_59 = arith.constant 1.280000e+02 : f32
    %102 = vector.broadcast %cst_59 : f32 to vector<16x1xf32>
    %103 = arith.divf %101, %102 : vector<16x1xf32>
    %104 = vector.broadcast %103 : vector<16x1xf32> to vector<16x128xf32>
    %105 = arith.subf %97, %104 : vector<16x128xf32>
    %106 = arith.mulf %105, %105 : vector<16x128xf32>
    %cst_60 = arith.constant dense<0.000000e+00> : vector<16xf32>
    %107 = vector.multi_reduction <add>, %106, %cst_60 [1] : vector<16x128xf32> to vector<16xf32>
    %108 = vector.shape_cast %107 : vector<16xf32> to vector<16x1xf32>
    %cst_61 = arith.constant 1.280000e+02 : f32
    %109 = vector.broadcast %cst_61 : f32 to vector<16x1xf32>
    %110 = arith.divf %108, %109 : vector<16x1xf32>
    %111 = vector.broadcast %103 : vector<16x1xf32> to vector<16x128xf32>
    %112 = arith.subf %97, %111 : vector<16x128xf32>
    %cst_62 = arith.constant 9.99999974E-6 : f32
    %113 = vector.broadcast %cst_62 : f32 to vector<16x1xf32>
    %114 = arith.addf %110, %113 : vector<16x1xf32>
    %115 = math.rsqrt %114 : vector<16x1xf32>
    %116 = vector.broadcast %115 : vector<16x1xf32> to vector<16x128xf32>
    %117 = arith.mulf %112, %116 : vector<16x128xf32>
    %118 = vector.broadcast %98 : vector<1x128xf32> to vector<16x128xf32>
    %119 = arith.mulf %117, %118 : vector<16x128xf32>
    %120 = vector.broadcast %99 : vector<1x128xf32> to vector<16x128xf32>
    %121 = arith.addf %119, %120 : vector<16x128xf32>
    %122 = arith.truncf %121 : vector<16x128xf32> to vector<16x128xbf16>
    %c0_63 = arith.constant 0 : index
    %c0_64 = arith.constant 0 : index
    %123 = vector.load %arg9[%c0_63, %c0_64] : memref<128x256xbf16, #tpu.memory_space<vmem>>, vector<128x256xbf16>
    %cst_65 = arith.constant dense<0.000000e+00> : vector<16x256xf32>
    %124 = tpu.matmul %122, %123, %cst_65 {dimension_numbers = #tpu.dot_dimension_numbers<[1], [0], [0], [1], [0, 0, 1, 1], [], []>} : vector<16x128xbf16>, vector<128x256xbf16>, vector<16x256xf32> -> vector<16x256xf32>
    %c0_66 = arith.constant 0 : index
    %c0_67 = arith.constant 0 : index
    %125 = vector.load %arg10[%c0_66, %c0_67] : memref<1x256xf32, #tpu.memory_space<vmem>>, vector<1x256xf32>
    %126 = vector.broadcast %125 : vector<1x256xf32> to vector<16x256xf32>
    %127 = arith.addf %124, %126 : vector<16x256xf32>
    %128 = arith.mulf %127, %127 : vector<16x256xf32>
    %129 = arith.mulf %127, %128 : vector<16x256xf32>
    %cst_68 = arith.constant 4.471500e-02 : f32
    %130 = vector.broadcast %cst_68 : f32 to vector<16x256xf32>
    %131 = arith.mulf %130, %129 : vector<16x256xf32>
    %132 = arith.addf %127, %131 : vector<16x256xf32>
    %cst_69 = arith.constant 0.797884583 : f32
    %133 = vector.broadcast %cst_69 : f32 to vector<16x256xf32>
    %134 = arith.mulf %133, %132 : vector<16x256xf32>
    %135 = math.tanh %134 : vector<16x256xf32>
    %cst_70 = arith.constant 1.000000e+00 : f32
    %136 = vector.broadcast %cst_70 : f32 to vector<16x256xf32>
    %137 = arith.addf %136, %135 : vector<16x256xf32>
    %cst_71 = arith.constant 5.000000e-01 : f32
    %138 = vector.broadcast %cst_71 : f32 to vector<16x256xf32>
    %139 = arith.mulf %138, %137 : vector<16x256xf32>
    %140 = arith.mulf %127, %139 : vector<16x256xf32>
    %141 = arith.truncf %140 : vector<16x256xf32> to vector<16x256xbf16>
    %c0_72 = arith.constant 0 : index
    %c0_73 = arith.constant 0 : index
    %142 = vector.load %arg11[%c0_72, %c0_73] : memref<256x128xbf16, #tpu.memory_space<vmem>>, vector<256x128xbf16>
    %cst_74 = arith.constant dense<0.000000e+00> : vector<16x128xf32>
    %143 = tpu.matmul %141, %142, %cst_74 {dimension_numbers = #tpu.dot_dimension_numbers<[1], [0], [0], [1], [0, 0, 1, 1], [], []>} : vector<16x256xbf16>, vector<256x128xbf16>, vector<16x128xf32> -> vector<16x128xf32>
    %c0_75 = arith.constant 0 : index
    %c0_76 = arith.constant 0 : index
    %144 = vector.load %arg12[%c0_75, %c0_76] : memref<1x128xf32, #tpu.memory_space<vmem>>, vector<1x128xf32>
    %145 = vector.broadcast %144 : vector<1x128xf32> to vector<16x128xf32>
    %146 = arith.addf %143, %145 : vector<16x128xf32>
    %147 = arith.addf %121, %146 : vector<16x128xf32>
    %c0_77 = arith.constant 0 : index
    %c0_78 = arith.constant 0 : index
    %148 = vector.load %arg13[%c0_77, %c0_78] : memref<1x128xf32, #tpu.memory_space<vmem>>, vector<1x128xf32>
    %c0_79 = arith.constant 0 : index
    %c0_80 = arith.constant 0 : index
    %149 = vector.load %arg14[%c0_79, %c0_80] : memref<1x128xf32, #tpu.memory_space<vmem>>, vector<1x128xf32>
    %cst_81 = arith.constant dense<0.000000e+00> : vector<16xf32>
    %150 = vector.multi_reduction <add>, %147, %cst_81 [1] : vector<16x128xf32> to vector<16xf32>
    %151 = vector.shape_cast %150 : vector<16xf32> to vector<16x1xf32>
    %cst_82 = arith.constant 1.280000e+02 : f32
    %152 = vector.broadcast %cst_82 : f32 to vector<16x1xf32>
    %153 = arith.divf %151, %152 : vector<16x1xf32>
    %154 = vector.broadcast %153 : vector<16x1xf32> to vector<16x128xf32>
    %155 = arith.subf %147, %154 : vector<16x128xf32>
    %156 = arith.mulf %155, %155 : vector<16x128xf32>
    %cst_83 = arith.constant dense<0.000000e+00> : vector<16xf32>
    %157 = vector.multi_reduction <add>, %156, %cst_83 [1] : vector<16x128xf32> to vector<16xf32>
    %158 = vector.shape_cast %157 : vector<16xf32> to vector<16x1xf32>
    %cst_84 = arith.constant 1.280000e+02 : f32
    %159 = vector.broadcast %cst_84 : f32 to vector<16x1xf32>
    %160 = arith.divf %158, %159 : vector<16x1xf32>
    %161 = vector.broadcast %153 : vector<16x1xf32> to vector<16x128xf32>
    %162 = arith.subf %147, %161 : vector<16x128xf32>
    %cst_85 = arith.constant 9.99999974E-6 : f32
    %163 = vector.broadcast %cst_85 : f32 to vector<16x1xf32>
    %164 = arith.addf %160, %163 : vector<16x1xf32>
    %165 = math.rsqrt %164 : vector<16x1xf32>
    %166 = vector.broadcast %165 : vector<16x1xf32> to vector<16x128xf32>
    %167 = arith.mulf %162, %166 : vector<16x128xf32>
    %168 = vector.broadcast %148 : vector<1x128xf32> to vector<16x128xf32>
    %169 = arith.mulf %167, %168 : vector<16x128xf32>
    %170 = vector.broadcast %149 : vector<1x128xf32> to vector<16x128xf32>
    %171 = arith.addf %169, %170 : vector<16x128xf32>
    %172 = arith.truncf %171 : vector<16x128xf32> to vector<16x128xbf16>
    %c0_86 = arith.constant 0 : index
    %c0_87 = arith.constant 0 : index
    %173 = vector.load %arg15[%c0_86, %c0_87] : memref<16x128xbf16, #tpu.memory_space<vmem>>, vector<16x128xbf16>
    tpu.vector_store %arg15[%c0_86, %c0_87], %172 {strides = array<i32>} : memref<16x128xbf16, #tpu.memory_space<vmem>>, vector<16x128xbf16>,
    return
  }
  func.func @transform_0(%arg0: i32) -> (i32, i32) {
    %c0_i32 = arith.constant 0 : i32
    %c0_i32_0 = arith.constant 0 : i32
    return %arg0, %c0_i32 : i32, i32
  }
  func.func @transform_1(%arg0: i32) -> (i32, i32, i32) {
    %c0_i32 = arith.constant 0 : i32
    %c0_i32_0 = arith.constant 0 : i32
    %c0_i32_1 = arith.constant 0 : i32
    return %arg0, %c0_i32, %c0_i32_0 : i32, i32, i32
  }
  func.func @transform_2(%arg0: i32) -> (i32, i32) {
    %c0_i32 = arith.constant 0 : i32
    %c0_i32_0 = arith.constant 0 : i32
    %c0_i32_1 = arith.constant 0 : i32
    return %c0_i32, %c0_i32_0 : i32, i32
  }
  func.func @transform_3(%arg0: i32) -> (i32, i32) {
    %c0_i32 = arith.constant 0 : i32
    %c0_i32_0 = arith.constant 0 : i32
    %c0_i32_1 = arith.constant 0 : i32
    return %c0_i32, %c0_i32_0 : i32, i32
  }
  func.func @transform_4(%arg0: i32) -> (i32, i32) {
    %c0_i32 = arith.constant 0 : i32
    %c0_i32_0 = arith.constant 0 : i32
    %c0_i32_1 = arith.constant 0 : i32
    return %c0_i32, %c0_i32_0 : i32, i32
  }
  func.func @transform_5(%arg0: i32) -> (i32, i32) {
    %c0_i32 = arith.constant 0 : i32
    %c0_i32_0 = arith.constant 0 : i32
    %c0_i32_1 = arith.constant 0 : i32
    return %c0_i32, %c0_i32_0 : i32, i32
  }
  func.func @transform_6(%arg0: i32) -> (i32, i32) {
    %c0_i32 = arith.constant 0 : i32
    %c0_i32_0 = arith.constant 0 : i32
    %c0_i32_1 = arith.constant 0 : i32
    return %c0_i32, %c0_i32_0 : i32, i32
  }
  func.func @transform_7(%arg0: i32) -> (i32, i32) {
    %c0_i32 = arith.constant 0 : i32
    %c0_i32_0 = arith.constant 0 : i32
    %c0_i32_1 = arith.constant 0 : i32
    return %c0_i32, %c0_i32_0 : i32, i32
  }
  func.func @transform_8(%arg0: i32) -> (i32, i32) {
    %c0_i32 = arith.constant 0 : i32
    %c0_i32_0 = arith.constant 0 : i32
    %c0_i32_1 = arith.constant 0 : i32
    return %c0_i32, %c0_i32_0 : i32, i32
  }
  func.func @transform_9(%arg0: i32) -> (i32, i32) {
    %c0_i32 = arith.constant 0 : i32
    %c0_i32_0 = arith.constant 0 : i32
    %c0_i32_1 = arith.constant 0 : i32
    return %c0_i32, %c0_i32_0 : i32, i32
  }
  func.func @transform_10(%arg0: i32) -> (i32, i32) {
    %c0_i32 = arith.constant 0 : i32
    %c0_i32_0 = arith.constant 0 : i32
    %c0_i32_1 = arith.constant 0 : i32
    return %c0_i32, %c0_i32_0 : i32, i32
  }
  func.func @transform_11(%arg0: i32) -> (i32, i32) {
    %c0_i32 = arith.constant 0 : i32
    %c0_i32_0 = arith.constant 0 : i32
    %c0_i32_1 = arith.constant 0 : i32
    return %c0_i32, %c0_i32_0 : i32, i32
  }
  func.func @transform_12(%arg0: i32) -> (i32, i32) {
    %c0_i32 = arith.constant 0 : i32
    %c0_i32_0 = arith.constant 0 : i32
    %c0_i32_1 = arith.constant 0 : i32
    return %c0_i32, %c0_i32_0 : i32, i32
  }
  func.func @transform_13(%arg0: i32) -> (i32, i32) {
    %c0_i32 = arith.constant 0 : i32
    %c0_i32_0 = arith.constant 0 : i32
    %c0_i32_1 = arith.constant 0 : i32
    return %c0_i32, %c0_i32_0 : i32, i32
  }
  func.func @transform_14(%arg0: i32) -> (i32, i32) {
    %c0_i32 = arith.constant 0 : i32
    %c0_i32_0 = arith.constant 0 : i32
    return %arg0, %c0_i32 : i32, i32
  }
}

module attributes {stable_mosaic.version = 11 : i64} {
  func.func @_head_kernel(%arg0: i32, %arg1: memref<2x128xbf16, #tpu.memory_space<vmem>>, %arg2: memref<128x128xbf16, #tpu.memory_space<vmem>>, %arg3: memref<1x128xf32, #tpu.memory_space<vmem>>, %arg4: memref<128x128xbf16, #tpu.memory_space<vmem>>, %arg5: memref<1x128xf32, #tpu.memory_space<vmem>>, %arg6: memref<2x128xf32, #tpu.memory_space<vmem>>) attributes {dimension_semantics = [#tpu.dimension_semantics<arbitrary>], iteration_bounds = array<i64: 1>, scalar_prefetch = 0 : i64, scratch_operands = 0 : i64, tpu.core_type = #tpu.core_type<tc>, window_params = [{pipeline_mode = #tpu.pipeline_mode<synchronous>, transform_indices = @transform_0, window_bounds = array<i64: 2, 128>}, {pipeline_mode = #tpu.pipeline_mode<synchronous>, transform_indices = @transform_1, window_bounds = array<i64: 128, 128>}, {pipeline_mode = #tpu.pipeline_mode<synchronous>, transform_indices = @transform_2, window_bounds = array<i64: 1, 128>}, {pipeline_mode = #tpu.pipeline_mode<synchronous>, transform_indices = @transform_3, window_bounds = array<i64: 128, 128>}, {pipeline_mode = #tpu.pipeline_mode<synchronous>, transform_indices = @transform_4, window_bounds = array<i64: 1, 128>}, {pipeline_mode = #tpu.pipeline_mode<synchronous>, transform_indices = @transform_5, window_bounds = array<i64: 2, 128>}]} {
    %c0 = arith.constant 0 : index
    %c0_0 = arith.constant 0 : index
    %0 = vector.load %arg1[%c0, %c0_0] : memref<2x128xbf16, #tpu.memory_space<vmem>>, vector<2x128xbf16>
    %c0_1 = arith.constant 0 : index
    %c0_2 = arith.constant 0 : index
    %1 = vector.load %arg2[%c0_1, %c0_2] : memref<128x128xbf16, #tpu.memory_space<vmem>>, vector<128x128xbf16>
    %cst = arith.constant dense<0.000000e+00> : vector<2x128xf32>
    %2 = tpu.matmul %0, %1, %cst {dimension_numbers = #tpu.dot_dimension_numbers<[1], [0], [0], [1], [0, 0, 1, 1], [], []>} : vector<2x128xbf16>, vector<128x128xbf16>, vector<2x128xf32> -> vector<2x128xf32>
    %c0_3 = arith.constant 0 : index
    %c0_4 = arith.constant 0 : index
    %3 = vector.load %arg3[%c0_3, %c0_4] : memref<1x128xf32, #tpu.memory_space<vmem>>, vector<1x128xf32>
    %4 = vector.broadcast %3 : vector<1x128xf32> to vector<2x128xf32>
    %5 = arith.addf %2, %4 : vector<2x128xf32>
    %6 = math.tanh %5 : vector<2x128xf32>
    %7 = arith.truncf %6 : vector<2x128xf32> to vector<2x128xbf16>
    %c0_5 = arith.constant 0 : index
    %c0_6 = arith.constant 0 : index
    %8 = vector.load %arg4[%c0_5, %c0_6] : memref<128x128xbf16, #tpu.memory_space<vmem>>, vector<128x128xbf16>
    %cst_7 = arith.constant dense<0.000000e+00> : vector<2x128xf32>
    %9 = tpu.matmul %7, %8, %cst_7 {dimension_numbers = #tpu.dot_dimension_numbers<[1], [0], [0], [1], [0, 0, 1, 1], [], []>} : vector<2x128xbf16>, vector<128x128xbf16>, vector<2x128xf32> -> vector<2x128xf32>
    %c0_8 = arith.constant 0 : index
    %c0_9 = arith.constant 0 : index
    %10 = vector.load %arg5[%c0_8, %c0_9] : memref<1x128xf32, #tpu.memory_space<vmem>>, vector<1x128xf32>
    %11 = vector.broadcast %10 : vector<1x128xf32> to vector<2x128xf32>
    %12 = arith.addf %9, %11 : vector<2x128xf32>
    %c0_10 = arith.constant 0 : index
    %c0_11 = arith.constant 0 : index
    %13 = vector.load %arg6[%c0_10, %c0_11] : memref<2x128xf32, #tpu.memory_space<vmem>>, vector<2x128xf32>
    tpu.vector_store %arg6[%c0_10, %c0_11], %12 {strides = array<i32>} : memref<2x128xf32, #tpu.memory_space<vmem>>, vector<2x128xf32>,
    return
  }
  func.func @transform_0(%arg0: i32) -> (i32, i32) {
    %c0_i32 = arith.constant 0 : i32
    %c0_i32_0 = arith.constant 0 : i32
    %c0_i32_1 = arith.constant 0 : i32
    return %c0_i32, %c0_i32_0 : i32, i32
  }
  func.func @transform_1(%arg0: i32) -> (i32, i32) {
    %c0_i32 = arith.constant 0 : i32
    %c0_i32_0 = arith.constant 0 : i32
    %c0_i32_1 = arith.constant 0 : i32
    return %c0_i32, %c0_i32_0 : i32, i32
  }
  func.func @transform_2(%arg0: i32) -> (i32, i32) {
    %c0_i32 = arith.constant 0 : i32
    %c0_i32_0 = arith.constant 0 : i32
    %c0_i32_1 = arith.constant 0 : i32
    return %c0_i32, %c0_i32_0 : i32, i32
  }
  func.func @transform_3(%arg0: i32) -> (i32, i32) {
    %c0_i32 = arith.constant 0 : i32
    %c0_i32_0 = arith.constant 0 : i32
    %c0_i32_1 = arith.constant 0 : i32
    return %c0_i32, %c0_i32_0 : i32, i32
  }
  func.func @transform_4(%arg0: i32) -> (i32, i32) {
    %c0_i32 = arith.constant 0 : i32
    %c0_i32_0 = arith.constant 0 : i32
    %c0_i32_1 = arith.constant 0 : i32
    return %c0_i32, %c0_i32_0 : i32, i32
  }
  func.func @transform_5(%arg0: i32) -> (i32, i32) {
    %c0_i32 = arith.constant 0 : i32
    %c0_i32_0 = arith.constant 0 : i32
    %c0_i32_1 = arith.constant 0 : i32
    return %c0_i32, %c0_i32_0 : i32, i32
  }
}

module attributes {stable_mosaic.version = 11 : i64} {
  func.func @_encoder_layer_kernel(%arg0: i32, %arg1: memref<16x128xbf16, #tpu.memory_space<vmem>>, %arg2: memref<1x1x16xf32, #tpu.memory_space<vmem>>, %arg3: memref<128x384xbf16, #tpu.memory_space<vmem>>, %arg4: memref<1x384xf32, #tpu.memory_space<vmem>>, %arg5: memref<128x128xbf16, #tpu.memory_space<vmem>>, %arg6: memref<1x128xf32, #tpu.memory_space<vmem>>, %arg7: memref<1x128xf32, #tpu.memory_space<vmem>>, %arg8: memref<1x128xf32, #tpu.memory_space<vmem>>, %arg9: memref<128x256xbf16, #tpu.memory_space<vmem>>, %arg10: memref<1x256xf32, #tpu.memory_space<vmem>>, %arg11: memref<256x128xbf16, #tpu.memory_space<vmem>>, %arg12: memref<1x128xf32, #tpu.memory_space<vmem>>, %arg13: memref<1x128xf32, #tpu.memory_space<vmem>>, %arg14: memref<1x128xf32, #tpu.memory_space<vmem>>, %arg15: memref<16x128xbf16, #tpu.memory_space<vmem>>, %arg16: memref<16x384xbf16, #tpu.memory_space<vmem>>, %arg17: memref<16x128xbf16, #tpu.memory_space<vmem>>) attributes {dimension_semantics = [#tpu.dimension_semantics<parallel>], iteration_bounds = array<i64: 2>, scalar_prefetch = 0 : i64, scratch_operands = 2 : i64, tpu.core_type = #tpu.core_type<tc>, window_params = [{transform_indices = @transform_0, window_bounds = array<i64: 16, 128>}, {transform_indices = @transform_1, window_bounds = array<i64: 1, 1, 16>}, {pipeline_mode = #tpu.pipeline_mode<synchronous>, transform_indices = @transform_2, window_bounds = array<i64: 128, 384>}, {pipeline_mode = #tpu.pipeline_mode<synchronous>, transform_indices = @transform_3, window_bounds = array<i64: 1, 384>}, {pipeline_mode = #tpu.pipeline_mode<synchronous>, transform_indices = @transform_4, window_bounds = array<i64: 128, 128>}, {pipeline_mode = #tpu.pipeline_mode<synchronous>, transform_indices = @transform_5, window_bounds = array<i64: 1, 128>}, {pipeline_mode = #tpu.pipeline_mode<synchronous>, transform_indices = @transform_6, window_bounds = array<i64: 1, 128>}, {pipeline_mode = #tpu.pipeline_mode<synchronous>, transform_indices = @transform_7, window_bounds = array<i64: 1, 128>}, {pipeline_mode = #tpu.pipeline_mode<synchronous>, transform_indices = @transform_8, window_bounds = array<i64: 128, 256>}, {pipeline_mode = #tpu.pipeline_mode<synchronous>, transform_indices = @transform_9, window_bounds = array<i64: 1, 256>}, {pipeline_mode = #tpu.pipeline_mode<synchronous>, transform_indices = @transform_10, window_bounds = array<i64: 256, 128>}, {pipeline_mode = #tpu.pipeline_mode<synchronous>, transform_indices = @transform_11, window_bounds = array<i64: 1, 128>}, {pipeline_mode = #tpu.pipeline_mode<synchronous>, transform_indices = @transform_12, window_bounds = array<i64: 1, 128>}, {pipeline_mode = #tpu.pipeline_mode<synchronous>, transform_indices = @transform_13, window_bounds = array<i64: 1, 128>}, {transform_indices = @transform_14, window_bounds = array<i64: 16, 128>}]} {
    %c0 = arith.constant 0 : index
    %c0_0 = arith.constant 0 : index
    %0 = vector.load %arg1[%c0, %c0_0] : memref<16x128xbf16, #tpu.memory_space<vmem>>, vector<16x128xbf16>
    %1 = arith.extf %0 : vector<16x128xbf16> to vector<16x128xf32>
    %c0_1 = arith.constant 0 : index
    %c0_2 = arith.constant 0 : index
    %2 = vector.load %arg3[%c0_1, %c0_2] : memref<128x384xbf16, #tpu.memory_space<vmem>>, vector<128x384xbf16>
    %cst = arith.constant dense<0.000000e+00> : vector<16x384xf32>
    %3 = tpu.matmul %0, %2, %cst {dimension_numbers = #tpu.dot_dimension_numbers<[1], [0], [0], [1], [0, 0, 1, 1], [], []>} : vector<16x128xbf16>, vector<128x384xbf16>, vector<16x384xf32> -> vector<16x384xf32>
    %c0_3 = arith.constant 0 : index
    %c0_4 = arith.constant 0 : index
    %4 = vector.load %arg4[%c0_3, %c0_4] : memref<1x384xf32, #tpu.memory_space<vmem>>, vector<1x384xf32>
    %5 = vector.broadcast %4 : vector<1x384xf32> to vector<16x384xf32>
    %6 = arith.addf %3, %5 : vector<16x384xf32>
    %7 = arith.truncf %6 : vector<16x384xf32> to vector<16x384xbf16>
    %c0_5 = arith.constant 0 : index
    %c0_6 = arith.constant 0 : index
    %8 = vector.load %arg16[%c0_5, %c0_6] : memref<16x384xbf16, #tpu.memory_space<vmem>>, vector<16x384xbf16>
    tpu.vector_store %arg16[%c0_5, %c0_6], %7 {strides = array<i32>} : memref<16x384xbf16, #tpu.memory_space<vmem>>, vector<16x384xbf16>,
    %c0_7 = arith.constant 0 : index
    %c0_8 = arith.constant 0 : index
    %c0_9 = arith.constant 0 : index
    %9 = vector.load %arg2[%c0_7, %c0_8, %c0_9] : memref<1x1x16xf32, #tpu.memory_space<vmem>>, vector<1x1x16xf32>
    %10 = vector.shape_cast %9 : vector<1x1x16xf32> to vector<1x16xf32>
    %c0_10 = arith.constant 0 : index
    %c0_11 = arith.constant 0 : index
    %11 = vector.load %arg16[%c0_10, %c0_11] : memref<16x384xbf16, #tpu.memory_space<vmem>>, vector<16x32xbf16>
    %c0_12 = arith.constant 0 : index
    %c128 = arith.constant 128 : index
    %12 = vector.load %arg16[%c0_12, %c128] : memref<16x384xbf16, #tpu.memory_space<vmem>>, vector<16x32xbf16>
    %c0_13 = arith.constant 0 : index
    %c256 = arith.constant 256 : index
    %13 = vector.load %arg16[%c0_13, %c256] : memref<16x384xbf16, #tpu.memory_space<vmem>>, vector<16x32xbf16>
    %cst_14 = arith.constant dense<0.000000e+00> : vector<16x16xf32>
    %14 = tpu.matmul %11, %12, %cst_14 {dimension_numbers = #tpu.dot_dimension_numbers<[1], [1], [0], [0], [0, 0, 1, 0], [], []>} : vector<16x32xbf16>, vector<16x32xbf16>, vector<16x16xf32> -> vector<16x16xf32>
    %15 = vector.broadcast %10 : vector<1x16xf32> to vector<16x16xf32>
    %16 = arith.addf %14, %15 : vector<16x16xf32>
    %cst_15 = arith.constant dense<0xFF800000> : vector<16xf32>
    %17 = vector.multi_reduction <maximumf>, %16, %cst_15 [1] : vector<16x16xf32> to vector<16xf32>
    %18 = vector.shape_cast %17 : vector<16xf32> to vector<16x1xf32>
    %19 = vector.broadcast %18 : vector<16x1xf32> to vector<16x16xf32>
    %20 = arith.subf %16, %19 : vector<16x16xf32>
    %21 = math.exp %20 : vector<16x16xf32>
    %cst_16 = arith.constant dense<0.000000e+00> : vector<16xf32>
    %22 = vector.multi_reduction <add>, %21, %cst_16 [1] : vector<16x16xf32> to vector<16xf32>
    %23 = vector.shape_cast %22 : vector<16xf32> to vector<16x1xf32>
    %24 = tpu.reciprocal %23 {approx = true} : vector<16x1xf32> -> vector<16x1xf32>
    %25 = vector.broadcast %24 : vector<16x1xf32> to vector<16x16xf32>
    %26 = arith.mulf %21, %25 : vector<16x16xf32>
    %27 = arith.truncf %26 : vector<16x16xf32> to vector<16x16xbf16>
    %cst_17 = arith.constant dense<0.000000e+00> : vector<16x32xf32>
    %28 = tpu.matmul %27, %13, %cst_17 {dimension_numbers = #tpu.dot_dimension_numbers<[1], [0], [0], [1], [0, 0, 1, 1], [], []>} : vector<16x16xbf16>, vector<16x32xbf16>, vector<16x32xf32> -> vector<16x32xf32>
    %29 = arith.truncf %28 : vector<16x32xf32> to vector<16x32xbf16>
    %c0_18 = arith.constant 0 : index
    %c0_19 = arith.constant 0 : index
    %30 = vector.load %arg17[%c0_18, %c0_19] : memref<16x128xbf16, #tpu.memory_space<vmem>>, vector<16x32xbf16>
    tpu.vector_store %arg17[%c0_18, %c0_19], %29 {strides = array<i32>} : memref<16x128xbf16, #tpu.memory_space<vmem>>, vector<16x32xbf16>,
    %c0_20 = arith.constant 0 : index
    %c32 = arith.constant 32 : index
    %31 = vector.load %arg16[%c0_20, %c32] : memref<16x384xbf16, #tpu.memory_space<vmem>>, vector<16x32xbf16>
    %c0_21 = arith.constant 0 : index
    %c160 = arith.constant 160 : index
    %32 = vector.load %arg16[%c0_21, %c160] : memref<16x384xbf16, #tpu.memory_space<vmem>>, vector<16x32xbf16>
    %c0_22 = arith.constant 0 : index
    %c288 = arith.constant 288 : index
    %33 = vector.load %arg16[%c0_22, %c288] : memref<16x384xbf16, #tpu.memory_space<vmem>>, vector<16x32xbf16>
    %cst_23 = arith.constant dense<0.000000e+00> : vector<16x16xf32>
    %34 = tpu.matmul %31, %32, %cst_23 {dimension_numbers = #tpu.dot_dimension_numbers<[1], [1], [0], [0], [0, 0, 1, 0], [], []>} : vector<16x32xbf16>, vector<16x32xbf16>, vector<16x16xf32> -> vector<16x16xf32>
    %35 = vector.broadcast %10 : vector<1x16xf32> to vector<16x16xf32>
    %36 = arith.addf %34, %35 : vector<16x16xf32>
    %cst_24 = arith.constant dense<0xFF800000> : vector<16xf32>
    %37 = vector.multi_reduction <maximumf>, %36, %cst_24 [1] : vector<16x16xf32> to vector<16xf32>
    %38 = vector.shape_cast %37 : vector<16xf32> to vector<16x1xf32>
    %39 = vector.broadcast %38 : vector<16x1xf32> to vector<16x16xf32>
    %40 = arith.subf %36, %39 : vector<16x16xf32>
    %41 = math.exp %40 : vector<16x16xf32>
    %cst_25 = arith.constant dense<0.000000e+00> : vector<16xf32>
    %42 = vector.multi_reduction <add>, %41, %cst_25 [1] : vector<16x16xf32> to vector<16xf32>
    %43 = vector.shape_cast %42 : vector<16xf32> to vector<16x1xf32>
    %44 = tpu.reciprocal %43 {approx = true} : vector<16x1xf32> -> vector<16x1xf32>
    %45 = vector.broadcast %44 : vector<16x1xf32> to vector<16x16xf32>
    %46 = arith.mulf %41, %45 : vector<16x16xf32>
    %47 = arith.truncf %46 : vector<16x16xf32> to vector<16x16xbf16>
    %cst_26 = arith.constant dense<0.000000e+00> : vector<16x32xf32>
    %48 = tpu.matmul %47, %33, %cst_26 {dimension_numbers = #tpu.dot_dimension_numbers<[1], [0], [0], [1], [0, 0, 1, 1], [], []>} : vector<16x16xbf16>, vector<16x32xbf16>, vector<16x32xf32> -> vector<16x32xf32>
    %49 = arith.truncf %48 : vector<16x32xf32> to vector<16x32xbf16>
    %c0_27 = arith.constant 0 : index
    %c32_28 = arith.constant 32 : index
    %50 = vector.load %arg17[%c0_27, %c32_28] : memref<16x128xbf16, #tpu.memory_space<vmem>>, vector<16x32xbf16>
    tpu.vector_store %arg17[%c0_27, %c32_28], %49 {strides = array<i32>} : memref<16x128xbf16, #tpu.memory_space<vmem>>, vector<16x32xbf16>,
    %c0_29 = arith.constant 0 : index
    %c64 = arith.constant 64 : index
    %51 = vector.load %arg16[%c0_29, %c64] : memref<16x384xbf16, #tpu.memory_space<vmem>>, vector<16x32xbf16>
    %c0_30 = arith.constant 0 : index
    %c192 = arith.constant 192 : index
    %52 = vector.load %arg16[%c0_30, %c192] : memref<16x384xbf16, #tpu.memory_space<vmem>>, vector<16x32xbf16>
    %c0_31 = arith.constant 0 : index
    %c320 = arith.constant 320 : index
    %53 = vector.load %arg16[%c0_31, %c320] : memref<16x384xbf16, #tpu.memory_space<vmem>>, vector<16x32xbf16>
    %cst_32 = arith.constant dense<0.000000e+00> : vector<16x16xf32>
    %54 = tpu.matmul %51, %52, %cst_32 {dimension_numbers = #tpu.dot_dimension_numbers<[1], [1], [0], [0], [0, 0, 1, 0], [], []>} : vector<16x32xbf16>, vector<16x32xbf16>, vector<16x16xf32> -> vector<16x16xf32>
    %55 = vector.broadcast %10 : vector<1x16xf32> to vector<16x16xf32>
    %56 = arith.addf %54, %55 : vector<16x16xf32>
    %cst_33 = arith.constant dense<0xFF800000> : vector<16xf32>
    %57 = vector.multi_reduction <maximumf>, %56, %cst_33 [1] : vector<16x16xf32> to vector<16xf32>
    %58 = vector.shape_cast %57 : vector<16xf32> to vector<16x1xf32>
    %59 = vector.broadcast %58 : vector<16x1xf32> to vector<16x16xf32>
    %60 = arith.subf %56, %59 : vector<16x16xf32>
    %61 = math.exp %60 : vector<16x16xf32>
    %cst_34 = arith.constant dense<0.000000e+00> : vector<16xf32>
    %62 = vector.multi_reduction <add>, %61, %cst_34 [1] : vector<16x16xf32> to vector<16xf32>
    %63 = vector.shape_cast %62 : vector<16xf32> to vector<16x1xf32>
    %64 = tpu.reciprocal %63 {approx = true} : vector<16x1xf32> -> vector<16x1xf32>
    %65 = vector.broadcast %64 : vector<16x1xf32> to vector<16x16xf32>
    %66 = arith.mulf %61, %65 : vector<16x16xf32>
    %67 = arith.truncf %66 : vector<16x16xf32> to vector<16x16xbf16>
    %cst_35 = arith.constant dense<0.000000e+00> : vector<16x32xf32>
    %68 = tpu.matmul %67, %53, %cst_35 {dimension_numbers = #tpu.dot_dimension_numbers<[1], [0], [0], [1], [0, 0, 1, 1], [], []>} : vector<16x16xbf16>, vector<16x32xbf16>, vector<16x32xf32> -> vector<16x32xf32>
    %69 = arith.truncf %68 : vector<16x32xf32> to vector<16x32xbf16>
    %c0_36 = arith.constant 0 : index
    %c64_37 = arith.constant 64 : index
    %70 = vector.load %arg17[%c0_36, %c64_37] : memref<16x128xbf16, #tpu.memory_space<vmem>>, vector<16x32xbf16>
    tpu.vector_store %arg17[%c0_36, %c64_37], %69 {strides = array<i32>} : memref<16x128xbf16, #tpu.memory_space<vmem>>, vector<16x32xbf16>,
    %c0_38 = arith.constant 0 : index
    %c96 = arith.constant 96 : index
    %71 = vector.load %arg16[%c0_38, %c96] : memref<16x384xbf16, #tpu.memory_space<vmem>>, vector<16x32xbf16>
    %c0_39 = arith.constant 0 : index
    %c224 = arith.constant 224 : index
    %72 = vector.load %arg16[%c0_39, %c224] : memref<16x384xbf16, #tpu.memory_space<vmem>>, vector<16x32xbf16>
    %c0_40 = arith.constant 0 : index
    %c352 = arith.constant 352 : index
    %73 = vector.load %arg16[%c0_40, %c352] : memref<16x384xbf16, #tpu.memory_space<vmem>>, vector<16x32xbf16>
    %cst_41 = arith.constant dense<0.000000e+00> : vector<16x16xf32>
    %74 = tpu.matmul %71, %72, %cst_41 {dimension_numbers = #tpu.dot_dimension_numbers<[1], [1], [0], [0], [0, 0, 1, 0], [], []>} : vector<16x32xbf16>, vector<16x32xbf16>, vector<16x16xf32> -> vector<16x16xf32>
    %75 = vector.broadcast %10 : vector<1x16xf32> to vector<16x16xf32>
    %76 = arith.addf %74, %75 : vector<16x16xf32>
    %cst_42 = arith.constant dense<0xFF800000> : vector<16xf32>
    %77 = vector.multi_reduction <maximumf>, %76, %cst_42 [1] : vector<16x16xf32> to vector<16xf32>
    %78 = vector.shape_cast %77 : vector<16xf32> to vector<16x1xf32>
    %79 = vector.broadcast %78 : vector<16x1xf32> to vector<16x16xf32>
    %80 = arith.subf %76, %79 : vector<16x16xf32>
    %81 = math.exp %80 : vector<16x16xf32>
    %cst_43 = arith.constant dense<0.000000e+00> : vector<16xf32>
    %82 = vector.multi_reduction <add>, %81, %cst_43 [1] : vector<16x16xf32> to vector<16xf32>
    %83 = vector.shape_cast %82 : vector<16xf32> to vector<16x1xf32>
    %84 = tpu.reciprocal %83 {approx = true} : vector<16x1xf32> -> vector<16x1xf32>
    %85 = vector.broadcast %84 : vector<16x1xf32> to vector<16x16xf32>
    %86 = arith.mulf %81, %85 : vector<16x16xf32>
    %87 = arith.truncf %86 : vector<16x16xf32> to vector<16x16xbf16>
    %cst_44 = arith.constant dense<0.000000e+00> : vector<16x32xf32>
    %88 = tpu.matmul %87, %73, %cst_44 {dimension_numbers = #tpu.dot_dimension_numbers<[1], [0], [0], [1], [0, 0, 1, 1], [], []>} : vector<16x16xbf16>, vector<16x32xbf16>, vector<16x32xf32> -> vector<16x32xf32>
    %89 = arith.truncf %88 : vector<16x32xf32> to vector<16x32xbf16>
    %c0_45 = arith.constant 0 : index
    %c96_46 = arith.constant 96 : index
    %90 = vector.load %arg17[%c0_45, %c96_46] : memref<16x128xbf16, #tpu.memory_space<vmem>>, vector<16x32xbf16>
    tpu.vector_store %arg17[%c0_45, %c96_46], %89 {strides = array<i32>} : memref<16x128xbf16, #tpu.memory_space<vmem>>, vector<16x32xbf16>,
    %c0_47 = arith.constant 0 : index
    %c0_48 = arith.constant 0 : index
    %91 = vector.load %arg17[%c0_47, %c0_48] : memref<16x128xbf16, #tpu.memory_space<vmem>>, vector<16x128xbf16>
    %c0_49 = arith.constant 0 : index
    %c0_50 = arith.constant 0 : index
    %92 = vector.load %arg5[%c0_49, %c0_50] : memref<128x128xbf16, #tpu.memory_space<vmem>>, vector<128x128xbf16>
    %cst_51 = arith.constant dense<0.000000e+00> : vector<16x128xf32>
    %93 = tpu.matmul %91, %92, %cst_51 {dimension_numbers = #tpu.dot_dimension_numbers<[1], [0], [0], [1], [0, 0, 1, 1], [], []>} : vector<16x128xbf16>, vector<128x128xbf16>, vector<16x128xf32> -> vector<16x128xf32>
    %c0_52 = arith.constant 0 : index
    %c0_53 = arith.constant 0 : index
    %94 = vector.load %arg6[%c0_52, %c0_53] : memref<1x128xf32, #tpu.memory_space<vmem>>, vector<1x128xf32>
    %95 = vector.broadcast %94 : vector<1x128xf32> to vector<16x128xf32>
    %96 = arith.addf %93, %95 : vector<16x128xf32>
    %97 = arith.addf %1, %96 : vector<16x128xf32>
    %c0_54 = arith.constant 0 : index
    %c0_55 = arith.constant 0 : index
    %98 = vector.load %arg7[%c0_54, %c0_55] : memref<1x128xf32, #tpu.memory_space<vmem>>, vector<1x128xf32>
    %c0_56 = arith.constant 0 : index
    %c0_57 = arith.constant 0 : index
    %99 = vector.load %arg8[%c0_56, %c0_57] : memref<1x128xf32, #tpu.memory_space<vmem>>, vector<1x128xf32>
    %cst_58 = arith.constant dense<0.000000e+00> : vector<16xf32>
    %100 = vector.multi_reduction <add>, %97, %cst_58 [1] : vector<16x128xf32> to vector<16xf32>
    %101 = vector.shape_cast %100 : vector<16xf32> to vector<16x1xf32>
    %cst_59 = arith.constant 1.280000e+02 : f32
    %102 = vector.broadcast %cst_59 : f32 to vector<16x1xf32>
    %103 = arith.divf %101, %102 : vector<16x1xf32>
    %104 = vector.broadcast %103 : vector<16x1xf32> to vector<16x128xf32>
    %105 = arith.subf %97, %104 : vector<16x128xf32>
    %106 = arith.mulf %105, %105 : vector<16x128xf32>
    %cst_60 = arith.constant dense<0.000000e+00> : vector<16xf32>
    %107 = vector.multi_reduction <add>, %106, %cst_60 [1] : vector<16x128xf32> to vector<16xf32>
    %108 = vector.shape_cast %107 : vector<16xf32> to vector<16x1xf32>
    %cst_61 = arith.constant 1.280000e+02 : f32
    %109 = vector.broadcast %cst_61 : f32 to vector<16x1xf32>
    %110 = arith.divf %108, %109 : vector<16x1xf32>
    %111 = vector.broadcast %103 : vector<16x1xf32> to vector<16x128xf32>
    %112 = arith.subf %97, %111 : vector<16x128xf32>
    %cst_62 = arith.constant 9.99999974E-6 : f32
    %113 = vector.broadcast %cst_62 : f32 to vector<16x1xf32>
    %114 = arith.addf %110, %113 : vector<16x1xf32>
    %115 = math.rsqrt %114 : vector<16x1xf32>
    %116 = vector.broadcast %115 : vector<16x1xf32> to vector<16x128xf32>
    %117 = arith.mulf %112, %116 : vector<16x128xf32>
    %118 = vector.broadcast %98 : vector<1x128xf32> to vector<16x128xf32>
    %119 = arith.mulf %117, %118 : vector<16x128xf32>
    %120 = vector.broadcast %99 : vector<1x128xf32> to vector<16x128xf32>
    %121 = arith.addf %119, %120 : vector<16x128xf32>
    %122 = arith.truncf %121 : vector<16x128xf32> to vector<16x128xbf16>
    %c0_63 = arith.constant 0 : index
    %c0_64 = arith.constant 0 : index
    %123 = vector.load %arg9[%c0_63, %c0_64] : memref<128x256xbf16, #tpu.memory_space<vmem>>, vector<128x256xbf16>
    %cst_65 = arith.constant dense<0.000000e+00> : vector<16x256xf32>
    %124 = tpu.matmul %122, %123, %cst_65 {dimension_numbers = #tpu.dot_dimension_numbers<[1], [0], [0], [1], [0, 0, 1, 1], [], []>} : vector<16x128xbf16>, vector<128x256xbf16>, vector<16x256xf32> -> vector<16x256xf32>
    %c0_66 = arith.constant 0 : index
    %c0_67 = arith.constant 0 : index
    %125 = vector.load %arg10[%c0_66, %c0_67] : memref<1x256xf32, #tpu.memory_space<vmem>>, vector<1x256xf32>
    %126 = vector.broadcast %125 : vector<1x256xf32> to vector<16x256xf32>
    %127 = arith.addf %124, %126 : vector<16x256xf32>
    %128 = arith.mulf %127, %127 : vector<16x256xf32>
    %129 = arith.mulf %127, %128 : vector<16x256xf32>
    %cst_68 = arith.constant 4.471500e-02 : f32
    %130 = vector.broadcast %cst_68 : f32 to vector<16x256xf32>
    %131 = arith.mulf %130, %129 : vector<16x256xf32>
    %132 = arith.addf %127, %131 : vector<16x256xf32>
    %cst_69 = arith.constant 0.797884583 : f32
    %133 = vector.broadcast %cst_69 : f32 to vector<16x256xf32>
    %134 = arith.mulf %133, %132 : vector<16x256xf32>
    %135 = math.tanh %134 : vector<16x256xf32>
    %cst_70 = arith.constant 1.000000e+00 : f32
    %136 = vector.broadcast %cst_70 : f32 to vector<16x256xf32>
    %137 = arith.addf %136, %135 : vector<16x256xf32>
    %cst_71 = arith.constant 5.000000e-01 : f32
    %138 = vector.broadcast %cst_71 : f32 to vector<16x256xf32>
    %139 = arith.mulf %138, %137 : vector<16x256xf32>
    %140 = arith.mulf %127, %139 : vector<16x256xf32>
    %141 = arith.truncf %140 : vector<16x256xf32> to vector<16x256xbf16>
    %c0_72 = arith.constant 0 : index
    %c0_73 = arith.constant 0 : index
    %142 = vector.load %arg11[%c0_72, %c0_73] : memref<256x128xbf16, #tpu.memory_space<vmem>>, vector<256x128xbf16>
    %cst_74 = arith.constant dense<0.000000e+00> : vector<16x128xf32>
    %143 = tpu.matmul %141, %142, %cst_74 {dimension_numbers = #tpu.dot_dimension_numbers<[1], [0], [0], [1], [0, 0, 1, 1], [], []>} : vector<16x256xbf16>, vector<256x128xbf16>, vector<16x128xf32> -> vector<16x128xf32>
    %c0_75 = arith.constant 0 : index
    %c0_76 = arith.constant 0 : index
    %144 = vector.load %arg12[%c0_75, %c0_76] : memref<1x128xf32, #tpu.memory_space<vmem>>, vector<1x128xf32>
    %145 = vector.broadcast %144 : vector<1x128xf32> to vector<16x128xf32>
    %146 = arith.addf %143, %145 : vector<16x128xf32>
    %147 = arith.addf %121, %146 : vector<16x128xf32>
    %c0_77 = arith.constant 0 : index
    %c0_78 = arith.constant 0 : index
    %148 = vector.load %arg13[%c0_77, %c0_78] : memref<1x128xf32, #tpu.memory_space<vmem>>, vector<1x128xf32>
    %c0_79 = arith.constant 0 : index
    %c0_80 = arith.constant 0 : index
    %149 = vector.load %arg14[%c0_79, %c0_80] : memref<1x128xf32, #tpu.memory_space<vmem>>, vector<1x128xf32>
    %cst_81 = arith.constant dense<0.000000e+00> : vector<16xf32>
    %150 = vector.multi_reduction <add>, %147, %cst_81 [1] : vector<16x128xf32> to vector<16xf32>
    %151 = vector.shape_cast %150 : vector<16xf32> to vector<16x1xf32>
    %cst_82 = arith.constant 1.280000e+02 : f32
    %152 = vector.broadcast %cst_82 : f32 to vector<16x1xf32>
    %153 = arith.divf %151, %152 : vector<16x1xf32>
    %154 = vector.broadcast %153 : vector<16x1xf32> to vector<16x128xf32>
    %155 = arith.subf %147, %154 : vector<16x128xf32>
    %156 = arith.mulf %155, %155 : vector<16x128xf32>
    %cst_83 = arith.constant dense<0.000000e+00> : vector<16xf32>
    %157 = vector.multi_reduction <add>, %156, %cst_83 [1] : vector<16x128xf32> to vector<16xf32>
    %158 = vector.shape_cast %157 : vector<16xf32> to vector<16x1xf32>
    %cst_84 = arith.constant 1.280000e+02 : f32
    %159 = vector.broadcast %cst_84 : f32 to vector<16x1xf32>
    %160 = arith.divf %158, %159 : vector<16x1xf32>
    %161 = vector.broadcast %153 : vector<16x1xf32> to vector<16x128xf32>
    %162 = arith.subf %147, %161 : vector<16x128xf32>
    %cst_85 = arith.constant 9.99999974E-6 : f32
    %163 = vector.broadcast %cst_85 : f32 to vector<16x1xf32>
    %164 = arith.addf %160, %163 : vector<16x1xf32>
    %165 = math.rsqrt %164 : vector<16x1xf32>
    %166 = vector.broadcast %165 : vector<16x1xf32> to vector<16x128xf32>
    %167 = arith.mulf %162, %166 : vector<16x128xf32>
    %168 = vector.broadcast %148 : vector<1x128xf32> to vector<16x128xf32>
    %169 = arith.mulf %167, %168 : vector<16x128xf32>
    %170 = vector.broadcast %149 : vector<1x128xf32> to vector<16x128xf32>
    %171 = arith.addf %169, %170 : vector<16x128xf32>
    %172 = arith.truncf %171 : vector<16x128xf32> to vector<16x128xbf16>
    %c0_86 = arith.constant 0 : index
    %c0_87 = arith.constant 0 : index
    %173 = vector.load %arg15[%c0_86, %c0_87] : memref<16x128xbf16, #tpu.memory_space<vmem>>, vector<16x128xbf16>
    tpu.vector_store %arg15[%c0_86, %c0_87], %172 {strides = array<i32>} : memref<16x128xbf16, #tpu.memory_space<vmem>>, vector<16x128xbf16>,
    return
  }
  func.func @transform_0(%arg0: i32) -> (i32, i32) {
    %c0_i32 = arith.constant 0 : i32
    %c0_i32_0 = arith.constant 0 : i32
    return %arg0, %c0_i32 : i32, i32
  }
  func.func @transform_1(%arg0: i32) -> (i32, i32, i32) {
    %c0_i32 = arith.constant 0 : i32
    %c0_i32_0 = arith.constant 0 : i32
    %c0_i32_1 = arith.constant 0 : i32
    return %arg0, %c0_i32, %c0_i32_0 : i32, i32, i32
  }
  func.func @transform_2(%arg0: i32) -> (i32, i32) {
    %c0_i32 = arith.constant 0 : i32
    %c0_i32_0 = arith.constant 0 : i32
    %c0_i32_1 = arith.constant 0 : i32
    return %c0_i32, %c0_i32_0 : i32, i32
  }
  func.func @transform_3(%arg0: i32) -> (i32, i32) {
    %c0_i32 = arith.constant 0 : i32
    %c0_i32_0 = arith.constant 0 : i32
    %c0_i32_1 = arith.constant 0 : i32
    return %c0_i32, %c0_i32_0 : i32, i32
  }
  func.func @transform_4(%arg0: i32) -> (i32, i32) {
    %c0_i32 = arith.constant 0 : i32
    %c0_i32_0 = arith.constant 0 : i32
    %c0_i32_1 = arith.constant 0 : i32
    return %c0_i32, %c0_i32_0 : i32, i32
  }
  func.func @transform_5(%arg0: i32) -> (i32, i32) {
    %c0_i32 = arith.constant 0 : i32
    %c0_i32_0 = arith.constant 0 : i32
    %c0_i32_1 = arith.constant 0 : i32
    return %c0_i32, %c0_i32_0 : i32, i32
  }
  func.func @transform_6(%arg0: i32) -> (i32, i32) {
    %c0_i32 = arith.constant 0 : i32
    %c0_i32_0 = arith.constant 0 : i32
    %c0_i32_1 = arith.constant 0 : i32
    return %c0_i32, %c0_i32_0 : i32, i32
  }
  func.func @transform_7(%arg0: i32) -> (i32, i32) {
    %c0_i32 = arith.constant 0 : i32
    %c0_i32_0 = arith.constant 0 : i32
    %c0_i32_1 = arith.constant 0 : i32
    return %c0_i32, %c0_i32_0 : i32, i32
  }
  func.func @transform_8(%arg0: i32) -> (i32, i32) {
    %c0_i32 = arith.constant 0 : i32
    %c0_i32_0 = arith.constant 0 : i32
    %c0_i32_1 = arith.constant 0 : i32
    return %c0_i32, %c0_i32_0 : i32, i32
  }
  func.func @transform_9(%arg0: i32) -> (i32, i32) {
    %c0_i32 = arith.constant 0 : i32
    %c0_i32_0 = arith.constant 0 : i32
    %c0_i32_1 = arith.constant 0 : i32
    return %c0_i32, %c0_i32_0 : i32, i32
  }
  func.func @transform_10(%arg0: i32) -> (i32, i32) {
    %c0_i32 = arith.constant 0 : i32
    %c0_i32_0 = arith.constant 0 : i32
    %c0_i32_1 = arith.constant 0 : i32
    return %c0_i32, %c0_i32_0 : i32, i32
  }
  func.func @transform_11(%arg0: i32) -> (i32, i32) {
    %c0_i32 = arith.constant 0 : i32
    %c0_i32_0 = arith.constant 0 : i32
    %c0_i32_1 = arith.constant 0 : i32
    return %c0_i32, %c0_i32_0 : i32, i32
  }
  func.func @transform_12(%arg0: i32) -> (i32, i32) {
    %c0_i32 = arith.constant 0 : i32
    %c0_i32_0 = arith.constant 0 : i32
    %c0_i32_1 = arith.constant 0 : i32
    return %c0_i32, %c0_i32_0 : i32, i32
  }
  func.func @transform_13(%arg0: i32) -> (i32, i32) {
    %c0_i32 = arith.constant 0 : i32
    %c0_i32_0 = arith.constant 0 : i32
    %c0_i32_1 = arith.constant 0 : i32
    return %c0_i32, %c0_i32_0 : i32, i32
  }
  func.func @transform_14(%arg0: i32) -> (i32, i32) {
    %c0_i32 = arith.constant 0 : i32
    %c0_i32_0 = arith.constant 0 : i32
    return %arg0, %c0_i32 : i32, i32
  }
}

</mosaic_0001>

<bundles_post_ra>
// kernel: bert_classifier_forward.4
= control target key start
LH: loop header
LB: loop body
LE: loop exit
PB: predicated region body
PF: predicated region fallthrough
CT: control target
= control target key end

     0   :  { %s345_s12 = smov 0   ;;  %s372_s0 = inlined_call_operand.vmem [shape: f32[32,128], index: 0, kind: input, shape index: {}]   ;;  %s373_s1 = inlined_call_operand.vmem [shape: f32[1,128], index: 1, kind: input, shape index: {}]   ;;  %s374_s2 = inlined_call_operand.vmem [shape: f32[1,128], index: 2, kind: input, shape index: {}]   ;;  %s375_s3 = inlined_call_operand.vmem [shape: bf16[32,128], index: 3, kind: output, shape index: {}]  }
   0x1 LB: > { %s283_s13 = sadd.s32 4294967295, %s323_s12   ;;  %p287_p0 = scmp.ge.s32.totalorder %s323_s12, 1  ;;  %s323_s12 = sphi %s345_s12, %s13_s12  }
   0x2   : > { %p138_p1 = scmp.lt.s32.totalorder %s323_s12, 3 }
   0x4   : > { %p139_p2 = pnand %p287_p0, %p138_p1 }
   0x5   : > { %s288_s14 = sshll.u32 (!%p139_p2), %s283_s13, 1  ;;  %v292_v18 = vld [vmem:[%s373_s1] ss:$0 sm:$0xff] (!%p139_p2) }
   0x6   : > { %142 = sbr.rel (%p139_p2) target bundleno = 335 (0x14f), region = 32  ;;  %p163_p3 = scmp.lt.s32.totalorder (!%p139_p2), %s288_s14, 3  ;;  %v293_v22 = vld [vmem:[%s374_s2] ss:$0 sm:$0xff] (!%p139_p2) }
   0xd   : > { %s377_s14 = smov (!%p163_p3, %s288_s14), 3 }
   0xe   : > { %s289_s15 = sshll.u32 %s377_s14, 3  ;;  %s291_s23 = sshll.u32 %s377_s14, 2 }
   0xf   : > { %s166_s18 = scalar_lea.vmem %s372_s0, %s289_s15  ;;  %s172_s26 = scalar_lea.vmem %s375_s3, %s291_s23 }
  0x10   : > { %v174_v0 = vld [vmem:[%s166_s18] sm:$0xff]  ;;  %v175_v1 = vld [vmem:[%s166_s18 + $0x8] sm:$0xff] }
  0x11   : > { %178 = vadd.xlane.f32.xlu0 %v174_v0 }
  0x15   : > { %180 = vadd.xlane.f32.xlu0 %v175_v1 }
  0x9e   : > { %v179_v2 = vpop.xlane.xlu0 %178 }
  0x9f   : > { %v183_v3 = vmul.f32 0.0078125, %v179_v2 }
  0xa1   : > { %v185_v4 = vsub.f32 %v174_v0, %v183_v3 }
  0xa2   : > { %v181_v5 = vpop.xlane.xlu0 %180 }
  0xa3   : > { %v184_v6 = vmul.f32 0.0078125, %v181_v5  ;;  %v187_v7 = vmul.f32 %v185_v4, %v185_v4 }
  0xa5   : > { %v186_v8 = vsub.f32 %v175_v1, %v184_v6  ;;  %189 = vadd.xlane.f32.xlu1 %v187_v7 }
  0xa7   : > { %v188_v9 = vmul.f32 %v186_v8, %v186_v8 }
  0xa9   : > { %191 = vadd.xlane.f32.xlu1 %v188_v9 }
 0x132   : > { %v190_v10 = vpop.xlane.xlu1 %189 }
 0x133   : > { %v193_v11 = vmul.f32 0.0078125, %v190_v10 }
 0x135   : > { %v195_v12 = vadd.f32 1e-05, %v193_v11 }
 0x136   : > { %v192_v13 = vpop.xlane.xlu1 %191 }
 0x137   : > { %313 = vrsqrt.f32 %v195_v12  ;;  %v194_v14 = vmul.f32 0.0078125, %v192_v13 }
 0x139   : > { %v196_v15 = vadd.f32 1e-05, %v194_v14 }
 0x13b   : > { %315 = vrsqrt.f32 %v196_v15 }
 0x141   : > { %v314_v16 = vpop.eup %313 }
 0x142   : > { %v199_v17 = vmul.f32 %v314_v16, %v185_v4 }
 0x144   : > { %v207_v20 = vmul.f32 %v292_v18, %v199_v17 }
 0x145   : > { %v316_v19 = vpop.eup %315 }
 0x146   : > { %v200_v21 = vmul.f32 %v316_v19, %v186_v8  ;;  %v215_v24 = vadd.f32 %v293_v22, %v207_v20 }
 0x148   : > { %v208_v23 = vmul.f32 %v292_v18, %v200_v21 }
 0x14a   : > { %v216_v25 = vadd.f32 %v293_v22, %v208_v23 }
 0x14c   : > { %v303_v26 = vpack.c.bf16 %v216_v25, %v215_v24 }
 0x14e   : > { %304 = vst [vmem:[%s172_s26] sm:$0xff] %v303_v26  }
 0x14f PF: > { %s13_s12 = sadd.s32 1, %s323_s12  }
 0x150   : > { %p10_p4 = scmp.ge.s32.totalorder %s13_s12, 4  }
 0x152   :  { %12 = sbr.rel (!%p10_p4) target bundleno = 1 (0x1), region = 62 }

// kernel: bert_classifier_forward.7
= control target key start
LH: loop header
LB: loop body
LE: loop exit
PB: predicated region body
PF: predicated region fallthrough
CT: control target
= control target key end

     0   :  { %v383_v1 = vmov 0.0   ;;  %vm384_vm0 = vmmov 0   ;;  %s485_s0 = inlined_call_operand.vmem [shape: bf16[2,128], index: 0, kind: input, shape index: {}]   ;;  %s486_s1 = inlined_call_operand.vmem [shape: bf16[128,128], index: 1, kind: input, shape index: {}]   ;;  %s487_s2 = inlined_call_operand.vmem [shape: f32[1,128], index: 2, kind: input, shape index: {}]   ;;  %s488_s3 = inlined_call_operand.vmem [shape: bf16[128,128], index: 3, kind: input, shape index: {}]   ;;  %s489_s4 = inlined_call_operand.vmem [shape: f32[1,128], index: 4, kind: input, shape index: {}]   ;;  %s490_s5 = inlined_call_operand.hbm [shape: f32[2,128], index: 5, kind: output, shape index: {}]  }
   0x1   :  { %v341_v0 = vld [vmem:[%s486_s1] sm:$0xff]   ;;  %298 = vmatprep.subr.bf16.mxu0 %v383_v1  ;;  %318 = vmatprep.subr.bf16.mxu1 %v383_v1  ;;  %v342_v2 = vld [vmem:[%s486_s1 + $0x8] sm:$0xff]   ;;  %v343_v3 = vld [vmem:[%s486_s1 + $0x10] sm:$0xff]  }
   0x2   :  { %299 = vmatpush3.bf16.msra.mxu0 %v341_v0  ;;  %314 = vmatprep.mubr.msk.bf16.mxu0 %vm384_vm0, %v383_v1  ;;  %v349_v4 = vld [vmem:[%s488_s3] sm:$0xff]   ;;  %v344_v5 = vld [vmem:[%s486_s1 + $0x18] sm:$0xff]   ;;  %v350_v6 = vld [vmem:[%s488_s3 + $0x8] sm:$0xff]  }
   0x3   :  { %300 = vmatprep.subr.bf16.mxu0 %v383_v1  ;;  %334 = vmatprep.mubr.msk.bf16.mxu1 %vm384_vm0, %v383_v1  ;;  %v345_v7 = vld [vmem:[%s486_s1 + $0x20] sm:$0xff]   ;;  %v351_v8 = vld [vmem:[%s488_s3 + $0x10] sm:$0xff]  }
   0x4   :  { %319 = vmatpush3.bf16.msra.mxu1 %v349_v4 }
   0x5   :  { %320 = vmatprep.subr.bf16.mxu1 %v383_v1 }
   0x6   :  { %301 = vmatpush3.bf16.msra.mxu0 %v342_v2 }
   0x7   :  { %302 = vmatprep.subr.bf16.mxu0 %v383_v1 }
   0x8   :  { %321 = vmatpush3.bf16.msra.mxu1 %v350_v6 }
   0xa   :  { %303 = vmatpush3.bf16.msra.mxu0 %v343_v3 }
   0xb   :  { %304 = vmatprep.subr.bf16.mxu0 %v383_v1 }
   0xe   :  { %305 = vmatpush3.bf16.msra.mxu0 %v344_v5 }
   0xf   :  { %306 = vmatprep.subr.bf16.mxu0 %v383_v1 }
  0x10   :  { %10 = vsyncpa [#allocation3], 0  ;;  %322 = vmatprep.subr.bf16.mxu1 %v383_v1  ;;  %v346_v9 = vld [vmem:[%s486_s1 + $0x28] sm:$0xff]   ;;  %v352_v10 = vld [vmem:[%s488_s3 + $0x18] sm:$0xff]   ;;  %s385_s29 = smov [#allocation2]  }
  0x11   :  { %323 = vmatpush3.bf16.msra.mxu1 %v351_v8  ;;  %v347_v11 = vld [vmem:[%s486_s1 + $0x30] sm:$0xff]   ;;  %v348_v12 = vld [vmem:[%s486_s1 + $0x38] sm:$0xff]   ;;  %v22_v13 = vld [vmem:[%s485_s0] sm:$0x1] }
  0x12   :  { %307 = vmatpush3.bf16.msra.mxu0 %v345_v7  ;;  %324 = vmatprep.subr.bf16.mxu1 %v383_v1  ;;  %v353_v14 = vld [vmem:[%s488_s3 + $0x20] sm:$0xff]   ;;  %v354_v15 = vld [vmem:[%s488_s3 + $0x28] sm:$0xff]   ;;  %v355_v16 = vld [vmem:[%s488_s3 + $0x30] sm:$0xff]  }
  0x13   :  { %308 = vmatprep.subr.bf16.mxu0 %v383_v1  ;;  %v356_v17 = vld [vmem:[%s488_s3 + $0x38] sm:$0xff]   ;;  %v262_v18 = vld [vmem:[%s487_s2] ss:$0 sm:$0xff]  ;;  %s254_s3 = sshll.u32 %s385_s29, 4  ;;  %s255_s3 = int_to_ptr.vmem [resolvable:$true] %s254_s3 }
  0x14   :  { %v271_v26 = vld [vmem:[%s489_s4] ss:$0 sm:$0xff]  ;;  %s359_s2 = scalar_lea.vmem %s255_s3, 32  ;;  %p364_p1 = scmp.lt.s32.totalorder %s255_s3, %s255_s3 }
  0x15   :  { %325 = vmatpush3.bf16.msra.mxu1 %v352_v10  ;;  %p360_p0 = scmp.ne.s32.totalorder %s255_s3, %s359_s2  ;;  %p365_p2 = scmp.lt.s32.totalorder %s359_s2, %s359_s2 }
  0x16   :  { %309 = vmatpush3.bf16.msra.mxu0 %v346_v9  ;;  %326 = vmatprep.subr.bf16.mxu1 %v383_v1 }
  0x17   :  { %310 = vmatprep.subr.bf16.mxu0 %v383_v1  ;;  %p366_p3 = por %p365_p2, %p364_p1 }
  0x19   :  { %327 = vmatpush3.bf16.msra.mxu1 %v353_v14  ;;  %p367_p4 = pnand %p366_p3, %p360_p0 }
  0x1a   :  { %311 = vmatpush3.bf16.msra.mxu0 %v347_v11  ;;  %328 = vmatprep.subr.bf16.mxu1 %v383_v1 }
  0x1b   :  { %312 = vmatprep.subr.bf16.mxu0 %v383_v1 }
  0x1d   :  { %329 = vmatpush3.bf16.msra.mxu1 %v354_v15 }
  0x1e   :  { %313 = vmatpush3.bf16.msra.mxu0 %v348_v12  ;;  %330 = vmatprep.subr.bf16.mxu1 %v383_v1 }
  0x21   :  { %315 = vmatmul.mubr.bf16.vlgmr.msra.gmra.mrb[0].mxu0 %v22_v13  ;;  %331 = vmatpush3.bf16.msra.mxu1 %v355_v16 }
  0x22   :  { %332 = vmatprep.subr.bf16.mxu1 %v383_v1 }
  0x25   :  { %333 = vmatpush3.bf16.msra.mxu1 %v356_v17 }
  0xf4   :  { %v128_v19 = vpop.f32.mrb[0].mxu0 }
  0xf5   :  { %v129_v20 = vadd.f32 %v262_v18, %v128_v19  ;;  %v316_v21 = vpop.f32.mrb[1].mxu0 }
  0xf6   :  { %v131_v22 = vpop.f32.mrb[2].mxu0 }
  0xf7   :  { %357 = vtanh.f32 %v129_v20  ;;  %v317_v23 = vpop.f32.mrb[3].mxu0 }
 0x101   :  { %v358_v24 = vpop.eup %357 }
 0x102   :  { %v135_v25 = vpack.c.bf16 %v358_v24, %v358_v24 }
 0x104   :  { %335 = vmatmul.mubr.bf16.vlgmr.msra.gmra.mrb[0].mxu1 %v135_v25 }
 0x1d7   :  { %v241_v27 = vpop.f32.mrb[0].mxu1 }
 0x1d8   :  { %v242_v28 = vadd.f32 %v271_v26, %v241_v27  ;;  %v336_v29 = vpop.f32.mrb[1].mxu1 }
 0x1d9   :  { %v244_v30 = vpop.f32.mrb[2].mxu1 }
 0x1da   :  { %247 = vst [vmem:[#allocation2] sm:$0x3] %v242_v28  ;;  %v337_v31 = vpop.f32.mrb[3].mxu1 }
 0x1db   :  { %370 = shalt.err (!%p367_p4)
}
 0x1dc   :  { %s371_s4 = scalar_lea.hbm %s490_s5, 32 }
 0x1dd   :  { %p372_p5 = scmp.ne.s32.totalorder %s490_s5, %s371_s4  ;;  %p375_p6 = scmp.lt.u32.totalorder %s371_s4, %s490_s5 }
 0x1df   :  { %p377_p7 = pnand %p375_p6, %p372_p5 }
 0x1e1   :  { %380 = shalt.err (!%p377_p7)
}
 0x1e2   :  { %257 = dma.vmem_to_hbm [thread:$0]  %s255_s3, 32, %s490_s5, [#allocation3]  }
 0x1e3   :  { %381 = dma.done.wait [#allocation3], 32  }
 0x1e4   :  { %382 = vsyncadd [#allocation3], 4294967264 }
 0x1e5   :  { %261 = vsyncpa [#allocation3], 1 }

// kernel: bert_classifier_forward.5
= control target key start
LH: loop header
LB: loop body
LE: loop exit
PB: predicated region body
PF: predicated region fallthrough
CT: control target
= control target key end

     0   :  { %s3258_s0 = inlined_call_operand.vmem [shape: bf16[32,128], index: 0, kind: input, shape index: {}]   ;;  %s3259_s1 = inlined_call_operand.vmem [shape: f32[2,1,16], index: 1, kind: input, shape index: {}]   ;;  %s3260_s2 = inlined_call_operand.vmem [shape: bf16[128,384], index: 2, kind: input, shape index: {}]   ;;  %s3261_s3 = inlined_call_operand.vmem [shape: f32[1,384], index: 3, kind: input, shape index: {}]   ;;  %s3262_s4 = inlined_call_operand.vmem [shape: bf16[128,128], index: 4, kind: input, shape index: {}]   ;;  %s3263_s5 = inlined_call_operand.vmem [shape: f32[1,128], index: 5, kind: input, shape index: {}]   ;;  %s3264_s6 = inlined_call_operand.hbm [shape: f32[1,128], index: 6, kind: input, shape index: {}]   ;;  %s3265_s7 = inlined_call_operand.hbm [shape: f32[1,128], index: 7, kind: input, shape index: {}]   ;;  %s3266_s8 = inlined_call_operand.vmem [shape: bf16[128,256], index: 8, kind: input, shape index: {}]   ;;  %s3267_s9 = inlined_call_operand.vmem [shape: f32[1,256], index: 9, kind: input, shape index: {}]   ;;  %s3268_s10 = inlined_call_operand.vmem [shape: bf16[256,128], index: 10, kind: input, shape index: {}]   ;;  %s3269_s11 = inlined_call_operand.hbm [shape: f32[1,128], index: 11, kind: input, shape index: {}]   ;;  %s3270_s12 = inlined_call_operand.hbm [shape: f32[1,128], index: 12, kind: input, shape index: {}]   ;;  %s3271_s13 = inlined_call_operand.hbm [shape: f32[1,128], index: 13, kind: input, shape index: {}]   ;;  %s3272_s14 = inlined_call_operand.vmem [shape: bf16[32,128], index: 14, kind: output, shape index: {}]  }
   0x1   :  { %3276 = sst [smem:[#allocation16_spill]] %s3272_s14 }
   0x2   :  { %19 = vsyncpa [#allocation5], 0 }
   0x3   :  { %20 = vsyncpa [#allocation7], 0 }
   0x4   :  { %21 = vsyncpa [#allocation10], 0  ;;  %s2740_s29 = smov 0  }
   0x5 LB: > { %3277 = sst [smem:[#allocation15_spill]] %s2652_s29  ;;  %s2654_s30 = smov [#allocation6]   ;;  %s2652_s29 = sphi %s2740_s29, %s27_s29  }
   0x6   : > { %s398_s15 = sshll.u32 %s2654_s30, 4  ;;  %s2746_s16 = sadd.s32 4294967295, %s2652_s29   ;;  %s2751_s15 = int_to_ptr.vmem [resolvable:$true] %s398_s15 }
   0x7   : > { %p2047_p0 = scmp.ge.s32.totalorder %s2652_s29, 1  ;;  %p362_p1 = scmp.lt.s32.totalorder %s2652_s29, 3 }
   0x8   : > { %p3274_p2 = scmp.eq.s32.totalorder %s2746_s16, 0  ;;  %s2655_s18 = smov [#allocation9]  }
   0x9   : > { %p2753_p3 = pnand %p2047_p0, %p362_p1  ;;  %s429_s19 = sshll.u32 %s2655_s18, 4  ;;  %s2759_s19 = int_to_ptr.vmem [resolvable:$true] %s429_s19 }
   0xa   : > { %s2656_s20 = smov [#allocation4]   ;;  %s2657_s23 = smov [#allocation8]  }
   0xb   : > { %s3278_s17 = scalar_select %p2753_p3, 1, 0 }
   0xc   : > { %p2319_p4 = pneg %p2753_p3  ;;  %s387_s21 = sshll.u32 %s2656_s20, 4  ;;  %s2767_s21 = int_to_ptr.vmem [resolvable:$true] %s387_s21 }
   0xd   : > { %s418_s24 = sshll.u32 %s2657_s23, 4  ;;  %s2494_s27 = scalar_lea.hbm %s3265_s7, 16  ;;  %s2769_s24 = int_to_ptr.vmem [resolvable:$true] %s418_s24 }
   0xe   : > { %p2763_p5 = pnand %p3274_p2, %p2319_p4  ;;  %p2495_p6 = scmp.ne.s32.totalorder %s3265_s7, %s2494_s27 }
   0xf   : > { %p2501_p10 = scmp.lt.u32.totalorder %s2494_s27, %s3265_s7 }
  0x10   : > { %p2779_p7 = pneg %p2763_p5 }
  0x12   : > { %p2497_p8 = pnand %p2779_p7, %p2495_p6 }
  0x14   : > { %p2498_p9 = pneg %p2497_p8 }
  0x16   : > { %p2503_p11 = pnand %p2501_p10, %p2498_p9 }
  0x18   : > { %2506 = shalt.err (!%p2503_p11)
}
  0x19   : > { %s2507_s25 = scalar_lea.vmem %s2751_s15, 16  ;;  %s2514_s26 = scalar_lea.vmem %s2751_s15, 32 }
  0x1a   : > { %p2508_p12 = scmp.ne.s32.totalorder %s2751_s15, %s2507_s25  ;;  %p2515_p1 = scmp.lt.s32.totalorder %s2751_s15, %s2751_s15 }
  0x1b   : > { %p2516_p4 = scmp.lt.s32.totalorder %s2514_s26, %s2507_s25 }
  0x1c   : > { %p2510_p13 = pnand %p2508_p12, %p2779_p7 }
  0x1d   : > { %p2517_p6 = por %p2516_p4, %p2515_p1 }
  0x1e   : > { %p2511_p0 = pneg %p2510_p13 }
  0x20   : > { %p2518_p8 = pnand %p2517_p6, %p2511_p0 }
  0x22   : > { %2521 = shalt.err (!%p2518_p8)
}
  0x23   : > { %2325 = dma.hbm_to_vmem [thread:$0]  (!%p2763_p5), %s3265_s7, 16, %s2751_s15, [#allocation7]  }
  0x24   : > { %s2522_s23 = scalar_lea.hbm %s3270_s12, 16 }
  0x25   : > { %p2523_p9 = scmp.ne.s32.totalorder %s3270_s12, %s2522_s23  ;;  %p2529_p12 = scmp.lt.u32.totalorder %s2522_s23, %s3270_s12 }
  0x27   : > { %p2525_p10 = pnand %p2523_p9, %p2779_p7 }
  0x29   : > { %p2526_p11 = pneg %p2525_p10 }
  0x2b   : > { %p2531_p13 = pnand %p2529_p12, %p2526_p11 }
  0x2d   : > { %2534 = shalt.err (!%p2531_p13)
}
  0x2e   : > { %s2535_s15 = scalar_lea.vmem %s2759_s19, 16  ;;  %s2542_s14 = scalar_lea.vmem %s2759_s19, 32 }
  0x2f   : > { %p2536_p0 = scmp.ne.s32.totalorder %s2759_s19, %s2535_s15  ;;  %p2543_p6 = scmp.lt.s32.totalorder %s2759_s19, %s2759_s19 }
  0x30   : > { %p2544_p8 = scmp.lt.s32.totalorder %s2542_s14, %s2535_s15 }
  0x31   : > { %p2538_p1 = pnand %p2536_p0, %p2779_p7 }
  0x32   : > { %p2545_p9 = por %p2544_p8, %p2543_p6 }
  0x33   : > { %p2539_p4 = pneg %p2538_p1 }
  0x35   : > { %p2546_p10 = pnand %p2545_p9, %p2539_p4 }
  0x37   : > { %2549 = shalt.err (!%p2546_p10)
}
  0x38   : > { %2331 = dma.hbm_to_vmem [thread:$0]  (!%p2763_p5), %s3270_s12, 16, %s2759_s19, [#allocation10]  }
  0x39   : > { %s2550_s20 = scalar_lea.hbm %s3264_s6, 16 }
  0x3a   : > { %p2551_p11 = scmp.ne.s32.totalorder %s3264_s6, %s2550_s20  ;;  %p2557_p0 = scmp.lt.u32.totalorder %s2550_s20, %s3264_s6 }
  0x3c   : > { %p2553_p12 = pnand %p2551_p11, %p2779_p7 }
  0x3e   : > { %p2554_p13 = pneg %p2553_p12 }
  0x40   : > { %p2559_p1 = pnand %p2557_p0, %p2554_p13 }
  0x42   : > { %2562 = shalt.err (!%p2559_p1)
}
  0x43   : > { %s2563_s19 = scalar_lea.vmem %s2767_s21, 16  ;;  %s2570_s14 = scalar_lea.vmem %s2767_s21, 32 }
  0x44   : > { %p2564_p4 = scmp.ne.s32.totalorder %s2767_s21, %s2563_s19  ;;  %p2571_p9 = scmp.lt.s32.totalorder %s2767_s21, %s2767_s21 }
  0x45   : > { %p2572_p10 = scmp.lt.s32.totalorder %s2570_s14, %s2563_s19 }
  0x46   : > { %p2566_p6 = pnand %p2564_p4, %p2779_p7 }
  0x47   : > { %p2573_p11 = por %p2572_p10, %p2571_p9 }
  0x48   : > { %p2567_p8 = pneg %p2566_p6 }
  0x4a   : > { %p2574_p12 = pnand %p2573_p11, %p2567_p8 }
  0x4c   : > { %2577 = shalt.err (!%p2574_p12)
}
  0x4d   : > { %2322 = dma.hbm_to_vmem [thread:$0]  (!%p2763_p5), %s3264_s6, 16, %s2767_s21, [#allocation5]  }
  0x4e   : > { %s2578_s20 = scalar_lea.hbm %s3269_s11, 16 }
  0x4f   : > { %p2579_p13 = scmp.ne.s32.totalorder %s3269_s11, %s2578_s20  ;;  %p2585_p4 = scmp.lt.u32.totalorder %s2578_s20, %s3269_s11 }
  0x51   : > { %p2581_p0 = pnand %p2579_p13, %p2779_p7 }
  0x53   : > { %p2582_p1 = pneg %p2581_p0 }
  0x55   : > { %p2587_p6 = pnand %p2585_p4, %p2582_p1 }
  0x57   : > { %2590 = shalt.err (!%p2587_p6)
}
  0x58   : > { %s2591_s21 = scalar_lea.vmem %s2769_s24, 16  ;;  %s2598_s19 = scalar_lea.vmem %s2769_s24, 32 }
  0x59   : > { %p2592_p8 = scmp.ne.s32.totalorder %s2769_s24, %s2591_s21  ;;  %p2599_p11 = scmp.lt.s32.totalorder %s2769_s24, %s2769_s24 }
  0x5a   : > { %p2600_p12 = scmp.lt.s32.totalorder %s2598_s19, %s2591_s21 }
  0x5b   : > { %p2594_p9 = pnand %p2592_p8, %p2779_p7 }
  0x5c   : > { %p2601_p13 = por %p2600_p12, %p2599_p11 }
  0x5d   : > { %p2595_p10 = pneg %p2594_p9 }
  0x5f   : > { %p2602_p0 = pnand %p2601_p13, %p2595_p10 }
  0x61   : > { %2605 = shalt.err (!%p2602_p0)
}
  0x62   : > { %2328 = dma.hbm_to_vmem [thread:$0]  (!%p2763_p5), %s3269_s11, 16, %s2769_s24, [#allocation7]  }
  0x63   : > { %s2658_s27 = smov [#allocation11]   ;;  %s2606_s23 = scalar_lea.hbm %s3271_s13, 16 }
  0x64   : > { %s440_s28 = sshll.u32 %s2658_s27, 4  ;;  %p2607_p1 = scmp.ne.s32.totalorder %s3271_s13, %s2606_s23  ;;  %s441_s28 = int_to_ptr.vmem [resolvable:$true] %s440_s28 }
  0x65   : > { %p2613_p8 = scmp.lt.u32.totalorder %s2606_s23, %s3271_s13 }
  0x66   : > { %p2609_p4 = pnand %p2607_p1, %p2779_p7 }
  0x68   : > { %p2610_p6 = pneg %p2609_p4 }
  0x6a   : > { %p2615_p9 = pnand %p2613_p8, %p2610_p6 }
  0x6c   : > { %2618 = shalt.err (!%p2615_p9)
}
  0x6d   : > { %s2619_s24 = scalar_lea.vmem %s441_s28, 16  ;;  %s2626_s19 = scalar_lea.vmem %s441_s28, 32 }
  0x6e   : > { %p2620_p10 = scmp.ne.s32.totalorder %s441_s28, %s2619_s24  ;;  %p2627_p13 = scmp.lt.s32.totalorder %s441_s28, %s441_s28 }
  0x6f   : > { %p2628_p0 = scmp.lt.s32.totalorder %s2626_s19, %s2619_s24 }
  0x70   : > { %p2622_p11 = pnand %p2620_p10, %p2779_p7 }
  0x71   : > { %p2629_p2 = por %p2628_p0, %p2627_p13 }
  0x72   : > { %p2623_p12 = pneg %p2622_p11 }
  0x74   : > { %p2630_p3 = pnand %p2629_p2, %p2623_p12 }
  0x76   : > { %2633 = shalt.err (!%p2630_p3)
}
  0x77   : > { %2334 = dma.hbm_to_vmem [thread:$0]  (!%p2763_p5), %s3271_s13, 16, %s441_s28, [#allocation10]  }
  0x78   : > { %p3281_p1 = scmp.ne.s32.totalorder %s3278_s17, 0 }
  0x79   : > { %p3282_p4 = scmp.eq.s32.totalorder (!%p3281_p1), %s2746_s16, 0 }
  0x7a   : > { %468 = sbr.rel (%p3281_p1) target bundleno = 3157 (0xc55), region = 76 }
  0x81   : > { %2639 = dma.done.wait (%p3282_p4), [#allocation5], 16   ;;  %p3283_p7 = pmov %p3282_p4 }
  0x82   : > { %p3284_p6 = pmov %p3282_p4 }
  0x83   : > { %2641 = vsyncadd (%p3283_p7), [#allocation5], 4294967280 }
  0x84   : > { %2643 = dma.done.wait (%p3284_p6), [#allocation7], 32   ;;  %p3285_p2 = pmov %p3282_p4 }
  0x86   : > { %2645 = vsyncadd (%p3285_p2), [#allocation7], 4294967264  ;;  %p3286_p3 = pmov %p3285_p2 }
  0x87   : > { %p3287_p5 = pmov %p3285_p2 }
  0x88   : > { %2647 = dma.done.wait (%p3286_p3), [#allocation10], 32  }
  0x89   : > { %2649 = vsyncadd (%p3287_p5), [#allocation10], 4294967264  ;;  %v2659_v0 = vmov 0   ;;  %v2660_v1 = vmov 0.0   ;;  %v2364_v2 = vld [vmem:[%s3260_s2 + $0x4] ss:$12 sps:$4 sm:$0xff]   ;;  %v587_v27 = vlaneseq }
  0x8a   : > { %768 = vmatprep.mubr.bf16.mxu0 %v2659_v0  ;;  %2211 = vmatprep.subr.bf16.mxu1 %v2660_v1  ;;  %v2366_v3 = vld [vmem:[%s3260_s2] ss:$12 sps:$4 sm:$0xff]   ;;  %v2367_v4 = vld [vmem:[%s3260_s2 + $0x1c] ss:$12 sps:$4 sm:$0xff]   ;;  %v2369_v5 = vld [vmem:[%s3260_s2 + $0x18] ss:$12 sps:$4 sm:$0xff]  }
  0x8b   : > { %736 = vmatprep.subr.bf16.mxu0 %v2364_v2  ;;  %s2060_s25 = sshll.u32 %s2746_s16, 1  ;;  %v2370_v6 = vld [vmem:[%s3260_s2 + $0x34] ss:$12 sps:$4 sm:$0xff]   ;;  %v2372_v7 = vld [vmem:[%s3260_s2 + $0x30] ss:$12 sps:$4 sm:$0xff]   ;;  %vm2661_vm0 = vmmov 0  }
  0x8c   : > { %737 = vmatpush1.bf16.msra.mxu0 %v2366_v3  ;;  %p534_p8 = scmp.lt.s32.totalorder %s2060_s25, 3  ;;  %v2373_v8 = vld [vmem:[%s3260_s2 + $0x4c] ss:$12 sps:$4 sm:$0xff]   ;;  %v2375_v9 = vld [vmem:[%s3260_s2 + $0x48] ss:$12 sps:$4 sm:$0xff]   ;;  %2227 = vmatprep.mubr.msk.bf16.mxu1 %vm2661_vm0, %v2660_v1  ;;  %v3007_v28 = vshrl.u32 %v587_v27, 7 }
  0x8d   : > { %738 = vmatprep.subr.bf16.mxu0 %v2367_v4  ;;  %v2389_v10 = vld [vmem:[%s3260_s2 + $0x8] ss:$12 sps:$4 sm:$0xff]   ;;  %v2376_v11 = vld [vmem:[%s3260_s2 + $0x64] ss:$12 sps:$4 sm:$0xff]   ;;  %v2390_v12 = vld [vmem:[%s3260_s2 + $0x20] ss:$12 sps:$4 sm:$0xff]  }
  0x8e   : > { %s3291_s25 = smov (!%p534_p8, %s2060_s25), 3  ;;  %2212 = vmatpush3.bf16.msra.mxu1 %v2389_v10  ;;  %v2378_v13 = vld [vmem:[%s3260_s2 + $0x60] ss:$12 sps:$4 sm:$0xff]   ;;  %v2379_v14 = vld [vmem:[%s3260_s2 + $0x7c] ss:$12 sps:$4 sm:$0xff]   ;;  %v589_v29 = vsub.s32 0, %v3007_v28 }
  0x8f   : > { %s2061_s23 = sshll.u32 %s3291_s25, 2  ;;  %2213 = vmatprep.subr.bf16.mxu1 %v2660_v1  ;;  %v2381_v15 = vld [vmem:[%s3260_s2 + $0x78] ss:$12 sps:$4 sm:$0xff]   ;;  %v2382_v17 = vld [vmem:[%s3260_s2 + $0x94] ss:$12 sps:$4 sm:$0xff]   ;;  %v593_v31 = vsub.s32 1, %v3007_v28 }
  0x90   : > { %739 = vmatpush1.bf16.msra.mxu0 %v2369_v5  ;;  %v2391_v16 = vld [vmem:[%s3260_s2 + $0x38] ss:$12 sps:$4 sm:$0xff]   ;;  %v2392_v18 = vld [vmem:[%s3260_s2 + $0x50] ss:$12 sps:$4 sm:$0xff]   ;;  %s537_s19 = scalar_lea.vmem %s3258_s0, %s2061_s23  ;;  %v2393_v21 = vld [vmem:[%s3260_s2 + $0x68] ss:$12 sps:$4 sm:$0xff]  }
  0x91   : > { %740 = vmatprep.subr.bf16.mxu0 %v2370_v6  ;;  %v2384_v19 = vld [vmem:[%s3260_s2 + $0x90] ss:$12 sps:$4 sm:$0xff]   ;;  %v2385_v20 = vld [vmem:[%s3260_s2 + $0xac] ss:$12 sps:$4 sm:$0xff]   ;;  %v2387_v22 = vld [vmem:[%s3260_s2 + $0xa8] ss:$12 sps:$4 sm:$0xff]  }
  0x92   : > { %2214 = vmatpush3.bf16.msra.mxu1 %v2390_v12  ;;  %v2982_v23 = vld [vmem:[%s537_s19] sm:$0xff]   ;;  %v2396_v26 = vld [vmem:[%s3260_s2 + $0xb0] ss:$12 sps:$4 sm:$0xff]   ;;  %vm836_vm1 = vcmask 261120   ;;  %v597_v45 = vsub.s32 2, %v3007_v28  ;;  %p539_p9 = scmp.lt.s32.totalorder %s2746_s16, 1 }
  0x93   : > { %2215 = vmatprep.subr.bf16.mxu1 %v2660_v1  ;;  %v2394_v24 = vld [vmem:[%s3260_s2 + $0x80] ss:$12 sps:$4 sm:$0xff]   ;;  %v2395_v25 = vld [vmem:[%s3260_s2 + $0x98] ss:$12 sps:$4 sm:$0xff]   ;;  %vm884_vm2 = vcmask 130048   ;;  %s2662_s29 = smov 96  }
  0x94   : > { %741 = vmatpush1.bf16.msra.mxu0 %v2372_v7  ;;  %v585_v30 = vld [vmem:[%s3261_s3] sm:$0x7]  ;;  %s3293_s16 = smov (!%p539_p9, %s2746_s16), 1  ;;  %s2664_s17 = smov 64   ;;  %vm1086_vm3 = vcmask 523520   ;;  %vm1220_vm4 = vcmask 785920  }
  0x95   : > { %742 = vmatprep.subr.bf16.mxu0 %v2373_v8  ;;  %v590_v32 = vrot.slane %v585_v30, %v589_v29  ;;  %v594_v34 = vrot.slane %v585_v30, %v593_v31  ;;  %v598_v46 = vrot.slane %v585_v30, %v597_v45  ;;  %s541_s14 = scalar_lea.vmem %s3259_s1, %s3293_s16  ;;  %s2663_s16 = smov 32   ;;  %vm1354_vm5 = vcmask 1048320  }
  0x96   : > { %2216 = vmatpush3.bf16.msra.mxu1 %v2391_v16  ;;  %v3033_v54 = vld [vmem:[%s541_s14] ss:$0 sm:$0xff]  ;;  %s3288_s14 = sld [smem:[#allocation16_spill]] }
  0x97   : > { %2217 = vmatprep.subr.bf16.mxu1 %v2660_v1 }
  0x98   : > { %743 = vmatpush1.bf16.msra.mxu0 %v2375_v9 }
  0x99   : > { %744 = vmatprep.subr.bf16.mxu0 %v2376_v11 }
  0x9a   : > { %2218 = vmatpush3.bf16.msra.mxu1 %v2392_v18 }
  0x9b   : > { %2219 = vmatprep.subr.bf16.mxu1 %v2660_v1 }
  0x9c   : > { %745 = vmatpush1.bf16.msra.mxu0 %v2378_v13  ;;  %s546_s22 = scalar_lea.vmem %s3288_s14, %s2061_s23 }
  0x9d   : > { %746 = vmatprep.subr.bf16.mxu0 %v2379_v14 }
  0x9e   : > { %2220 = vmatpush3.bf16.msra.mxu1 %v2393_v21 }
  0x9f   : > { %2221 = vmatprep.subr.bf16.mxu1 %v2660_v1 }
  0xa0   : > { %747 = vmatpush1.bf16.msra.mxu0 %v2381_v15 }
  0xa1   : > { %748 = vmatprep.subr.bf16.mxu0 %v2382_v17 }
  0xa2   : > { %2222 = vmatpush3.bf16.msra.mxu1 %v2394_v24 }
  0xa3   : > { %2223 = vmatprep.subr.bf16.mxu1 %v2660_v1 }
  0xa4   : > { %749 = vmatpush1.bf16.msra.mxu0 %v2384_v19 }
  0xa5   : > { %750 = vmatprep.subr.bf16.mxu0 %v2385_v20 }
  0xa6   : > { %2224 = vmatpush3.bf16.msra.mxu1 %v2395_v25 }
  0xa7   : > { %2225 = vmatprep.subr.bf16.mxu1 %v2660_v1 }
  0xa8   : > { %751 = vmatpush1.bf16.msra.mxu0 %v2387_v22 }
  0xa9   : > { %2255 = vmatprep.subr.bf16.mxu0 %v2660_v1 }
  0xaa   : > { %2226 = vmatpush3.bf16.msra.mxu1 %v2396_v26 }
  0xab   : > { %769 = vmatmul.mubr.bf16.vlgmr.msra.gmra.mrb[0].mxu0 %v2982_v23  ;;  %2231 = vmatprep.subr.bf16.mxu1 %v2660_v1 }
  0xac   : > { %2257 = vmatprep.mubr.msk.bf16.mxu0 %vm2661_vm0, %v2660_v1 }
  0xad   : > { %2228 = vmatmul.mubr.bf16.vlgmr.msra.gmra.mrb[0].mxu1 %v2982_v23 }
  0xae   : > { %2233 = vmatprep.mubr.msk.bf16.mxu1 %vm2661_vm0, %v2660_v1 }
 0x17e   : > { %v770_v33 = vpop.f32.mrb[0].mxu0 }
 0x17f   : > { %v772_v35 = vpop.f32.mrb[1].mxu0  ;;  %v771_v37 = vadd.f32 %v770_v33, %v590_v32 }
 0x180   : > { %v774_v36 = vpop.f32.mrb[2].mxu0  ;;  %v773_v40 = vadd.f32 %v772_v35, %v594_v34  ;;  %v813_v47 = vpop.f32.mrb[0].mxu1 }
 0x181   : > { %v775_v38 = vadd.f32 %v774_v36, %v590_v32  ;;  %v776_v39 = vpop.f32.mrb[3].mxu0  ;;  %v814_v48 = vadd.f32 %v813_v47, %v598_v46  ;;  %v2229_v49 = vpop.f32.mrb[1].mxu1 }
 0x182   : > { %v777_v41 = vadd.f32 %v776_v39, %v594_v34  ;;  %v816_v50 = vpop.f32.mrb[2].mxu1 }
 0x183   : > { %v820_v42 = vpack.c.bf16 %v775_v38, %v771_v37  ;;  %v817_v51 = vadd.f32 %v816_v50, %v598_v46  ;;  %v2230_v52 = vpop.f32.mrb[3].mxu1 }
 0x184   : > { %v821_v43 = vpack.c.bf16 %v777_v41, %v773_v40 }
 0x185   : > { %v3024_v53 = vpack.c.bf16 %v817_v51, %v814_v48 }
 0x186   : > { %v841_v44 = vsel %vm836_vm1, %v821_v43, 0 }
 0x187   : > { %2232 = vmatpush3.bf16.xpose.msra.mxu1 %v841_v44 }
 0x188   : > { %2237 = vmatprep.subr.bf16.mxu1 %v2660_v1 }
 0x18e   : > { %2234 = vmatmul.mubr.msk.bf16.vlgmr.msra.gmra.mrb[4].mxu1 %vm836_vm1, %v820_v42 }
 0x18f   : > { %2239 = vmatprep.mubr.msk.bf16.mxu1 %vm2661_vm0, %v2660_v1  ;;  %2238 = vmatpush3.bf16.msra.mxu1 %v3024_v53 }
 0x190   : > { %2243 = vmatprep.subr.bf16.mxu1 %v2660_v1 }
 0x261   : > { %v877_v55 = vpop.f32.mrb[4].mxu1 }
 0x262   : > { %v878_v56 = vadd.f32 %v3033_v54, %v877_v55  ;;  %v2235_v57 = vpop.f32.mrb[5].mxu1 }
 0x263   : > { %v880_v58 = vpop.f32.mrb[6].mxu1 }
 0x264   : > { %v881_v59 = vadd.f32 %v3033_v54, %v880_v58  ;;  %v2236_v60 = vpop.f32.mrb[7].mxu1  ;;  %v885_v61 = vsel %vm884_vm2, %v878_v56, -inf }
 0x265   : > { %886 = vmax.xlane.f32.xlu0 %v885_v61 }
 0x266   : > { %v888_v62 = vsel %vm884_vm2, %v881_v59, -inf }
 0x269   : > { %889 = vmax.xlane.f32.xlu0 %v888_v62 }
 0x27f   : > { %961 = vrot.lane.b32.xlu0 %v821_v43, %s2662_s29 }
 0x283   : > { %1229 = vrot.lane.b32.xlu0 %v821_v43, %s2663_s16 }
 0x2f2   : > { %v887_v63 = vpop.xlane.xlu0 %886 }
 0x2f3   : > { %v891_v2 = vsub.f32 %v878_v56, %v887_v63 }
 0x2f5   : > { %v893_v3 = vmul.f32 1.442695, %v891_v2 }
 0x2f6   : > { %v890_v4 = vpop.xlane.xlu0 %889 }
 0x2f7   : > { %2446 = vpow2.f32 %v893_v3  ;;  %v892_v5 = vsub.f32 %v881_v59, %v890_v4 }
 0x2f9   : > { %v895_v6 = vmul.f32 1.442695, %v892_v5 }
 0x2fa   : > { %v962_v14 = vpop.permute.xlu0 %961 }
 0x2fb   : > { %2448 = vpow2.f32 %v895_v6  ;;  %v967_v24 = vsel %vm836_vm1, %v962_v14, 0 }
 0x2fe   : > { %v1230_v21 = vpop.permute.xlu0 %1229 }
 0x2ff   : > { %v1235_v26 = vsel %vm836_vm1, %v1230_v21, 0 }
 0x301   : > { %v2447_v7 = vpop.eup %2446 }
 0x302   : > { %v897_v8 = vsel %vm884_vm2, %v2447_v7, 0.0 }
 0x303   : > { %898 = vadd.xlane.f32.xlu1 %v897_v8 }
 0x305   : > { %v2449_v9 = vpop.eup %2448 }
 0x306   : > { %v900_v10 = vsel %vm884_vm2, %v2449_v9, 0.0 }
 0x307   : > { %901 = vadd.xlane.f32.xlu1 %v900_v10 }
 0x318   : > { %958 = vrot.lane.b32.xlu1 %v820_v42, %s2662_s29 }
 0x31c   : > { %1095 = vrot.lane.b32.xlu1 %v821_v43, %s2664_s17 }
 0x320   : > { %1092 = vrot.lane.b32.xlu1 %v820_v42, %s2664_s17 }
 0x324   : > { %1226 = vrot.lane.b32.xlu1 %v820_v42, %s2663_s16 }
 0x390   : > { %v899_v11 = vpop.xlane.xlu1 %898 }
 0x391   : > { %2450 = vrcp.f32 %v899_v11 }
 0x394   : > { %v902_v12 = vpop.xlane.xlu1 %901 }
 0x395   : > { %2452 = vrcp.f32 %v902_v12 }
 0x398   : > { %v959_v13 = vpop.permute.xlu1 %958 }
 0x39b   : > { %v2451_v16 = vpop.eup %2450 }
 0x39c   : > { %v1096_v15 = vpop.permute.xlu1 %1095  ;;  %v905_v19 = vmul.f32 %v2451_v16, %v2447_v7 }
 0x39d   : > { %v1101_v17 = vsel %vm836_vm1, %v1096_v15, 0 }
 0x39e   : > { %2256 = vmatpush3.bf16.xpose.msra.mxu0 %v1101_v17 }
 0x39f   : > { %v2453_v18 = vpop.eup %2452  ;;  %2267 = vmatprep.subr.bf16.mxu0 %v2660_v1 }
 0x3a0   : > { %v906_v20 = vmul.f32 %v2453_v18, %v2449_v9  ;;  %v1093_v25 = vpop.permute.xlu1 %1092 }
 0x3a2   : > { %v907_v22 = vpack.c.bf16 %v906_v20, %v905_v19 }
 0x3a4   : > { %2240 = vmatmul.mubr.msk.bf16.vlgmr.msra.gmra.mrb[8].mxu1 %vm884_vm2, %v907_v22  ;;  %v1227_v27 = vpop.permute.xlu1 %1226 }
 0x3a5   : > { %2244 = vmatpush3.bf16.xpose.msra.mxu1 %v967_v24  ;;  %2258 = vmatmul.mubr.msk.bf16.vlgmr.msra.gmra.mrb[4].mxu0 %vm836_vm1, %v1093_v25 }
 0x3a6   : > { %2268 = vmatpush3.bf16.xpose.msra.mxu0 %v1235_v26  ;;  %2245 = vmatprep.mubr.msk.bf16.mxu1 %vm2661_vm0, %v2660_v1 }
 0x3a7   : > { %2269 = vmatprep.mubr.msk.bf16.mxu0 %vm2661_vm0, %v2660_v1  ;;  %2249 = vmatprep.subr.bf16.mxu1 %v2660_v1 }
 0x3a8   : > { %2279 = vmatprep.subr.bf16.mxu0 %v2660_v1 }
 0x3ac   : > { %2246 = vmatmul.mubr.msk.bf16.vlgmr.msra.gmra.mrb[12].mxu1 %vm836_vm1, %v959_v13 }
 0x3ad   : > { %2270 = vmatmul.mubr.msk.bf16.vlgmr.msra.gmra.mrb[8].mxu0 %vm836_vm1, %v1227_v27  ;;  %2251 = vmatprep.mubr.msk.bf16.mxu1 %vm2661_vm0, %v2660_v1 }
 0x3ae   : > { %2295 = vmatprep.mubr.msk.bf16.mxu0 %vm2661_vm0, %v2660_v1 }
 0x477   : > { %v945_v30 = vpop.f32.mrb[8].mxu1 }
 0x478   : > { %v2241_v32 = vpop.f32.mrb[9].mxu1  ;;  %v1137_v33 = vpop.f32.mrb[4].mxu0 }
 0x479   : > { %v948_v34 = vpop.f32.mrb[10].mxu1  ;;  %v2259_v35 = vpop.f32.mrb[5].mxu0  ;;  %v1138_v46 = vadd.f32 %v3033_v54, %v1137_v33 }
 0x47a   : > { %v952_v36 = vpack.c.bf16 %v948_v34, %v945_v30  ;;  %v2242_v37 = vpop.f32.mrb[11].mxu1  ;;  %v1140_v38 = vpop.f32.mrb[6].mxu0 }
 0x47b   : > { %v2260_v39 = vpop.f32.mrb[7].mxu0  ;;  %v1141_v56 = vadd.f32 %v3033_v54, %v1140_v38  ;;  %v1144_v57 = vsel %vm884_vm2, %v1138_v46, -inf }
 0x47c   : > { %953 = vst.msk [vmem:[#allocation3] sm:$0xff] %vm836_vm1, %v952_v36 }
 0x47d   : > { %v1147_v60 = vsel %vm884_vm2, %v1141_v56, -inf }
 0x47f   : > { %v1003_v40 = vpop.f32.mrb[12].mxu1 }
 0x480   : > { %v1004_v41 = vadd.f32 %v3033_v54, %v1003_v40  ;;  %v2247_v42 = vpop.f32.mrb[13].mxu1  ;;  %v1271_v43 = vpop.f32.mrb[8].mxu0 }
 0x481   : > { %v1006_v44 = vpop.f32.mrb[14].mxu1  ;;  %v2271_v45 = vpop.f32.mrb[9].mxu0  ;;  %v1272_v59 = vadd.f32 %v3033_v54, %v1271_v43 }
 0x482   : > { %v1007_v47 = vadd.f32 %v3033_v54, %v1006_v44  ;;  %v2248_v48 = vpop.f32.mrb[15].mxu1  ;;  %v1274_v49 = vpop.f32.mrb[10].mxu0  ;;  %v1010_v50 = vsel %vm884_vm2, %v1004_v41, -inf }
 0x483   : > { %v2272_v51 = vpop.f32.mrb[11].mxu0  ;;  %1011 = vmax.xlane.f32.xlu0 %v1010_v50  ;;  %v1275_v52 = vadd.f32 %v3033_v54, %v1274_v49  ;;  %v1278_v61 = vsel %vm884_vm2, %v1272_v59, -inf }
 0x484   : > { %v1013_v55 = vsel %vm884_vm2, %v1007_v47, -inf }
 0x485   : > { %1014 = vmax.xlane.f32.xlu1 %v1013_v55  ;;  %v1281_v58 = vsel %vm884_vm2, %v1275_v52, -inf }
 0x487   : > { %1145 = vmax.xlane.f32.xlu0 %v1144_v57 }
 0x489   : > { %1282 = vmax.xlane.f32.xlu1 %v1281_v58  ;;  %v2397_v58 = vld [vmem:[%s3262_s4] sm:$0xff]  }
 0x48a   : > { %2280 = vmatpush3.bf16.msra.mxu0 %v2397_v58  ;;  %v2426_v58 = vld [vmem:[%s3266_s8 + $0x70] ss:$8 sps:$4 sm:$0xff]  }
 0x48b   : > { %1148 = vmax.xlane.f32.xlu0 %v1147_v60  ;;  %2281 = vmatprep.subr.bf16.mxu0 %v2660_v1  ;;  %v2399_v60 = vld [vmem:[%s3262_s4 + $0x10] sm:$0xff]  }
 0x48f   : > { %1279 = vmax.xlane.f32.xlu0 %v1278_v61 }
 0x510   : > { %v1012_v62 = vpop.xlane.xlu0 %1011 }
 0x511   : > { %v1016_v9 = vsub.f32 %v1004_v41, %v1012_v62  ;;  %v2401_v62 = vld [vmem:[%s3262_s4 + $0x20] sm:$0xff]  }
 0x512   : > { %v1015_v63 = vpop.xlane.xlu1 %1014 }
 0x513   : > { %v1017_v10 = vsub.f32 %v1007_v47, %v1015_v63  ;;  %v1018_v14 = vmul.f32 1.442695, %v1016_v9 }
 0x514   : > { %v1146_v2 = vpop.xlane.xlu0 %1145 }
 0x515   : > { %v1150_v3 = vsub.f32 %v1138_v46, %v1146_v2  ;;  %v1020_v15 = vmul.f32 1.442695, %v1017_v10  ;;  %v2404_v10 = vld [vmem:[%s3262_s4 + $0x38] sm:$0xff]  }
 0x516   : > { %v1283_v4 = vpop.xlane.xlu1 %1282 }
 0x517   : > { %v1152_v5 = vmul.f32 1.442695, %v1150_v3  ;;  %v1285_v6 = vsub.f32 %v1275_v52, %v1283_v4  ;;  %v2402_v3 = vld [vmem:[%s3262_s4 + $0x28] sm:$0xff]  }
 0x518   : > { %v1149_v7 = vpop.xlane.xlu0 %1148 }
 0x519   : > { %2454 = vpow2.f32 %v1152_v5  ;;  %v1151_v8 = vsub.f32 %v1141_v56, %v1149_v7  ;;  %v1288_v11 = vmul.f32 1.442695, %v1285_v6  ;;  %v2403_v7 = vld [vmem:[%s3262_s4 + $0x30] sm:$0xff]  }
 0x51b   : > { %v1154_v54 = vmul.f32 1.442695, %v1151_v8 }
 0x51c   : > { %v1280_v12 = vpop.xlane.xlu0 %1279 }
 0x51d   : > { %2456 = vpow2.f32 %v1154_v54  ;;  %v1284_v13 = vsub.f32 %v1272_v59, %v1280_v12  ;;  %v2398_v59 = vld [vmem:[%s3262_s4 + $0x8] sm:$0xff]  }
 0x51e   : > { %2458 = vpow2.f32 %v1288_v11  ;;  %2282 = vmatpush3.bf16.msra.mxu0 %v2398_v59 }
 0x51f   : > { %v1286_v16 = vmul.f32 1.442695, %v1284_v13  ;;  %2283 = vmatprep.subr.bf16.mxu0 %v2660_v1 }
 0x521   : > { %2460 = vpow2.f32 %v1286_v16 }
 0x522   : > { %2462 = vpow2.f32 %v1018_v14  ;;  %2284 = vmatpush3.bf16.msra.mxu0 %v2399_v60 }
 0x523   : > { %v2455_v17 = vpop.eup %2454  ;;  %2464 = vpow2.f32 %v1020_v15  ;;  %2285 = vmatprep.subr.bf16.mxu0 %v2660_v1 }
 0x524   : > { %v1156_v18 = vsel %vm884_vm2, %v2455_v17, 0.0 }
 0x525   : > { %1157 = vadd.xlane.f32.xlu0 %v1156_v18 }
 0x527   : > { %v2457_v19 = vpop.eup %2456 }
 0x528   : > { %v1159_v20 = vsel %vm884_vm2, %v2457_v19, 0.0  ;;  %v2459_v21 = vpop.eup %2458 }
 0x529   : > { %1160 = vadd.xlane.f32.xlu1 %v1159_v20  ;;  %v1293_v26 = vsel %vm884_vm2, %v2459_v21, 0.0  ;;  %v2098_v20 = vld [vmem:[%s3263_s5] ss:$0 sm:$0xff] }
 0x52b   : > { %v2461_v22 = vpop.eup %2460 }
 0x52c   : > { %v2463_v24 = vpop.eup %2462  ;;  %v1290_v25 = vsel %vm884_vm2, %v2461_v22, 0.0 }
 0x52d   : > { %v2465_v27 = vpop.eup %2464  ;;  %1291 = vadd.xlane.f32.xlu0 %v1290_v25  ;;  %1294 = vadd.xlane.f32.xlu1 %v1293_v26  ;;  %v1022_v30 = vsel %vm884_vm2, %v2463_v24, 0.0  ;;  %v552_v26 = vunpack.c.h.bf16 %v2982_v23 }
 0x52e   : > { %v1025_v32 = vsel %vm884_vm2, %v2465_v27, 0.0 }
 0x531   : > { %1023 = vadd.xlane.f32.xlu0 %v1022_v30  ;;  %1026 = vadd.xlane.f32.xlu1 %v1025_v32 }
 0x542   : > { %1168 = vrot.lane.b32.xlu1 %v3024_v53, %s2664_s17 }
 0x546   : > { %1302 = vrot.lane.b32.xlu1 %v3024_v53, %s2663_s16 }
 0x547   : > { %1034 = vrot.lane.b32.xlu0 %v3024_v53, %s2662_s29 }
 0x5b2   : > { %v1158_v33 = vpop.xlane.xlu0 %1157 }
 0x5b6   : > { %v1161_v34 = vpop.xlane.xlu1 %1160 }
 0x5ba   : > { %v1292_v35 = vpop.xlane.xlu0 %1291  ;;  %v1295_v36 = vpop.xlane.xlu1 %1294 }
 0x5be   : > { %v1024_v37 = vpop.xlane.xlu0 %1023  ;;  %v1027_v38 = vpop.xlane.xlu1 %1026 }
 0x5bf   : > { %2466 = vrcp.f32 %v1024_v37  ;;  %v2410_v37 = vld [vmem:[%s3266_s8 + $0x14] ss:$8 sps:$4 sm:$0xff]  }
 0x5c0   : > { %2468 = vrcp.f32 %v1027_v38 }
 0x5c1   : > { %2470 = vrcp.f32 %v1161_v34 }
 0x5c2   : > { %v1035_v39 = vpop.permute.xlu0 %1034  ;;  %2472 = vrcp.f32 %v1158_v33  ;;  %v1169_v45 = vpop.permute.xlu1 %1168 }
 0x5c3   : > { %2250 = vmatpush3.bf16.msra.mxu1 %v1035_v39  ;;  %2474 = vrcp.f32 %v1292_v35  ;;  %v2405_v35 = vld [vmem:[%s3266_s8] ss:$8 sps:$4 sm:$0xff]  }
 0x5c4   : > { %2261 = vmatprep.subr.bf16.mxu1 %v2660_v1  ;;  %2476 = vrcp.f32 %v1295_v36  ;;  %v2407_v36 = vld [vmem:[%s3266_s8 + $0x4] ss:$8 sps:$4 sm:$0xff]  }
 0x5c6   : > { %v1303_v52 = vpop.permute.xlu1 %1302 }
 0x5c9   : > { %v2467_v40 = vpop.eup %2466 }
 0x5ca   : > { %v2469_v41 = vpop.eup %2468  ;;  %v1030_v42 = vmul.f32 %v2467_v40, %v2463_v24 }
 0x5cb   : > { %v1031_v43 = vmul.f32 %v2469_v41, %v2465_v27  ;;  %v2471_v44 = vpop.eup %2470 }
 0x5cc   : > { %v2473_v46 = vpop.eup %2472  ;;  %v1165_v47 = vmul.f32 %v2471_v44, %v2457_v19 }
 0x5cd   : > { %v1032_v53 = vpack.c.bf16 %v1031_v43, %v1030_v42  ;;  %v1164_v48 = vmul.f32 %v2473_v46, %v2455_v17  ;;  %v2475_v49 = vpop.eup %2474  ;;  %v2411_v46 = vld [vmem:[%s3266_s8 + $0x20] ss:$8 sps:$4 sm:$0xff]  }
 0x5ce   : > { %v2477_v51 = vpop.eup %2476  ;;  %v1298_v55 = vmul.f32 %v2475_v49, %v2461_v22  ;;  %v2419_v49 = vld [vmem:[%s3266_s8 + $0x44] ss:$8 sps:$4 sm:$0xff]  }
 0x5cf   : > { %2252 = vmatmul.mubr.msk.bf16.vlgmr.msra.gmra.mrb[16].mxu1 %vm884_vm2, %v1032_v53  ;;  %v1166_v50 = vpack.c.bf16 %v1165_v47, %v1164_v48  ;;  %v1299_v56 = vmul.f32 %v2477_v51, %v2459_v21  ;;  %v551_v21 = vunpack.c.l.bf16 %v2982_v23  ;;  %v2408_v23 = vld [vmem:[%s3266_s8 + $0x10] ss:$8 sps:$4 sm:$0xff]   ;;  %v2416_v47 = vld [vmem:[%s3266_s8 + $0x34] ss:$8 sps:$4 sm:$0xff]  }
 0x5d0   : > { %2262 = vmatpush3.bf16.msra.mxu1 %v1169_v45  ;;  %2263 = vmatprep.mubr.msk.bf16.mxu1 %vm2661_vm0, %v2660_v1  ;;  %v2413_v45 = vld [vmem:[%s3266_s8 + $0x24] ss:$8 sps:$4 sm:$0xff]   ;;  %v2414_v48 = vld [vmem:[%s3266_s8 + $0x30] ss:$8 sps:$4 sm:$0xff]   ;;  %v2422_v51 = vld [vmem:[%s3266_s8 + $0x54] ss:$8 sps:$4 sm:$0xff]  }
 0x5d1   : > { %2273 = vmatprep.subr.bf16.mxu1 %v2660_v1  ;;  %v1300_v57 = vpack.c.bf16 %v1299_v56, %v1298_v55  ;;  %v2425_v55 = vld [vmem:[%s3266_s8 + $0x64] ss:$8 sps:$4 sm:$0xff]   ;;  %v2423_v56 = vld [vmem:[%s3266_s8 + $0x60] ss:$8 sps:$4 sm:$0xff]  }
 0x5d7   : > { %2264 = vmatmul.mubr.msk.bf16.vlgmr.msra.gmra.mrb[20].mxu1 %vm884_vm2, %v1166_v50  ;;  %v2417_v50 = vld [vmem:[%s3266_s8 + $0x40] ss:$8 sps:$4 sm:$0xff]  }
 0x5d8   : > { %2274 = vmatpush3.bf16.msra.mxu1 %v1303_v52  ;;  %2275 = vmatprep.mubr.msk.bf16.mxu1 %vm2661_vm0, %v2660_v1  ;;  %v2420_v52 = vld [vmem:[%s3266_s8 + $0x50] ss:$8 sps:$4 sm:$0xff]  }
 0x5d9   : > { %1621 = vmatprep.subr.bf16.mxu1 %v2407_v36 }
 0x5df   : > { %2276 = vmatmul.mubr.msk.bf16.vlgmr.msra.gmra.mrb[24].mxu1 %vm884_vm2, %v1300_v57  ;;  %v2428_v57 = vld [vmem:[%s3266_s8 + $0x74] ss:$8 sps:$4 sm:$0xff]  }
 0x5e0   : > { %1653 = vmatprep.mubr.bf16.mxu1 %v2659_v0  ;;  %v2400_v0 = vld [vmem:[%s3262_s4 + $0x18] sm:$0xff]   ;;  %1622 = vmatpush1.bf16.msra.mxu1 %v2405_v35 }
 0x5e1   : > { %2286 = vmatpush3.bf16.msra.mxu0 %v2400_v0  ;;  %1623 = vmatprep.subr.bf16.mxu1 %v2410_v37 }
 0x5e2   : > { %2287 = vmatprep.subr.bf16.mxu0 %v2660_v1 }
 0x5e4   : > { %1624 = vmatpush1.bf16.msra.mxu1 %v2408_v23 }
 0x5e5   : > { %2288 = vmatpush3.bf16.msra.mxu0 %v2401_v62  ;;  %1625 = vmatprep.subr.bf16.mxu1 %v2413_v45 }
 0x5e6   : > { %2289 = vmatprep.subr.bf16.mxu0 %v2660_v1 }
 0x5e8   : > { %1626 = vmatpush1.bf16.msra.mxu1 %v2411_v46 }
 0x5e9   : > { %2290 = vmatpush3.bf16.msra.mxu0 %v2402_v3  ;;  %1627 = vmatprep.subr.bf16.mxu1 %v2416_v47 }
 0x5ea   : > { %2291 = vmatprep.subr.bf16.mxu0 %v2660_v1 }
 0x5ec   : > { %1628 = vmatpush1.bf16.msra.mxu1 %v2414_v48 }
 0x5ed   : > { %2292 = vmatpush3.bf16.msra.mxu0 %v2403_v7  ;;  %1629 = vmatprep.subr.bf16.mxu1 %v2419_v49 }
 0x5ee   : > { %2293 = vmatprep.subr.bf16.mxu0 %v2660_v1 }
 0x5f0   : > { %1630 = vmatpush1.bf16.msra.mxu1 %v2417_v50 }
 0x5f1   : > { %2294 = vmatpush3.bf16.msra.mxu0 %v2404_v10  ;;  %1631 = vmatprep.subr.bf16.mxu1 %v2422_v51 }
 0x5f4   : > { %1632 = vmatpush1.bf16.msra.mxu1 %v2420_v52 }
 0x5f5   : > { %1633 = vmatprep.subr.bf16.mxu1 %v2425_v55 }
 0x5f8   : > { %1634 = vmatpush1.bf16.msra.mxu1 %v2423_v56 }
 0x5f9   : > { %1635 = vmatprep.subr.bf16.mxu1 %v2428_v57 }
 0x5fc   : > { %1636 = vmatpush1.bf16.msra.mxu1 %v2426_v58 }
 0x6a2   : > { %v1074_v61 = vpop.f32.mrb[16].mxu1 }
 0x6a3   : > { %v2253_v63 = vpop.f32.mrb[17].mxu1 }
 0x6a4   : > { %v1077_v2 = vpop.f32.mrb[18].mxu1 }
 0x6a5   : > { %v1081_v4 = vpack.c.bf16 %v1077_v2, %v1074_v61  ;;  %v2254_v5 = vpop.f32.mrb[19].mxu1 }
 0x6a7   : > { %1083 = vrot.lane.b32.xlu1 %v1081_v4, %s2663_s16  ;;  %v2107_v4 = vld [vmem:[#allocation4] ss:$0 sm:$0xff] }
 0x6aa   : > { %v1208_v6 = vpop.f32.mrb[20].mxu1 }
 0x6ab   : > { %v2265_v8 = vpop.f32.mrb[21].mxu1 }
 0x6ac   : > { %v1211_v9 = vpop.f32.mrb[22].mxu1  ;;  %v2108_v8 = vld [vmem:[#allocation6] ss:$0 sm:$0xff] }
 0x6ad   : > { %v1215_v11 = vpack.c.bf16 %v1211_v9, %v1208_v6  ;;  %v2266_v54 = vpop.f32.mrb[23].mxu1 }
 0x6af   : > { %1217 = vrot.lane.b32.xlu0 %v1215_v11, %s2664_s17 }
 0x6b2   : > { %v1342_v12 = vpop.f32.mrb[24].mxu1 }
 0x6b3   : > { %v2277_v13 = vpop.f32.mrb[25].mxu1 }
 0x6b4   : > { %v1345_v14 = vpop.f32.mrb[26].mxu1  ;;  %v2430_v13 = vld [vmem:[%s3268_s10] sm:$0xff]  }
 0x6b5   : > { %v1349_v15 = vpack.c.bf16 %v1345_v14, %v1342_v12  ;;  %v2278_v16 = vpop.f32.mrb[27].mxu1  ;;  %v2429_v12 = vld [vmem:[%s3268_s10 + $0x40] sm:$0xff]   ;;  %v2431_v14 = vld [vmem:[%s3268_s10 + $0x48] sm:$0xff]  }
 0x6b6   : > { %2189 = vmatprep.subr.bf16.mxu0 %v2429_v12  ;;  %v2433_v16 = vld [vmem:[%s3268_s10 + $0x50] sm:$0xff]  }
 0x6b7   : > { %1351 = vrot.lane.b32.xlu1 %v1349_v15, %s2662_s29  ;;  %v2432_v15 = vld [vmem:[%s3268_s10 + $0x8] sm:$0xff]  }
 0x719   : > { %v1084_v17 = vpop.permute.xlu1 %1083 }
 0x71a   : > { %1087 = vst.msk [vmem:[#allocation3] sm:$0xff] %vm1086_vm3, %v1084_v17  ;;  %v2434_v17 = vld [vmem:[%s3268_s10 + $0x10] sm:$0xff]  }
 0x721   : > { %v1218_v18 = vpop.permute.xlu0 %1217 }
 0x722   : > { %1221 = vst.msk [vmem:[#allocation3] sm:$0xff] %vm1220_vm4, %v1218_v18  ;;  %v2435_v18 = vld [vmem:[%s3268_s10 + $0x58] sm:$0xff]  }
 0x729   : > { %v1352_v19 = vpop.permute.xlu1 %1351 }
 0x72a   : > { %1355 = vst.msk [vmem:[#allocation3] sm:$0xff] %vm1354_vm5, %v1352_v19  ;;  %v2436_v19 = vld [vmem:[%s3268_s10 + $0x18] sm:$0xff]  }
 0x731   : > { %v1356_v1 = vld [vmem:[#allocation3] sm:$0xff] }
 0x732   : > { %2296 = vmatmul.mubr.bf16.vlgmr.msra.gmra.mrb[12].mxu0 %v1356_v1  ;;  %v2437_v1 = vld [vmem:[%s3268_s10 + $0x60] sm:$0xff]  }
 0x733   : > { %2190 = vmatpush3.bf16.msra.mxu0 %v2430_v13 }
 0x734   : > { %2191 = vmatprep.subr.bf16.mxu0 %v2431_v14 }
 0x737   : > { %2192 = vmatpush3.bf16.msra.mxu0 %v2432_v15 }
 0x738   : > { %2193 = vmatprep.subr.bf16.mxu0 %v2433_v16  ;;  %v2125_v16 = vld [vmem:[#allocation8] ss:$0 sm:$0xff] }
 0x73b   : > { %2194 = vmatpush3.bf16.msra.mxu0 %v2434_v17 }
 0x73c   : > { %2195 = vmatprep.subr.bf16.mxu0 %v2435_v18 }
 0x73f   : > { %2196 = vmatpush3.bf16.msra.mxu0 %v2436_v19 }
 0x740   : > { %2197 = vmatprep.subr.bf16.mxu0 %v2437_v1 }
 0x805   : > { %v1462_v22 = vpop.f32.mrb[12].mxu0 }
 0x806   : > { %v1463_v24 = vadd.f32 %v2098_v20, %v1462_v22  ;;  %v2297_v25 = vpop.f32.mrb[13].mxu0  ;;  %v2440_v22 = vld [vmem:[%s3268_s10 + $0x28] sm:$0xff]  }
 0x807   : > { %v1465_v27 = vpop.f32.mrb[14].mxu0  ;;  %v2442_v25 = vld [vmem:[%s3268_s10 + $0x30] sm:$0xff]  }
 0x808   : > { %v1466_v30 = vadd.f32 %v2098_v20, %v1465_v27  ;;  %v2298_v32 = vpop.f32.mrb[15].mxu0  ;;  %v1469_v33 = vadd.f32 %v1463_v24, %v551_v21  ;;  %v2438_v20 = vld [vmem:[%s3268_s10 + $0x20] sm:$0xff]   ;;  %v2439_v21 = vld [vmem:[%s3268_s10 + $0x68] sm:$0xff]   ;;  %v2441_v24 = vld [vmem:[%s3268_s10 + $0x70] sm:$0xff]  }
 0x809   : > { %2198 = vmatpush3.bf16.msra.mxu0 %v2438_v20  ;;  %v2444_v27 = vld [vmem:[%s3268_s10 + $0x38] sm:$0xff]  }
 0x80a   : > { %1473 = vadd.xlane.f32.xlu0 %v1469_v33  ;;  %v1470_v34 = vadd.f32 %v1466_v30, %v552_v26  ;;  %2199 = vmatprep.subr.bf16.mxu0 %v2439_v21  ;;  %v2443_v26 = vld [vmem:[%s3268_s10 + $0x78] sm:$0xff]   ;;  %v1529_v30 = vld [vmem:[%s3267_s9] sm:$0x3] }
 0x80b   : > { %v1534_v32 = vrot.slane %v1529_v30, %v589_v29 }
 0x80c   : > { %1475 = vadd.xlane.f32.xlu1 %v1470_v34 }
 0x80d   : > { %2200 = vmatpush3.bf16.msra.mxu0 %v2440_v22 }
 0x80e   : > { %2201 = vmatprep.subr.bf16.mxu0 %v2441_v24 }
 0x811   : > { %2202 = vmatpush3.bf16.msra.mxu0 %v2442_v25 }
 0x812   : > { %2203 = vmatprep.subr.bf16.mxu0 %v2443_v26 }
 0x815   : > { %2204 = vmatpush3.bf16.msra.mxu0 %v2444_v27 }
 0x897   : > { %v1474_v38 = vpop.xlane.xlu0 %1473 }
 0x898   : > { %v1478_v39 = vmul.f32 0.0078125, %v1474_v38 }
 0x899   : > { %v1476_v40 = vpop.xlane.xlu1 %1475 }
 0x89a   : > { %v1480_v41 = vsub.f32 %v1469_v33, %v1478_v39  ;;  %v1479_v42 = vmul.f32 0.0078125, %v1476_v40  ;;  %v1538_v33 = vrot.slane %v1529_v30, %v593_v31 }
 0x89c   : > { %v1481_v43 = vsub.f32 %v1470_v34, %v1479_v42  ;;  %v1482_v53 = vmul.f32 %v1480_v41, %v1480_v41 }
 0x89e   : > { %1484 = vadd.xlane.f32.xlu0 %v1482_v53  ;;  %v1483_v44 = vmul.f32 %v1481_v43, %v1481_v43 }
 0x8a2   : > { %1486 = vadd.xlane.f32.xlu0 %v1483_v44 }
 0x92b   : > { %v1485_v59 = vpop.xlane.xlu0 %1484 }
 0x92c   : > { %v1488_v60 = vmul.f32 0.0078125, %v1485_v59 }
 0x92e   : > { %v1490_v0 = vadd.f32 1e-05, %v1488_v60 }
 0x92f   : > { %v1487_v61 = vpop.xlane.xlu0 %1486 }
 0x930   : > { %2478 = vrsqrt.f32 %v1490_v0  ;;  %v1489_v62 = vmul.f32 0.0078125, %v1487_v61 }
 0x932   : > { %v1491_v63 = vadd.f32 1e-05, %v1489_v62 }
 0x934   : > { %2480 = vrsqrt.f32 %v1491_v63 }
 0x93a   : > { %v2479_v2 = vpop.eup %2478 }
 0x93b   : > { %v1494_v3 = vmul.f32 %v2479_v2, %v1480_v41 }
 0x93d   : > { %v1502_v7 = vmul.f32 %v2107_v4, %v1494_v3 }
 0x93e   : > { %v2481_v5 = vpop.eup %2480 }
 0x93f   : > { %v1495_v6 = vmul.f32 %v2481_v5, %v1481_v43  ;;  %v3187_v10 = vadd.f32 %v2108_v8, %v1502_v7 }
 0x941   : > { %v1503_v9 = vmul.f32 %v2107_v4, %v1495_v6 }
 0x943   : > { %v3189_v11 = vadd.f32 %v2108_v8, %v1503_v9 }
 0x945   : > { %v1512_v54 = vpack.c.bf16 %v3189_v11, %v3187_v10 }
 0x947   : > { %1654 = vmatmul.mubr.bf16.vlgmr.msra.gmra.mrb[28].mxu1 %v1512_v54 }
 0xa1a   : > { %v1655_v34 = vpop.f32.mrb[28].mxu1 }
 0xa1b   : > { %v1656_v35 = vadd.f32 %v1655_v34, %v1534_v32  ;;  %v1657_v36 = vpop.f32.mrb[29].mxu1 }
 0xa1c   : > { %v1658_v37 = vadd.f32 %v1657_v36, %v1538_v33  ;;  %v1659_v23 = vpop.f32.mrb[30].mxu1 }
 0xa1d   : > { %v1664_v38 = vmul.f32 %v1656_v35, %v1656_v35  ;;  %v1660_v39 = vadd.f32 %v1659_v23, %v1534_v32  ;;  %v1661_v40 = vpop.f32.mrb[31].mxu1 }
 0xa1e   : > { %v1665_v41 = vmul.f32 %v1658_v37, %v1658_v37  ;;  %v1662_v42 = vadd.f32 %v1661_v40, %v1538_v33 }
 0xa1f   : > { %v1668_v43 = vmul.f32 %v1664_v38, %v1656_v35  ;;  %v1666_v53 = vmul.f32 %v1660_v39, %v1660_v39 }
 0xa20   : > { %v1669_v44 = vmul.f32 %v1665_v41, %v1658_v37  ;;  %v1667_v45 = vmul.f32 %v1662_v42, %v1662_v42  ;;  %v2142_v41 = vld [vmem:[#allocation9] ss:$0 sm:$0xff] }
 0xa21   : > { %v1672_v46 = vmul.f32 0.044715, %v1668_v43  ;;  %v1670_v47 = vmul.f32 %v1666_v53, %v1660_v39 }
 0xa22   : > { %v1673_v29 = vmul.f32 0.044715, %v1669_v44  ;;  %v1671_v48 = vmul.f32 %v1667_v45, %v1662_v42  ;;  %v2143_v45 = vld [vmem:[#allocation11] ss:$0 sm:$0xff] }
 0xa23   : > { %v1676_v28 = vadd.f32 %v1672_v46, %v1656_v35  ;;  %v1674_v31 = vmul.f32 0.044715, %v1670_v47 }
 0xa24   : > { %v1677_v49 = vadd.f32 %v1673_v29, %v1658_v37  ;;  %v1675_v50 = vmul.f32 0.044715, %v1671_v48 }
 0xa25   : > { %v1680_v51 = vmul.f32 0.7978846, %v1676_v28  ;;  %v1678_v52 = vadd.f32 %v1674_v31, %v1660_v39 }
 0xa26   : > { %v1681_v55 = vmul.f32 0.7978846, %v1677_v49  ;;  %v1679_v56 = vadd.f32 %v1675_v50, %v1662_v42 }
 0xa27   : > { %2482 = vtanh.f32 %v1680_v51  ;;  %v1682_v57 = vmul.f32 0.7978846, %v1678_v52 }
 0xa28   : > { %2484 = vtanh.f32 %v1681_v55  ;;  %v1683_v58 = vmul.f32 0.7978846, %v1679_v56 }
 0xa29   : > { %2486 = vtanh.f32 %v1682_v57 }
 0xa2a   : > { %2488 = vtanh.f32 %v1683_v58 }
 0xa31   : > { %v2483_v59 = vpop.eup %2482 }
 0xa32   : > { %v2485_v60 = vpop.eup %2484  ;;  %v1688_v0 = vadd.f32 1.0, %v2483_v59 }
 0xa33   : > { %v2487_v61 = vpop.eup %2486  ;;  %v1689_v62 = vadd.f32 1.0, %v2485_v60 }
 0xa34   : > { %v2489_v63 = vpop.eup %2488  ;;  %v1692_v2 = vmul.f32 0.5, %v1688_v0  ;;  %v1690_v3 = vadd.f32 1.0, %v2487_v61 }
 0xa35   : > { %v1691_v4 = vadd.f32 1.0, %v2489_v63  ;;  %v1693_v5 = vmul.f32 0.5, %v1689_v62 }
 0xa36   : > { %v1694_v6 = vmul.f32 0.5, %v1690_v3  ;;  %v1696_v8 = vmul.f32 %v1692_v2, %v1656_v35 }
 0xa37   : > { %v1695_v7 = vmul.f32 0.5, %v1691_v4  ;;  %v1697_v54 = vmul.f32 %v1693_v5, %v1658_v37 }
 0xa38   : > { %v1698_v9 = vmul.f32 %v1694_v6, %v1660_v39 }
 0xa39   : > { %v1699_v12 = vmul.f32 %v1695_v7, %v1662_v42 }
 0xa3a   : > { %v1700_v13 = vpack.c.bf16 %v1698_v9, %v1696_v8 }
 0xa3b   : > { %v1701_v14 = vpack.c.bf16 %v1699_v12, %v1697_v54 }
 0xa3d   : > { %1869 = vmatprep.mubr.bf16.mxu0 %v1701_v14 }
 0xa3e   : > { %1870 = vmatmul.mubr.bf16.vlgmr.msra.gmra.mrb[16].mxu0 %v1700_v13 }
 0xb11   : > { %v2205_v15 = vpop.f32.mrb[16].mxu0 }
 0xb12   : > { %v2206_v17 = vpop.f32.mrb[17].mxu0 }
 0xb13   : > { %v2207_v18 = vadd.f32 %v2206_v17, %v2205_v15  ;;  %v2208_v19 = vpop.f32.mrb[18].mxu0 }
 0xb14   : > { %v2209_v1 = vpop.f32.mrb[19].mxu0 }
 0xb15   : > { %v1872_v20 = vadd.f32 %v2207_v18, %v2125_v16  ;;  %v2210_v21 = vadd.f32 %v2209_v1, %v2208_v19 }
 0xb17   : > { %v1875_v22 = vadd.f32 %v2210_v21, %v2125_v16  ;;  %v1878_v24 = vadd.f32 %v1872_v20, %v3187_v10 }
 0xb19   : > { %1882 = vadd.xlane.f32.xlu0 %v1878_v24  ;;  %v1879_v25 = vadd.f32 %v1875_v22, %v3189_v11 }
 0xb1b   : > { %1884 = vadd.xlane.f32.xlu1 %v1879_v25 }
 0xba6   : > { %v1883_v26 = vpop.xlane.xlu0 %1882 }
 0xba7   : > { %v1886_v27 = vmul.f32 0.0078125, %v1883_v26 }
 0xba8   : > { %v1885_v30 = vpop.xlane.xlu1 %1884 }
 0xba9   : > { %v1888_v32 = vsub.f32 %v1878_v24, %v1886_v27  ;;  %v1887_v33 = vmul.f32 0.0078125, %v1885_v30 }
 0xbab   : > { %v1889_v34 = vsub.f32 %v1879_v25, %v1887_v33  ;;  %v1890_v35 = vmul.f32 %v1888_v32, %v1888_v32 }
 0xbad   : > { %1892 = vadd.xlane.f32.xlu0 %v1890_v35  ;;  %v1891_v36 = vmul.f32 %v1889_v34, %v1889_v34 }
 0xbaf   : > { %1894 = vadd.xlane.f32.xlu1 %v1891_v36 }
 0xc3a   : > { %v1893_v37 = vpop.xlane.xlu0 %1892 }
 0xc3b   : > { %v1896_v23 = vmul.f32 0.0078125, %v1893_v37 }
 0xc3c   : > { %v1895_v38 = vpop.xlane.xlu1 %1894 }
 0xc3d   : > { %v1898_v39 = vadd.f32 1e-05, %v1896_v23  ;;  %v1897_v10 = vmul.f32 0.0078125, %v1895_v38 }
 0xc3f   : > { %2490 = vrsqrt.f32 %v1898_v39  ;;  %v1899_v40 = vadd.f32 1e-05, %v1897_v10 }
 0xc41   : > { %2492 = vrsqrt.f32 %v1899_v40 }
 0xc49   : > { %v2491_v11 = vpop.eup %2490 }
 0xc4a   : > { %v1902_v42 = vmul.f32 %v2491_v11, %v1888_v32 }
 0xc4b   : > { %v2493_v43 = vpop.eup %2492 }
 0xc4c   : > { %v1910_v53 = vmul.f32 %v2142_v41, %v1902_v42  ;;  %v1903_v44 = vmul.f32 %v2493_v43, %v1889_v34 }
 0xc4e   : > { %v1911_v46 = vmul.f32 %v2142_v41, %v1903_v44  ;;  %v1918_v47 = vadd.f32 %v2143_v45, %v1910_v53 }
 0xc50   : > { %v1919_v29 = vadd.f32 %v2143_v45, %v1911_v46 }
 0xc52   : > { %v2153_v48 = vpack.c.bf16 %v1919_v29, %v1918_v47 }
 0xc54   : > { %2154 = vst [vmem:[%s546_s22] sm:$0xff] %v2153_v48  }
 0xc55 PF: > { %s3289_s18 = sld [smem:[#allocation15_spill]] }
 0xc5b   : > { %s27_s29 = sadd.s32 1, %s3289_s18  }
 0xc5c   : > { %p24_p10 = scmp.ge.s32.totalorder %s27_s29, 4  }
 0xc5e   :  { %26 = sbr.rel (!%p24_p10) target bundleno = 5 (0x5), region = 130 }
 0xc65   :  { %1952 = vsyncpa [#allocation5], 1 }
 0xc66   :  { %1954 = vsyncpa [#allocation5 + $0x1], 1 }
 0xc67   :  { %1955 = vsyncpa [#allocation7], 1 }
 0xc68   :  { %1956 = vsyncpa [#allocation10], 1 }

// kernel: bert_classifier_forward.6
= control target key start
LH: loop header
LB: loop body
LE: loop exit
PB: predicated region body
PF: predicated region fallthrough
CT: control target
= control target key end

     0   :  { %s2409_s29 = smov 0   ;;  %s2787_s0 = inlined_call_operand.vmem [shape: bf16[32,128], index: 0, kind: input, shape index: {}]   ;;  %s2788_s1 = inlined_call_operand.vmem [shape: f32[2,1,16], index: 1, kind: input, shape index: {}]   ;;  %s2789_s2 = inlined_call_operand.vmem [shape: bf16[128,384], index: 2, kind: input, shape index: {}]   ;;  %s2790_s3 = inlined_call_operand.vmem [shape: f32[1,384], index: 3, kind: input, shape index: {}]   ;;  %s2791_s4 = inlined_call_operand.vmem [shape: bf16[128,128], index: 4, kind: input, shape index: {}]   ;;  %s2792_s5 = inlined_call_operand.vmem [shape: f32[1,128], index: 5, kind: input, shape index: {}]   ;;  %s2793_s6 = inlined_call_operand.vmem [shape: f32[1,128], index: 6, kind: input, shape index: {}]   ;;  %s2794_s7 = inlined_call_operand.vmem [shape: f32[1,128], index: 7, kind: input, shape index: {}]   ;;  %s2795_s8 = inlined_call_operand.vmem [shape: bf16[128,256], index: 8, kind: input, shape index: {}]   ;;  %s2796_s9 = inlined_call_operand.vmem [shape: f32[1,256], index: 9, kind: input, shape index: {}]   ;;  %s2797_s10 = inlined_call_operand.vmem [shape: bf16[256,128], index: 10, kind: input, shape index: {}]   ;;  %s2798_s11 = inlined_call_operand.vmem [shape: f32[1,128], index: 11, kind: input, shape index: {}]   ;;  %s2799_s12 = inlined_call_operand.vmem [shape: f32[1,128], index: 12, kind: input, shape index: {}]   ;;  %s2800_s13 = inlined_call_operand.vmem [shape: f32[1,128], index: 13, kind: input, shape index: {}]   ;;  %s2801_s14 = inlined_call_operand.vmem [shape: bf16[32,128], index: 14, kind: output, shape index: {}]  }
   0x1 LB: > { %s2415_s30 = sadd.s32 4294967295, %s2326_s29   ;;  %p1936_p0 = scmp.ge.s32.totalorder %s2326_s29, 1  ;;  %s2326_s29 = sphi %s2409_s29, %s24_s29  }
   0x2   : > { %p421_p1 = scmp.lt.s32.totalorder %s2326_s29, 3 }
   0x4   : > { %p422_p2 = pnand %p1936_p0, %p421_p1 }
   0x5   : > { %v2190_v0 = vld [vmem:[%s2789_s2 + $0x4] ss:$12 sps:$4 sm:$0xff] (!%p422_p2)   ;;  %v2192_v1 = vld [vmem:[%s2789_s2] ss:$12 sps:$4 sm:$0xff] (!%p422_p2)   ;;  %v2328_v2 = vmov (!%p422_p2), 0   ;;  %v2329_v4 = vmov (!%p422_p2), 0.0   ;;  %v524_v27 = vlaneseq (!%p422_p2) }
   0x6   : > { %425 = sbr.rel (%p422_p2) target bundleno = 3024 (0xbd0), region = 76  ;;  %705 = vmatprep.mubr.bf16.mxu0 (!%p422_p2), %v2328_v2  ;;  %673 = vmatprep.subr.bf16.mxu0 (!%p422_p2), %v2190_v0  ;;  %v2193_v3 = vld [vmem:[%s2789_s2 + $0x1c] ss:$12 sps:$4 sm:$0xff] (!%p422_p2)   ;;  %v2195_v5 = vld [vmem:[%s2789_s2 + $0x18] ss:$12 sps:$4 sm:$0xff] (!%p422_p2)   ;;  %s1937_s23 = sshll.u32 (!%p422_p2), %s2415_s30, 1 }
   0x7   : > { %2088 = vmatprep.subr.bf16.mxu1 (!%p422_p2), %v2329_v4  ;;  %674 = vmatpush1.bf16.msra.mxu0 (!%p422_p2), %v2192_v1  ;;  %v2196_v6 = vld [vmem:[%s2789_s2 + $0x34] ss:$12 sps:$4 sm:$0xff] (!%p422_p2)   ;;  %p471_p3 = scmp.lt.s32.totalorder (!%p422_p2), %s1937_s23, 3  ;;  %v2198_v7 = vld [vmem:[%s2789_s2 + $0x30] ss:$12 sps:$4 sm:$0xff] (!%p422_p2)   ;;  %vm2330_vm0 = vmmov (!%p422_p2), 0  }
   0x8   : > { %675 = vmatprep.subr.bf16.mxu0 (!%p422_p2), %v2193_v3  ;;  %v2199_v8 = vld [vmem:[%s2789_s2 + $0x4c] ss:$12 sps:$4 sm:$0xff] (!%p422_p2)   ;;  %v2201_v9 = vld [vmem:[%s2789_s2 + $0x48] ss:$12 sps:$4 sm:$0xff] (!%p422_p2)   ;;  %v2202_v11 = vld [vmem:[%s2789_s2 + $0x64] ss:$12 sps:$4 sm:$0xff] (!%p422_p2)   ;;  %2104 = vmatprep.mubr.msk.bf16.mxu1 (!%p422_p2), %vm2330_vm0, %v2329_v4 }
   0x9   : > { %v2215_v10 = vld [vmem:[%s2789_s2 + $0x8] ss:$12 sps:$4 sm:$0xff] (!%p422_p2)   ;;  %v2216_v12 = vld [vmem:[%s2789_s2 + $0x20] ss:$12 sps:$4 sm:$0xff] (!%p422_p2)   ;;  %v2207_v15 = vld [vmem:[%s2789_s2 + $0x78] ss:$12 sps:$4 sm:$0xff] (!%p422_p2)  }
   0xa   : > { %2089 = vmatpush3.bf16.msra.mxu1 (!%p422_p2), %v2215_v10  ;;  %v2204_v13 = vld [vmem:[%s2789_s2 + $0x60] ss:$12 sps:$4 sm:$0xff] (!%p422_p2)   ;;  %v2205_v14 = vld [vmem:[%s2789_s2 + $0x7c] ss:$12 sps:$4 sm:$0xff] (!%p422_p2)   ;;  %v2217_v16 = vld [vmem:[%s2789_s2 + $0x38] ss:$12 sps:$4 sm:$0xff] (!%p422_p2)  }
   0xb   : > { %676 = vmatpush1.bf16.msra.mxu0 (!%p422_p2), %v2195_v5  ;;  %2090 = vmatprep.subr.bf16.mxu1 (!%p422_p2), %v2329_v4  ;;  %v2208_v17 = vld [vmem:[%s2789_s2 + $0x94] ss:$12 sps:$4 sm:$0xff] (!%p422_p2)   ;;  %v2218_v18 = vld [vmem:[%s2789_s2 + $0x50] ss:$12 sps:$4 sm:$0xff] (!%p422_p2)   ;;  %v2211_v20 = vld [vmem:[%s2789_s2 + $0xac] ss:$12 sps:$4 sm:$0xff] (!%p422_p2)  }
   0xc   : > { %677 = vmatprep.subr.bf16.mxu0 (!%p422_p2), %v2196_v6  ;;  %v2210_v19 = vld [vmem:[%s2789_s2 + $0x90] ss:$12 sps:$4 sm:$0xff] (!%p422_p2)   ;;  %v2219_v21 = vld [vmem:[%s2789_s2 + $0x68] ss:$12 sps:$4 sm:$0xff] (!%p422_p2)   ;;  %v2220_v24 = vld [vmem:[%s2789_s2 + $0x80] ss:$12 sps:$4 sm:$0xff] (!%p422_p2)  }
   0xd   : > { %s2803_s23 = smov (!%p471_p3, %s1937_s23), 3  ;;  %v2213_v22 = vld [vmem:[%s2789_s2 + $0xa8] ss:$12 sps:$4 sm:$0xff]   ;;  %v2221_v25 = vld [vmem:[%s2789_s2 + $0x98] ss:$12 sps:$4 sm:$0xff]   ;;  %v2521_v28 = vshrl.u32 %v524_v27, 7 }
   0xe   : > { %s1938_s25 = sshll.u32 %s2803_s23, 2  ;;  %2091 = vmatpush3.bf16.msra.mxu1 %v2216_v12  ;;  %v2222_v26 = vld [vmem:[%s2789_s2 + $0xb0] ss:$12 sps:$4 sm:$0xff]   ;;  %v522_v30 = vld [vmem:[%s2790_s3] sm:$0x7]  ;;  %vm773_vm1 = vcmask 261120  }
   0xf   : > { %678 = vmatpush1.bf16.msra.mxu0 %v2198_v7  ;;  %2092 = vmatprep.subr.bf16.mxu1 %v2329_v4  ;;  %s474_s18 = scalar_lea.vmem %s2787_s0, %s1938_s25  ;;  %v526_v29 = vsub.s32 0, %v2521_v28  ;;  %v530_v31 = vsub.s32 1, %v2521_v28  ;;  %v534_v45 = vsub.s32 2, %v2521_v28  ;;  %p476_p4 = scmp.lt.s32.totalorder %s2415_s30, 1  ;;  %vm821_vm2 = vcmask 130048  }
  0x10   : > { %679 = vmatprep.subr.bf16.mxu0 %v2199_v8  ;;  %v2496_v23 = vld [vmem:[%s474_s18] sm:$0xff]   ;;  %s2331_s22 = smov 96   ;;  %s2333_s24 = smov 64   ;;  %vm1023_vm3 = vcmask 523520   ;;  %vm1157_vm4 = vcmask 785920   ;;  %vm1291_vm5 = vcmask 1048320  }
  0x11   : > { %v527_v32 = vrot.slane %v522_v30, %v526_v29  ;;  %v531_v34 = vrot.slane %v522_v30, %v530_v31  ;;  %v535_v46 = vrot.slane %v522_v30, %v534_v45  ;;  %s2805_s30 = smov (!%p476_p4, %s2415_s30), 1 }
  0x12   : > { %2093 = vmatpush3.bf16.msra.mxu1 %v2217_v16  ;;  %s478_s21 = scalar_lea.vmem %s2788_s1, %s2805_s30  ;;  %s2332_s30 = smov 32  }
  0x13   : > { %680 = vmatpush1.bf16.msra.mxu0 %v2201_v9  ;;  %2094 = vmatprep.subr.bf16.mxu1 %v2329_v4  ;;  %v2547_v54 = vld [vmem:[%s478_s21] ss:$0 sm:$0xff] }
  0x14   : > { %681 = vmatprep.subr.bf16.mxu0 %v2202_v11 }
  0x16   : > { %2095 = vmatpush3.bf16.msra.mxu1 %v2218_v18 }
  0x17   : > { %682 = vmatpush1.bf16.msra.mxu0 %v2204_v13  ;;  %2096 = vmatprep.subr.bf16.mxu1 %v2329_v4 }
  0x18   : > { %683 = vmatprep.subr.bf16.mxu0 %v2205_v14 }
  0x1a   : > { %2097 = vmatpush3.bf16.msra.mxu1 %v2219_v21 }
  0x1b   : > { %684 = vmatpush1.bf16.msra.mxu0 %v2207_v15  ;;  %2098 = vmatprep.subr.bf16.mxu1 %v2329_v4 }
  0x1c   : > { %685 = vmatprep.subr.bf16.mxu0 %v2208_v17 }
  0x1e   : > { %2099 = vmatpush3.bf16.msra.mxu1 %v2220_v24 }
  0x1f   : > { %686 = vmatpush1.bf16.msra.mxu0 %v2210_v19  ;;  %2100 = vmatprep.subr.bf16.mxu1 %v2329_v4 }
  0x20   : > { %687 = vmatprep.subr.bf16.mxu0 %v2211_v20 }
  0x22   : > { %2101 = vmatpush3.bf16.msra.mxu1 %v2221_v25 }
  0x23   : > { %688 = vmatpush1.bf16.msra.mxu0 %v2213_v22  ;;  %2102 = vmatprep.subr.bf16.mxu1 %v2329_v4 }
  0x24   : > { %2132 = vmatprep.subr.bf16.mxu0 %v2329_v4 }
  0x26   : > { %706 = vmatmul.mubr.bf16.vlgmr.msra.gmra.mrb[0].mxu0 %v2496_v23  ;;  %2103 = vmatpush3.bf16.msra.mxu1 %v2222_v26 }
  0x27   : > { %2108 = vmatprep.subr.bf16.mxu1 %v2329_v4  ;;  %2134 = vmatprep.mubr.msk.bf16.mxu0 %vm2330_vm0, %v2329_v4 }
  0x29   : > { %2105 = vmatmul.mubr.bf16.vlgmr.msra.gmra.mrb[0].mxu1 %v2496_v23 }
  0x2a   : > { %2110 = vmatprep.mubr.msk.bf16.mxu1 %vm2330_vm0, %v2329_v4 }
  0xf9   : > { %v707_v33 = vpop.f32.mrb[0].mxu0 }
  0xfa   : > { %v709_v35 = vpop.f32.mrb[1].mxu0  ;;  %v708_v37 = vadd.f32 %v707_v33, %v527_v32 }
  0xfb   : > { %v711_v36 = vpop.f32.mrb[2].mxu0  ;;  %v710_v40 = vadd.f32 %v709_v35, %v531_v34 }
  0xfc   : > { %v712_v38 = vadd.f32 %v711_v36, %v527_v32  ;;  %v713_v39 = vpop.f32.mrb[3].mxu0  ;;  %v750_v47 = vpop.f32.mrb[0].mxu1 }
  0xfd   : > { %v714_v41 = vadd.f32 %v713_v39, %v531_v34  ;;  %v751_v48 = vadd.f32 %v750_v47, %v535_v46  ;;  %v2106_v49 = vpop.f32.mrb[1].mxu1 }
  0xfe   : > { %v757_v42 = vpack.c.bf16 %v712_v38, %v708_v37  ;;  %v753_v50 = vpop.f32.mrb[2].mxu1 }
  0xff   : > { %v758_v43 = vpack.c.bf16 %v714_v41, %v710_v40  ;;  %v754_v51 = vadd.f32 %v753_v50, %v535_v46  ;;  %v2107_v52 = vpop.f32.mrb[3].mxu1 }
 0x101   : > { %v778_v44 = vsel %vm773_vm1, %v758_v43, 0  ;;  %v2538_v53 = vpack.c.bf16 %v754_v51, %v751_v48 }
 0x102   : > { %2109 = vmatpush3.bf16.xpose.msra.mxu1 %v778_v44 }
 0x103   : > { %2114 = vmatprep.subr.bf16.mxu1 %v2329_v4 }
 0x109   : > { %2111 = vmatmul.mubr.msk.bf16.vlgmr.msra.gmra.mrb[4].mxu1 %vm773_vm1, %v757_v42 }
 0x10a   : > { %2116 = vmatprep.mubr.msk.bf16.mxu1 %vm2330_vm0, %v2329_v4  ;;  %2115 = vmatpush3.bf16.msra.mxu1 %v2538_v53 }
 0x10b   : > { %2120 = vmatprep.subr.bf16.mxu1 %v2329_v4 }
 0x1dc   : > { %v814_v55 = vpop.f32.mrb[4].mxu1 }
 0x1dd   : > { %v815_v56 = vadd.f32 %v2547_v54, %v814_v55  ;;  %v2112_v57 = vpop.f32.mrb[5].mxu1 }
 0x1de   : > { %v817_v58 = vpop.f32.mrb[6].mxu1 }
 0x1df   : > { %v818_v59 = vadd.f32 %v2547_v54, %v817_v58  ;;  %v2113_v60 = vpop.f32.mrb[7].mxu1  ;;  %v822_v61 = vsel %vm821_vm2, %v815_v56, -inf }
 0x1e0   : > { %823 = vmax.xlane.f32.xlu0 %v822_v61 }
 0x1e1   : > { %v825_v62 = vsel %vm821_vm2, %v818_v59, -inf }
 0x1e4   : > { %826 = vmax.xlane.f32.xlu0 %v825_v62 }
 0x1fa   : > { %898 = vrot.lane.b32.xlu0 %v758_v43, %s2331_s22 }
 0x1fe   : > { %1166 = vrot.lane.b32.xlu0 %v758_v43, %s2332_s30 }
 0x26d   : > { %v824_v63 = vpop.xlane.xlu0 %823 }
 0x26e   : > { %v828_v0 = vsub.f32 %v815_v56, %v824_v63 }
 0x270   : > { %v830_v1 = vmul.f32 1.442695, %v828_v0 }
 0x271   : > { %v827_v3 = vpop.xlane.xlu0 %826 }
 0x272   : > { %2272 = vpow2.f32 %v830_v1  ;;  %v829_v5 = vsub.f32 %v818_v59, %v827_v3 }
 0x274   : > { %v832_v6 = vmul.f32 1.442695, %v829_v5 }
 0x275   : > { %v899_v14 = vpop.permute.xlu0 %898 }
 0x276   : > { %2274 = vpow2.f32 %v832_v6  ;;  %v904_v24 = vsel %vm773_vm1, %v899_v14, 0 }
 0x279   : > { %v1167_v21 = vpop.permute.xlu0 %1166 }
 0x27a   : > { %v1172_v26 = vsel %vm773_vm1, %v1167_v21, 0 }
 0x27c   : > { %v2273_v7 = vpop.eup %2272 }
 0x27d   : > { %v834_v8 = vsel %vm821_vm2, %v2273_v7, 0.0 }
 0x27e   : > { %835 = vadd.xlane.f32.xlu1 %v834_v8 }
 0x280   : > { %v2275_v9 = vpop.eup %2274 }
 0x281   : > { %v837_v10 = vsel %vm821_vm2, %v2275_v9, 0.0 }
 0x282   : > { %838 = vadd.xlane.f32.xlu1 %v837_v10 }
 0x293   : > { %895 = vrot.lane.b32.xlu1 %v757_v42, %s2331_s22 }
 0x297   : > { %1032 = vrot.lane.b32.xlu1 %v758_v43, %s2333_s24 }
 0x29b   : > { %1029 = vrot.lane.b32.xlu1 %v757_v42, %s2333_s24 }
 0x29f   : > { %1163 = vrot.lane.b32.xlu1 %v757_v42, %s2332_s30 }
 0x30b   : > { %v836_v11 = vpop.xlane.xlu1 %835 }
 0x30c   : > { %2276 = vrcp.f32 %v836_v11 }
 0x30f   : > { %v839_v12 = vpop.xlane.xlu1 %838 }
 0x310   : > { %2278 = vrcp.f32 %v839_v12 }
 0x313   : > { %v896_v13 = vpop.permute.xlu1 %895 }
 0x316   : > { %v2277_v16 = vpop.eup %2276 }
 0x317   : > { %v1033_v15 = vpop.permute.xlu1 %1032  ;;  %v842_v19 = vmul.f32 %v2277_v16, %v2273_v7 }
 0x318   : > { %v1038_v17 = vsel %vm773_vm1, %v1033_v15, 0 }
 0x319   : > { %2133 = vmatpush3.bf16.xpose.msra.mxu0 %v1038_v17 }
 0x31a   : > { %v2279_v18 = vpop.eup %2278  ;;  %2144 = vmatprep.subr.bf16.mxu0 %v2329_v4 }
 0x31b   : > { %v843_v20 = vmul.f32 %v2279_v18, %v2275_v9  ;;  %v1030_v25 = vpop.permute.xlu1 %1029 }
 0x31d   : > { %v844_v22 = vpack.c.bf16 %v843_v20, %v842_v19 }
 0x31f   : > { %2117 = vmatmul.mubr.msk.bf16.vlgmr.msra.gmra.mrb[8].mxu1 %vm821_vm2, %v844_v22  ;;  %v1164_v27 = vpop.permute.xlu1 %1163 }
 0x320   : > { %2121 = vmatpush3.bf16.xpose.msra.mxu1 %v904_v24  ;;  %2135 = vmatmul.mubr.msk.bf16.vlgmr.msra.gmra.mrb[4].mxu0 %vm773_vm1, %v1030_v25 }
 0x321   : > { %2145 = vmatpush3.bf16.xpose.msra.mxu0 %v1172_v26  ;;  %2122 = vmatprep.mubr.msk.bf16.mxu1 %vm2330_vm0, %v2329_v4 }
 0x322   : > { %2146 = vmatprep.mubr.msk.bf16.mxu0 %vm2330_vm0, %v2329_v4  ;;  %2126 = vmatprep.subr.bf16.mxu1 %v2329_v4 }
 0x323   : > { %2156 = vmatprep.subr.bf16.mxu0 %v2329_v4 }
 0x327   : > { %2123 = vmatmul.mubr.msk.bf16.vlgmr.msra.gmra.mrb[12].mxu1 %vm773_vm1, %v896_v13 }
 0x328   : > { %2147 = vmatmul.mubr.msk.bf16.vlgmr.msra.gmra.mrb[8].mxu0 %vm773_vm1, %v1164_v27  ;;  %2128 = vmatprep.mubr.msk.bf16.mxu1 %vm2330_vm0, %v2329_v4 }
 0x329   : > { %2172 = vmatprep.mubr.msk.bf16.mxu0 %vm2330_vm0, %v2329_v4 }
 0x3f2   : > { %v882_v30 = vpop.f32.mrb[8].mxu1 }
 0x3f3   : > { %v2118_v32 = vpop.f32.mrb[9].mxu1  ;;  %v1074_v33 = vpop.f32.mrb[4].mxu0 }
 0x3f4   : > { %v885_v34 = vpop.f32.mrb[10].mxu1  ;;  %v2136_v35 = vpop.f32.mrb[5].mxu0  ;;  %v1075_v46 = vadd.f32 %v2547_v54, %v1074_v33 }
 0x3f5   : > { %v889_v36 = vpack.c.bf16 %v885_v34, %v882_v30  ;;  %v2119_v37 = vpop.f32.mrb[11].mxu1  ;;  %v1077_v38 = vpop.f32.mrb[6].mxu0 }
 0x3f6   : > { %v2137_v39 = vpop.f32.mrb[7].mxu0  ;;  %v1078_v56 = vadd.f32 %v2547_v54, %v1077_v38  ;;  %v1081_v57 = vsel %vm821_vm2, %v1075_v46, -inf }
 0x3f7   : > { %890 = vst.msk [vmem:[#allocation3] sm:$0xff] %vm773_vm1, %v889_v36 }
 0x3f8   : > { %v1084_v60 = vsel %vm821_vm2, %v1078_v56, -inf }
 0x3fa   : > { %v940_v40 = vpop.f32.mrb[12].mxu1 }
 0x3fb   : > { %v941_v41 = vadd.f32 %v2547_v54, %v940_v40  ;;  %v2124_v42 = vpop.f32.mrb[13].mxu1  ;;  %v1208_v43 = vpop.f32.mrb[8].mxu0 }
 0x3fc   : > { %v943_v44 = vpop.f32.mrb[14].mxu1  ;;  %v2148_v45 = vpop.f32.mrb[9].mxu0  ;;  %v1209_v59 = vadd.f32 %v2547_v54, %v1208_v43 }
 0x3fd   : > { %v944_v47 = vadd.f32 %v2547_v54, %v943_v44  ;;  %v2125_v48 = vpop.f32.mrb[15].mxu1  ;;  %v1211_v49 = vpop.f32.mrb[10].mxu0  ;;  %v947_v50 = vsel %vm821_vm2, %v941_v41, -inf }
 0x3fe   : > { %v2149_v51 = vpop.f32.mrb[11].mxu0  ;;  %948 = vmax.xlane.f32.xlu0 %v947_v50  ;;  %v1212_v52 = vadd.f32 %v2547_v54, %v1211_v49  ;;  %v1215_v61 = vsel %vm821_vm2, %v1209_v59, -inf }
 0x3ff   : > { %v950_v55 = vsel %vm821_vm2, %v944_v47, -inf }
 0x400   : > { %951 = vmax.xlane.f32.xlu1 %v950_v55  ;;  %v1218_v58 = vsel %vm821_vm2, %v1212_v52, -inf }
 0x402   : > { %1082 = vmax.xlane.f32.xlu0 %v1081_v57 }
 0x404   : > { %1219 = vmax.xlane.f32.xlu1 %v1218_v58  ;;  %v2223_v58 = vld [vmem:[%s2791_s4] sm:$0xff]  }
 0x405   : > { %2157 = vmatpush3.bf16.msra.mxu0 %v2223_v58  ;;  %v2252_v58 = vld [vmem:[%s2795_s8 + $0x70] ss:$8 sps:$4 sm:$0xff]  }
 0x406   : > { %1085 = vmax.xlane.f32.xlu0 %v1084_v60  ;;  %2158 = vmatprep.subr.bf16.mxu0 %v2329_v4  ;;  %v2225_v60 = vld [vmem:[%s2791_s4 + $0x10] sm:$0xff]  }
 0x40a   : > { %1216 = vmax.xlane.f32.xlu0 %v1215_v61 }
 0x48b   : > { %v949_v62 = vpop.xlane.xlu0 %948 }
 0x48c   : > { %v953_v9 = vsub.f32 %v941_v41, %v949_v62  ;;  %v2227_v62 = vld [vmem:[%s2791_s4 + $0x20] sm:$0xff]  }
 0x48d   : > { %v952_v63 = vpop.xlane.xlu1 %951 }
 0x48e   : > { %v954_v10 = vsub.f32 %v944_v47, %v952_v63  ;;  %v955_v14 = vmul.f32 1.442695, %v953_v9 }
 0x48f   : > { %v1083_v0 = vpop.xlane.xlu0 %1082 }
 0x490   : > { %v1087_v1 = vsub.f32 %v1075_v46, %v1083_v0  ;;  %v957_v15 = vmul.f32 1.442695, %v954_v10  ;;  %v2230_v10 = vld [vmem:[%s2791_s4 + $0x38] sm:$0xff]  }
 0x491   : > { %v1220_v3 = vpop.xlane.xlu1 %1219 }
 0x492   : > { %v1089_v5 = vmul.f32 1.442695, %v1087_v1  ;;  %v1222_v6 = vsub.f32 %v1212_v52, %v1220_v3  ;;  %v2228_v1 = vld [vmem:[%s2791_s4 + $0x28] sm:$0xff]  }
 0x493   : > { %v1086_v7 = vpop.xlane.xlu0 %1085 }
 0x494   : > { %2280 = vpow2.f32 %v1089_v5  ;;  %v1088_v8 = vsub.f32 %v1078_v56, %v1086_v7  ;;  %v1225_v11 = vmul.f32 1.442695, %v1222_v6  ;;  %v2229_v7 = vld [vmem:[%s2791_s4 + $0x30] sm:$0xff]  }
 0x496   : > { %v1091_v54 = vmul.f32 1.442695, %v1088_v8 }
 0x497   : > { %v1217_v12 = vpop.xlane.xlu0 %1216 }
 0x498   : > { %2282 = vpow2.f32 %v1091_v54  ;;  %v1221_v13 = vsub.f32 %v1209_v59, %v1217_v12  ;;  %v2224_v59 = vld [vmem:[%s2791_s4 + $0x8] sm:$0xff]  }
 0x499   : > { %2284 = vpow2.f32 %v1225_v11  ;;  %2159 = vmatpush3.bf16.msra.mxu0 %v2224_v59 }
 0x49a   : > { %v1223_v16 = vmul.f32 1.442695, %v1221_v13  ;;  %2160 = vmatprep.subr.bf16.mxu0 %v2329_v4 }
 0x49c   : > { %2286 = vpow2.f32 %v1223_v16 }
 0x49d   : > { %2288 = vpow2.f32 %v955_v14  ;;  %2161 = vmatpush3.bf16.msra.mxu0 %v2225_v60 }
 0x49e   : > { %v2281_v17 = vpop.eup %2280  ;;  %2290 = vpow2.f32 %v957_v15  ;;  %2162 = vmatprep.subr.bf16.mxu0 %v2329_v4 }
 0x49f   : > { %v1093_v18 = vsel %vm821_vm2, %v2281_v17, 0.0 }
 0x4a0   : > { %1094 = vadd.xlane.f32.xlu0 %v1093_v18 }
 0x4a2   : > { %v2283_v19 = vpop.eup %2282 }
 0x4a3   : > { %v1096_v20 = vsel %vm821_vm2, %v2283_v19, 0.0  ;;  %v2285_v21 = vpop.eup %2284 }
 0x4a4   : > { %1097 = vadd.xlane.f32.xlu1 %v1096_v20  ;;  %v1230_v26 = vsel %vm821_vm2, %v2285_v21, 0.0  ;;  %v1975_v20 = vld [vmem:[%s2792_s5] ss:$0 sm:$0xff] }
 0x4a6   : > { %v2287_v22 = vpop.eup %2286 }
 0x4a7   : > { %v2289_v24 = vpop.eup %2288  ;;  %v1227_v25 = vsel %vm821_vm2, %v2287_v22, 0.0 }
 0x4a8   : > { %v2291_v27 = vpop.eup %2290  ;;  %1228 = vadd.xlane.f32.xlu0 %v1227_v25  ;;  %1231 = vadd.xlane.f32.xlu1 %v1230_v26  ;;  %v959_v30 = vsel %vm821_vm2, %v2289_v24, 0.0  ;;  %v489_v26 = vunpack.c.h.bf16 %v2496_v23 }
 0x4a9   : > { %v962_v32 = vsel %vm821_vm2, %v2291_v27, 0.0 }
 0x4ac   : > { %960 = vadd.xlane.f32.xlu0 %v959_v30  ;;  %963 = vadd.xlane.f32.xlu1 %v962_v32 }
 0x4bd   : > { %1105 = vrot.lane.b32.xlu1 %v2538_v53, %s2333_s24 }
 0x4c1   : > { %1239 = vrot.lane.b32.xlu1 %v2538_v53, %s2332_s30 }
 0x4c2   : > { %971 = vrot.lane.b32.xlu0 %v2538_v53, %s2331_s22 }
 0x52d   : > { %v1095_v33 = vpop.xlane.xlu0 %1094 }
 0x531   : > { %v1098_v34 = vpop.xlane.xlu1 %1097 }
 0x535   : > { %v1229_v35 = vpop.xlane.xlu0 %1228  ;;  %v1232_v36 = vpop.xlane.xlu1 %1231 }
 0x539   : > { %v961_v37 = vpop.xlane.xlu0 %960  ;;  %v964_v38 = vpop.xlane.xlu1 %963 }
 0x53a   : > { %2292 = vrcp.f32 %v961_v37  ;;  %v2236_v37 = vld [vmem:[%s2795_s8 + $0x14] ss:$8 sps:$4 sm:$0xff]  }
 0x53b   : > { %2294 = vrcp.f32 %v964_v38 }
 0x53c   : > { %2296 = vrcp.f32 %v1098_v34 }
 0x53d   : > { %v972_v39 = vpop.permute.xlu0 %971  ;;  %2298 = vrcp.f32 %v1095_v33  ;;  %v1106_v45 = vpop.permute.xlu1 %1105 }
 0x53e   : > { %2127 = vmatpush3.bf16.msra.mxu1 %v972_v39  ;;  %2300 = vrcp.f32 %v1229_v35  ;;  %v2231_v35 = vld [vmem:[%s2795_s8] ss:$8 sps:$4 sm:$0xff]  }
 0x53f   : > { %2138 = vmatprep.subr.bf16.mxu1 %v2329_v4  ;;  %2302 = vrcp.f32 %v1232_v36  ;;  %v2233_v36 = vld [vmem:[%s2795_s8 + $0x4] ss:$8 sps:$4 sm:$0xff]  }
 0x541   : > { %v1240_v52 = vpop.permute.xlu1 %1239 }
 0x544   : > { %v2293_v40 = vpop.eup %2292 }
 0x545   : > { %v2295_v41 = vpop.eup %2294  ;;  %v967_v42 = vmul.f32 %v2293_v40, %v2289_v24 }
 0x546   : > { %v968_v43 = vmul.f32 %v2295_v41, %v2291_v27  ;;  %v2297_v44 = vpop.eup %2296 }
 0x547   : > { %v2299_v46 = vpop.eup %2298  ;;  %v1102_v47 = vmul.f32 %v2297_v44, %v2283_v19 }
 0x548   : > { %v969_v53 = vpack.c.bf16 %v968_v43, %v967_v42  ;;  %v1101_v48 = vmul.f32 %v2299_v46, %v2281_v17  ;;  %v2301_v49 = vpop.eup %2300  ;;  %v2237_v46 = vld [vmem:[%s2795_s8 + $0x20] ss:$8 sps:$4 sm:$0xff]  }
 0x549   : > { %v2303_v51 = vpop.eup %2302  ;;  %v1235_v55 = vmul.f32 %v2301_v49, %v2287_v22  ;;  %v2245_v49 = vld [vmem:[%s2795_s8 + $0x44] ss:$8 sps:$4 sm:$0xff]  }
 0x54a   : > { %2129 = vmatmul.mubr.msk.bf16.vlgmr.msra.gmra.mrb[16].mxu1 %vm821_vm2, %v969_v53  ;;  %v1103_v50 = vpack.c.bf16 %v1102_v47, %v1101_v48  ;;  %v1236_v56 = vmul.f32 %v2303_v51, %v2285_v21  ;;  %v488_v21 = vunpack.c.l.bf16 %v2496_v23  ;;  %v2234_v23 = vld [vmem:[%s2795_s8 + $0x10] ss:$8 sps:$4 sm:$0xff]   ;;  %v2242_v47 = vld [vmem:[%s2795_s8 + $0x34] ss:$8 sps:$4 sm:$0xff]  }
 0x54b   : > { %2139 = vmatpush3.bf16.msra.mxu1 %v1106_v45  ;;  %2140 = vmatprep.mubr.msk.bf16.mxu1 %vm2330_vm0, %v2329_v4  ;;  %v2239_v45 = vld [vmem:[%s2795_s8 + $0x24] ss:$8 sps:$4 sm:$0xff]   ;;  %v2240_v48 = vld [vmem:[%s2795_s8 + $0x30] ss:$8 sps:$4 sm:$0xff]   ;;  %v2248_v51 = vld [vmem:[%s2795_s8 + $0x54] ss:$8 sps:$4 sm:$0xff]  }
 0x54c   : > { %2150 = vmatprep.subr.bf16.mxu1 %v2329_v4  ;;  %v1237_v57 = vpack.c.bf16 %v1236_v56, %v1235_v55  ;;  %v2251_v55 = vld [vmem:[%s2795_s8 + $0x64] ss:$8 sps:$4 sm:$0xff]   ;;  %v2249_v56 = vld [vmem:[%s2795_s8 + $0x60] ss:$8 sps:$4 sm:$0xff]  }
 0x552   : > { %2141 = vmatmul.mubr.msk.bf16.vlgmr.msra.gmra.mrb[20].mxu1 %vm821_vm2, %v1103_v50  ;;  %v2243_v50 = vld [vmem:[%s2795_s8 + $0x40] ss:$8 sps:$4 sm:$0xff]  }
 0x553   : > { %2151 = vmatpush3.bf16.msra.mxu1 %v1240_v52  ;;  %2152 = vmatprep.mubr.msk.bf16.mxu1 %vm2330_vm0, %v2329_v4  ;;  %v2246_v52 = vld [vmem:[%s2795_s8 + $0x50] ss:$8 sps:$4 sm:$0xff]  }
 0x554   : > { %1558 = vmatprep.subr.bf16.mxu1 %v2233_v36 }
 0x55a   : > { %2153 = vmatmul.mubr.msk.bf16.vlgmr.msra.gmra.mrb[24].mxu1 %vm821_vm2, %v1237_v57  ;;  %v2254_v57 = vld [vmem:[%s2795_s8 + $0x74] ss:$8 sps:$4 sm:$0xff]  }
 0x55b   : > { %1590 = vmatprep.mubr.bf16.mxu1 %v2328_v2  ;;  %v2226_v2 = vld [vmem:[%s2791_s4 + $0x18] sm:$0xff]   ;;  %1559 = vmatpush1.bf16.msra.mxu1 %v2231_v35 }
 0x55c   : > { %2163 = vmatpush3.bf16.msra.mxu0 %v2226_v2  ;;  %1560 = vmatprep.subr.bf16.mxu1 %v2236_v37 }
 0x55d   : > { %2164 = vmatprep.subr.bf16.mxu0 %v2329_v4 }
 0x55f   : > { %1561 = vmatpush1.bf16.msra.mxu1 %v2234_v23 }
 0x560   : > { %2165 = vmatpush3.bf16.msra.mxu0 %v2227_v62  ;;  %1562 = vmatprep.subr.bf16.mxu1 %v2239_v45 }
 0x561   : > { %2166 = vmatprep.subr.bf16.mxu0 %v2329_v4 }
 0x563   : > { %1563 = vmatpush1.bf16.msra.mxu1 %v2237_v46 }
 0x564   : > { %2167 = vmatpush3.bf16.msra.mxu0 %v2228_v1  ;;  %1564 = vmatprep.subr.bf16.mxu1 %v2242_v47 }
 0x565   : > { %2168 = vmatprep.subr.bf16.mxu0 %v2329_v4 }
 0x567   : > { %1565 = vmatpush1.bf16.msra.mxu1 %v2240_v48 }
 0x568   : > { %2169 = vmatpush3.bf16.msra.mxu0 %v2229_v7  ;;  %1566 = vmatprep.subr.bf16.mxu1 %v2245_v49 }
 0x569   : > { %2170 = vmatprep.subr.bf16.mxu0 %v2329_v4 }
 0x56b   : > { %1567 = vmatpush1.bf16.msra.mxu1 %v2243_v50 }
 0x56c   : > { %2171 = vmatpush3.bf16.msra.mxu0 %v2230_v10  ;;  %1568 = vmatprep.subr.bf16.mxu1 %v2248_v51 }
 0x56f   : > { %1569 = vmatpush1.bf16.msra.mxu1 %v2246_v52 }
 0x570   : > { %1570 = vmatprep.subr.bf16.mxu1 %v2251_v55 }
 0x573   : > { %1571 = vmatpush1.bf16.msra.mxu1 %v2249_v56 }
 0x574   : > { %1572 = vmatprep.subr.bf16.mxu1 %v2254_v57 }
 0x577   : > { %1573 = vmatpush1.bf16.msra.mxu1 %v2252_v58 }
 0x61d   : > { %v1011_v61 = vpop.f32.mrb[16].mxu1 }
 0x61e   : > { %v2130_v63 = vpop.f32.mrb[17].mxu1 }
 0x61f   : > { %v1014_v0 = vpop.f32.mrb[18].mxu1 }
 0x620   : > { %v1018_v3 = vpack.c.bf16 %v1014_v0, %v1011_v61  ;;  %v2131_v5 = vpop.f32.mrb[19].mxu1 }
 0x622   : > { %1020 = vrot.lane.b32.xlu1 %v1018_v3, %s2332_s30  ;;  %v1984_v3 = vld [vmem:[%s2793_s6] ss:$0 sm:$0xff] }
 0x625   : > { %v1145_v6 = vpop.f32.mrb[20].mxu1 }
 0x626   : > { %v2142_v8 = vpop.f32.mrb[21].mxu1 }
 0x627   : > { %v1148_v9 = vpop.f32.mrb[22].mxu1  ;;  %v1985_v8 = vld [vmem:[%s2794_s7] ss:$0 sm:$0xff] }
 0x628   : > { %v1152_v11 = vpack.c.bf16 %v1148_v9, %v1145_v6  ;;  %v2143_v54 = vpop.f32.mrb[23].mxu1 }
 0x62a   : > { %1154 = vrot.lane.b32.xlu0 %v1152_v11, %s2333_s24 }
 0x62d   : > { %v1279_v12 = vpop.f32.mrb[24].mxu1 }
 0x62e   : > { %v2154_v13 = vpop.f32.mrb[25].mxu1 }
 0x62f   : > { %v1282_v14 = vpop.f32.mrb[26].mxu1  ;;  %v2256_v13 = vld [vmem:[%s2797_s10] sm:$0xff]  }
 0x630   : > { %v1286_v15 = vpack.c.bf16 %v1282_v14, %v1279_v12  ;;  %v2155_v16 = vpop.f32.mrb[27].mxu1  ;;  %v2255_v12 = vld [vmem:[%s2797_s10 + $0x40] sm:$0xff]   ;;  %v2257_v14 = vld [vmem:[%s2797_s10 + $0x48] sm:$0xff]  }
 0x631   : > { %2066 = vmatprep.subr.bf16.mxu0 %v2255_v12  ;;  %v2259_v16 = vld [vmem:[%s2797_s10 + $0x50] sm:$0xff]  }
 0x632   : > { %1288 = vrot.lane.b32.xlu1 %v1286_v15, %s2331_s22  ;;  %v2258_v15 = vld [vmem:[%s2797_s10 + $0x8] sm:$0xff]   ;;  %s483_s22 = scalar_lea.vmem %s2801_s14, %s1938_s25 }
 0x694   : > { %v1021_v17 = vpop.permute.xlu1 %1020 }
 0x695   : > { %1024 = vst.msk [vmem:[#allocation3] sm:$0xff] %vm1023_vm3, %v1021_v17  ;;  %v2260_v17 = vld [vmem:[%s2797_s10 + $0x10] sm:$0xff]  }
 0x69c   : > { %v1155_v18 = vpop.permute.xlu0 %1154 }
 0x69d   : > { %1158 = vst.msk [vmem:[#allocation3] sm:$0xff] %vm1157_vm4, %v1155_v18  ;;  %v2261_v18 = vld [vmem:[%s2797_s10 + $0x58] sm:$0xff]  }
 0x6a4   : > { %v1289_v19 = vpop.permute.xlu1 %1288 }
 0x6a5   : > { %1292 = vst.msk [vmem:[#allocation3] sm:$0xff] %vm1291_vm5, %v1289_v19  ;;  %v2262_v19 = vld [vmem:[%s2797_s10 + $0x18] sm:$0xff]  }
 0x6ac   : > { %v1293_v4 = vld [vmem:[#allocation3] sm:$0xff] }
 0x6ad   : > { %2173 = vmatmul.mubr.bf16.vlgmr.msra.gmra.mrb[12].mxu0 %v1293_v4  ;;  %v2263_v4 = vld [vmem:[%s2797_s10 + $0x60] sm:$0xff]  }
 0x6ae   : > { %2067 = vmatpush3.bf16.msra.mxu0 %v2256_v13 }
 0x6af   : > { %2068 = vmatprep.subr.bf16.mxu0 %v2257_v14 }
 0x6b2   : > { %2069 = vmatpush3.bf16.msra.mxu0 %v2258_v15 }
 0x6b3   : > { %2070 = vmatprep.subr.bf16.mxu0 %v2259_v16  ;;  %v2002_v16 = vld [vmem:[%s2798_s11] ss:$0 sm:$0xff] }
 0x6b6   : > { %2071 = vmatpush3.bf16.msra.mxu0 %v2260_v17 }
 0x6b7   : > { %2072 = vmatprep.subr.bf16.mxu0 %v2261_v18 }
 0x6ba   : > { %2073 = vmatpush3.bf16.msra.mxu0 %v2262_v19 }
 0x6bb   : > { %2074 = vmatprep.subr.bf16.mxu0 %v2263_v4 }
 0x780   : > { %v1399_v22 = vpop.f32.mrb[12].mxu0 }
 0x781   : > { %v1400_v24 = vadd.f32 %v1975_v20, %v1399_v22  ;;  %v2174_v25 = vpop.f32.mrb[13].mxu0  ;;  %v2266_v22 = vld [vmem:[%s2797_s10 + $0x28] sm:$0xff]  }
 0x782   : > { %v1402_v27 = vpop.f32.mrb[14].mxu0  ;;  %v2268_v25 = vld [vmem:[%s2797_s10 + $0x30] sm:$0xff]  }
 0x783   : > { %v1403_v30 = vadd.f32 %v1975_v20, %v1402_v27  ;;  %v2175_v32 = vpop.f32.mrb[15].mxu0  ;;  %v1406_v33 = vadd.f32 %v1400_v24, %v488_v21  ;;  %v2264_v20 = vld [vmem:[%s2797_s10 + $0x20] sm:$0xff]   ;;  %v2265_v21 = vld [vmem:[%s2797_s10 + $0x68] sm:$0xff]   ;;  %v2267_v24 = vld [vmem:[%s2797_s10 + $0x70] sm:$0xff]  }
 0x784   : > { %2075 = vmatpush3.bf16.msra.mxu0 %v2264_v20  ;;  %v2270_v27 = vld [vmem:[%s2797_s10 + $0x38] sm:$0xff]  }
 0x785   : > { %1410 = vadd.xlane.f32.xlu0 %v1406_v33  ;;  %v1407_v34 = vadd.f32 %v1403_v30, %v489_v26  ;;  %2076 = vmatprep.subr.bf16.mxu0 %v2265_v21  ;;  %v2269_v26 = vld [vmem:[%s2797_s10 + $0x78] sm:$0xff]   ;;  %v1466_v30 = vld [vmem:[%s2796_s9] sm:$0x3] }
 0x786   : > { %v1471_v32 = vrot.slane %v1466_v30, %v526_v29 }
 0x787   : > { %1412 = vadd.xlane.f32.xlu1 %v1407_v34 }
 0x788   : > { %2077 = vmatpush3.bf16.msra.mxu0 %v2266_v22 }
 0x789   : > { %2078 = vmatprep.subr.bf16.mxu0 %v2267_v24 }
 0x78c   : > { %2079 = vmatpush3.bf16.msra.mxu0 %v2268_v25 }
 0x78d   : > { %2080 = vmatprep.subr.bf16.mxu0 %v2269_v26 }
 0x790   : > { %2081 = vmatpush3.bf16.msra.mxu0 %v2270_v27 }
 0x812   : > { %v1411_v38 = vpop.xlane.xlu0 %1410 }
 0x813   : > { %v1415_v39 = vmul.f32 0.0078125, %v1411_v38 }
 0x814   : > { %v1413_v40 = vpop.xlane.xlu1 %1412 }
 0x815   : > { %v1417_v41 = vsub.f32 %v1406_v33, %v1415_v39  ;;  %v1416_v42 = vmul.f32 0.0078125, %v1413_v40  ;;  %v1475_v33 = vrot.slane %v1466_v30, %v530_v31 }
 0x817   : > { %v1418_v43 = vsub.f32 %v1407_v34, %v1416_v42  ;;  %v1419_v53 = vmul.f32 %v1417_v41, %v1417_v41 }
 0x819   : > { %1421 = vadd.xlane.f32.xlu0 %v1419_v53  ;;  %v1420_v44 = vmul.f32 %v1418_v43, %v1418_v43 }
 0x81d   : > { %1423 = vadd.xlane.f32.xlu0 %v1420_v44 }
 0x8a6   : > { %v1422_v59 = vpop.xlane.xlu0 %1421 }
 0x8a7   : > { %v1425_v60 = vmul.f32 0.0078125, %v1422_v59 }
 0x8a9   : > { %v1427_v2 = vadd.f32 1e-05, %v1425_v60 }
 0x8aa   : > { %v1424_v61 = vpop.xlane.xlu0 %1423 }
 0x8ab   : > { %2304 = vrsqrt.f32 %v1427_v2  ;;  %v1426_v62 = vmul.f32 0.0078125, %v1424_v61 }
 0x8ad   : > { %v1428_v63 = vadd.f32 1e-05, %v1426_v62 }
 0x8af   : > { %2306 = vrsqrt.f32 %v1428_v63 }
 0x8b5   : > { %v2305_v0 = vpop.eup %2304 }
 0x8b6   : > { %v1431_v1 = vmul.f32 %v2305_v0, %v1417_v41 }
 0x8b8   : > { %v1439_v7 = vmul.f32 %v1984_v3, %v1431_v1 }
 0x8b9   : > { %v2307_v5 = vpop.eup %2306 }
 0x8ba   : > { %v1432_v6 = vmul.f32 %v2307_v5, %v1418_v43  ;;  %v2707_v10 = vadd.f32 %v1985_v8, %v1439_v7 }
 0x8bc   : > { %v1440_v9 = vmul.f32 %v1984_v3, %v1432_v6 }
 0x8be   : > { %v2709_v11 = vadd.f32 %v1985_v8, %v1440_v9 }
 0x8c0   : > { %v1449_v54 = vpack.c.bf16 %v2709_v11, %v2707_v10 }
 0x8c2   : > { %1591 = vmatmul.mubr.bf16.vlgmr.msra.gmra.mrb[28].mxu1 %v1449_v54 }
 0x995   : > { %v1592_v34 = vpop.f32.mrb[28].mxu1 }
 0x996   : > { %v1593_v35 = vadd.f32 %v1592_v34, %v1471_v32  ;;  %v1594_v36 = vpop.f32.mrb[29].mxu1 }
 0x997   : > { %v1595_v37 = vadd.f32 %v1594_v36, %v1475_v33  ;;  %v1596_v23 = vpop.f32.mrb[30].mxu1 }
 0x998   : > { %v1601_v38 = vmul.f32 %v1593_v35, %v1593_v35  ;;  %v1597_v39 = vadd.f32 %v1596_v23, %v1471_v32  ;;  %v1598_v40 = vpop.f32.mrb[31].mxu1 }
 0x999   : > { %v1602_v41 = vmul.f32 %v1595_v37, %v1595_v37  ;;  %v1599_v42 = vadd.f32 %v1598_v40, %v1475_v33 }
 0x99a   : > { %v1605_v43 = vmul.f32 %v1601_v38, %v1593_v35  ;;  %v1603_v53 = vmul.f32 %v1597_v39, %v1597_v39 }
 0x99b   : > { %v1606_v44 = vmul.f32 %v1602_v41, %v1595_v37  ;;  %v1604_v45 = vmul.f32 %v1599_v42, %v1599_v42  ;;  %v2019_v41 = vld [vmem:[%s2799_s12] ss:$0 sm:$0xff] }
 0x99c   : > { %v1609_v46 = vmul.f32 0.044715, %v1605_v43  ;;  %v1607_v47 = vmul.f32 %v1603_v53, %v1597_v39 }
 0x99d   : > { %v1610_v29 = vmul.f32 0.044715, %v1606_v44  ;;  %v1608_v48 = vmul.f32 %v1604_v45, %v1599_v42  ;;  %v2020_v45 = vld [vmem:[%s2800_s13] ss:$0 sm:$0xff] }
 0x99e   : > { %v1613_v28 = vadd.f32 %v1609_v46, %v1593_v35  ;;  %v1611_v31 = vmul.f32 0.044715, %v1607_v47 }
 0x99f   : > { %v1614_v49 = vadd.f32 %v1610_v29, %v1595_v37  ;;  %v1612_v50 = vmul.f32 0.044715, %v1608_v48 }
 0x9a0   : > { %v1617_v51 = vmul.f32 0.7978846, %v1613_v28  ;;  %v1615_v52 = vadd.f32 %v1611_v31, %v1597_v39 }
 0x9a1   : > { %v1618_v55 = vmul.f32 0.7978846, %v1614_v49  ;;  %v1616_v56 = vadd.f32 %v1612_v50, %v1599_v42 }
 0x9a2   : > { %2308 = vtanh.f32 %v1617_v51  ;;  %v1619_v57 = vmul.f32 0.7978846, %v1615_v52 }
 0x9a3   : > { %2310 = vtanh.f32 %v1618_v55  ;;  %v1620_v58 = vmul.f32 0.7978846, %v1616_v56 }
 0x9a4   : > { %2312 = vtanh.f32 %v1619_v57 }
 0x9a5   : > { %2314 = vtanh.f32 %v1620_v58 }
 0x9ac   : > { %v2309_v59 = vpop.eup %2308 }
 0x9ad   : > { %v2311_v60 = vpop.eup %2310  ;;  %v1625_v2 = vadd.f32 1.0, %v2309_v59 }
 0x9ae   : > { %v2313_v61 = vpop.eup %2312  ;;  %v1626_v62 = vadd.f32 1.0, %v2311_v60 }
 0x9af   : > { %v2315_v63 = vpop.eup %2314  ;;  %v1629_v0 = vmul.f32 0.5, %v1625_v2  ;;  %v1627_v1 = vadd.f32 1.0, %v2313_v61 }
 0x9b0   : > { %v1628_v3 = vadd.f32 1.0, %v2315_v63  ;;  %v1630_v5 = vmul.f32 0.5, %v1626_v62 }
 0x9b1   : > { %v1631_v6 = vmul.f32 0.5, %v1627_v1  ;;  %v1633_v8 = vmul.f32 %v1629_v0, %v1593_v35 }
 0x9b2   : > { %v1632_v7 = vmul.f32 0.5, %v1628_v3  ;;  %v1634_v54 = vmul.f32 %v1630_v5, %v1595_v37 }
 0x9b3   : > { %v1635_v9 = vmul.f32 %v1631_v6, %v1597_v39 }
 0x9b4   : > { %v1636_v12 = vmul.f32 %v1632_v7, %v1599_v42 }
 0x9b5   : > { %v1637_v13 = vpack.c.bf16 %v1635_v9, %v1633_v8 }
 0x9b6   : > { %v1638_v14 = vpack.c.bf16 %v1636_v12, %v1634_v54 }
 0x9b8   : > { %1806 = vmatprep.mubr.bf16.mxu0 %v1638_v14 }
 0x9b9   : > { %1807 = vmatmul.mubr.bf16.vlgmr.msra.gmra.mrb[16].mxu0 %v1637_v13 }
 0xa8c   : > { %v2082_v15 = vpop.f32.mrb[16].mxu0 }
 0xa8d   : > { %v2083_v17 = vpop.f32.mrb[17].mxu0 }
 0xa8e   : > { %v2084_v18 = vadd.f32 %v2083_v17, %v2082_v15  ;;  %v2085_v19 = vpop.f32.mrb[18].mxu0 }
 0xa8f   : > { %v2086_v4 = vpop.f32.mrb[19].mxu0 }
 0xa90   : > { %v1809_v20 = vadd.f32 %v2084_v18, %v2002_v16  ;;  %v2087_v21 = vadd.f32 %v2086_v4, %v2085_v19 }
 0xa92   : > { %v1812_v22 = vadd.f32 %v2087_v21, %v2002_v16  ;;  %v1815_v24 = vadd.f32 %v1809_v20, %v2707_v10 }
 0xa94   : > { %1819 = vadd.xlane.f32.xlu0 %v1815_v24  ;;  %v1816_v25 = vadd.f32 %v1812_v22, %v2709_v11 }
 0xa96   : > { %1821 = vadd.xlane.f32.xlu1 %v1816_v25 }
 0xb21   : > { %v1820_v26 = vpop.xlane.xlu0 %1819 }
 0xb22   : > { %v1823_v27 = vmul.f32 0.0078125, %v1820_v26 }
 0xb23   : > { %v1822_v30 = vpop.xlane.xlu1 %1821 }
 0xb24   : > { %v1825_v32 = vsub.f32 %v1815_v24, %v1823_v27  ;;  %v1824_v33 = vmul.f32 0.0078125, %v1822_v30 }
 0xb26   : > { %v1826_v34 = vsub.f32 %v1816_v25, %v1824_v33  ;;  %v1827_v35 = vmul.f32 %v1825_v32, %v1825_v32 }
 0xb28   : > { %1829 = vadd.xlane.f32.xlu0 %v1827_v35  ;;  %v1828_v36 = vmul.f32 %v1826_v34, %v1826_v34 }
 0xb2a   : > { %1831 = vadd.xlane.f32.xlu1 %v1828_v36 }
 0xbb5   : > { %v1830_v37 = vpop.xlane.xlu0 %1829 }
 0xbb6   : > { %v1833_v23 = vmul.f32 0.0078125, %v1830_v37 }
 0xbb7   : > { %v1832_v38 = vpop.xlane.xlu1 %1831 }
 0xbb8   : > { %v1835_v39 = vadd.f32 1e-05, %v1833_v23  ;;  %v1834_v10 = vmul.f32 0.0078125, %v1832_v38 }
 0xbba   : > { %2316 = vrsqrt.f32 %v1835_v39  ;;  %v1836_v40 = vadd.f32 1e-05, %v1834_v10 }
 0xbbc   : > { %2318 = vrsqrt.f32 %v1836_v40 }
 0xbc4   : > { %v2317_v11 = vpop.eup %2316 }
 0xbc5   : > { %v1839_v42 = vmul.f32 %v2317_v11, %v1825_v32 }
 0xbc6   : > { %v2319_v43 = vpop.eup %2318 }
 0xbc7   : > { %v1847_v53 = vmul.f32 %v2019_v41, %v1839_v42  ;;  %v1840_v44 = vmul.f32 %v2319_v43, %v1826_v34 }
 0xbc9   : > { %v1848_v46 = vmul.f32 %v2019_v41, %v1840_v44  ;;  %v1855_v47 = vadd.f32 %v2020_v45, %v1847_v53 }
 0xbcb   : > { %v1856_v29 = vadd.f32 %v2020_v45, %v1848_v46 }
 0xbcd   : > { %v2030_v48 = vpack.c.bf16 %v1856_v29, %v1855_v47 }
 0xbcf   : > { %2031 = vst [vmem:[%s483_s22] sm:$0xff] %v2030_v48  }
 0xbd0 PF: > { %s24_s29 = sadd.s32 1, %s2326_s29  }
 0xbd1   : > { %p21_p5 = scmp.ge.s32.totalorder %s24_s29, 4  }
 0xbd3   :  { %23 = sbr.rel (!%p21_p5) target bundleno = 1 (0x1), region = 109 }

</bundles_post_ra>
